<compile_context>
chip_gen: v7x
topology: tpu7x:2x2x1
jax: 0.10.0
libtpu: 0.0.40
codegen_flags: <defaults>
</compile_context>

<pallas_src>
import functools

import jax
import jax.numpy as jnp
from jax.experimental import pallas as pl
from jax.experimental.pallas import tpu as pltpu


def _round_up(x, m):
    return ((x + m - 1) // m) * m


# ----------------------------- fused Pallas kernel --------------------------

def _cross_attn_kernel(
    # per-batch inputs (blocked over the grid axis)
    struct_ref, tok_ref,
    # shared inputs
    mask_ref,
    lin1_w_ref, lin1_b_ref, emb_ref,
    ca_wq_ref, ca_bq_ref, ca_wkv_ref, ca_bkv_ref, ca_wo_ref, ca_bo_ref,
    wqkv_ref, bqkv_ref, wo_ref, bo_ref,
    ln1_g_ref, ln1_b_ref, w1_ref, b1_ref, w2_ref, b2_ref, ln2_g_ref, ln2_b_ref,
    lin2_w_ref, lin2_b_ref,
    # output
    out_ref,
    *, n_head, n_layer, eps):
    f32 = jnp.float32

    x_struct = struct_ref[0]                      # (L, d_struct)
    L = x_struct.shape[0]
    E = lin1_w_ref.shape[1]
    V = emb_ref.shape[0]                          # padded vocab rows
    dh = E // n_head
    scale = 1.0 / float(dh) ** 0.5

    # ---------------- Linear1 (struct projection) ----------------
    s = jnp.dot(x_struct, lin1_w_ref[...],
                preferred_element_type=f32) + lin1_b_ref[...]          # (L, E)

    # ---------------- Embedding via one-hot matmul ----------------
    tok = tok_ref[0]                                                   # (L, 1) int32
    onehot = jnp.where(
        jax.lax.broadcasted_iota(jnp.int32, (L, V), 1) == tok, 1.0, 0.0
    ).astype(f32)                                                      # (L, V)
    seq = jnp.dot(onehot, emb_ref[...], preferred_element_type=f32)    # (L, E)

    # ---------------- helpers (values only, fully in-VMEM) ----------------
    def attention(q, k, v, wo, bo, mask):
        # q/k/v: (L, E); 1/sqrt(dh) already folded into q by the caller.
        o = None
        for h in range(n_head):
            sl = slice(h * dh, (h + 1) * dh)
            qh, kh, vh = q[:, sl], k[:, sl], v[:, sl]
            # scores: contract last dims directly (no transpose/relayout)
            sc = jax.lax.dot_general(qh, kh, (((1,), (1,)), ((), ())),
                                     preferred_element_type=f32)       # (L, L)
            if mask is not None:
                sc = sc + mask
            sc = sc - jnp.max(sc, axis=-1, keepdims=True)
            p = jnp.exp(sc)
            p = p * pl.reciprocal(jnp.sum(p, axis=-1, keepdims=True),
                                  approx=True)
            ctx_h = jnp.dot(p, vh, preferred_element_type=f32)         # (L, dh)
            # fold the head-concat into the output projection:
            part = jnp.dot(ctx_h, wo[sl, :], preferred_element_type=f32)
            o = part if o is None else o + part
        return o + bo

    def layer_norm(x, g, b):
        mu = jnp.mean(x, axis=-1, keepdims=True)
        xc = x - mu
        var = jnp.mean(xc * xc, axis=-1, keepdims=True)
        return xc * jax.lax.rsqrt(var + eps) * g + b

    # ---------------- cross attention (query=struct, key/value=seq) --------
    q = (jnp.dot(s, ca_wq_ref[...], preferred_element_type=f32)
         + ca_bq_ref[...]) * scale
    kv = jnp.dot(seq, ca_wkv_ref[...],
                 preferred_element_type=f32) + ca_bkv_ref[...]
    cross = attention(q, kv[:, :E], kv[:, E:],
                      ca_wo_ref[...], ca_bo_ref[...], mask=None)
    x = seq + cross

    attn_mask = mask_ref[...]                                          # (L, L)

    # ---------------- transformer encoder stack (post-norm, relu) ----------
    for layer in range(n_layer):
        qkv = jnp.dot(x, wqkv_ref[layer],
                      preferred_element_type=f32) + bqkv_ref[layer]    # (L, 3E)
        qs = qkv[:, :E] * scale
        ks = qkv[:, E:2 * E]
        vs = qkv[:, 2 * E:]
        attn = attention(qs, ks, vs, wo_ref[layer], bo_ref[layer], attn_mask)
        x = layer_norm(x + attn, ln1_g_ref[layer], ln1_b_ref[layer])
        h1 = jnp.maximum(
            jnp.dot(x, w1_ref[layer], preferred_element_type=f32)
            + b1_ref[layer], 0.0)
        h2 = jnp.dot(h1, w2_ref[layer],
                     preferred_element_type=f32) + b2_ref[layer]
        x = layer_norm(x + h2, ln2_g_ref[layer], ln2_b_ref[layer])

    # ---------------- Linear2 (lane-dense, vocab padded to 128) ------------
    out = jnp.dot(x, lin2_w_ref[...],
                  preferred_element_type=f32) + lin2_b_ref[...]        # (L, Vp)
    out_ref[0] = out.astype(out_ref.dtype)


# ----------------------------- JAX wrapper ----------------------------------

def cross_attn_forward(params, struct, seq_tokens, seq_mask, *, n_head, n_vocab):
    """struct: (L, N, d_struct), seq_tokens: (L, N) int32, seq_mask: (L, L) additive.
    Returns (L, N, n_vocab)."""
    L, N, _ = struct.shape
    v_out_pad = params["lin2_w"].shape[1]
    n_layer = params["wqkv"].shape[0]

    # batch-major layout so the grid blocks over the leading axis
    struct_b = jnp.transpose(struct, (1, 0, 2))               # (N, L, d_struct)
    tok_b = jnp.transpose(seq_tokens, (1, 0))[..., None]      # (N, L, 1) int32

    inputs = [
        struct_b, tok_b, seq_mask,
        params["lin1_w"], params["lin1_b"], params["emb"],
        params["ca_wq"], params["ca_bq"], params["ca_wkv"], params["ca_bkv"],
        params["ca_wo"], params["ca_bo"],
        params["wqkv"], params["bqkv"], params["wo"], params["bo"],
        params["ln1_g"], params["ln1_b"], params["w1"], params["b1"],
        params["w2"], params["b2"], params["ln2_g"], params["ln2_b"],
        params["lin2_w"], params["lin2_b"],
    ]

    def batch_spec(a):
        nd = a.ndim
        blk = (1,) + a.shape[1:]
        return pl.BlockSpec(blk, lambda i, _nd=nd: (i,) + (0,) * (_nd - 1))

    def const_spec(a):
        nd = a.ndim
        return pl.BlockSpec(a.shape, lambda i, _nd=nd: (0,) * _nd)

    in_specs = [batch_spec(struct_b), batch_spec(tok_b)]
    in_specs += [const_spec(a) for a in inputs[2:]]

    kernel = functools.partial(_cross_attn_kernel, n_head=n_head,
                               n_layer=n_layer, eps=1e-5)

    out = pl.pallas_call(
        kernel,
        out_shape=jax.ShapeDtypeStruct((N, L, v_out_pad), jnp.float32),
        grid=(N,),
        in_specs=in_specs,
        out_specs=pl.BlockSpec((1, L, v_out_pad), lambda i: (i, 0, 0)),
        compiler_params=pltpu.CompilerParams(
            dimension_semantics=("parallel",)),
    )(*inputs)

    # back to (L, N, n_vocab), dropping the lane padding
    return jnp.transpose(out, (1, 0, 2))[:, :, :n_vocab]


# ----------------------------- parameter init -------------------------------

def _init_linear(key, d_in, d_out):
    k1, k2 = jax.random.split(key)
    s = 1.0 / (d_in ** 0.5)
    w = jax.random.uniform(k1, (d_in, d_out), jnp.float32, -s, s)
    b = jax.random.uniform(k2, (1, d_out), jnp.float32, -s, s)
    return w, b


def _init_cross_attn(key, e):
    ks = jax.random.split(key, 3)
    wq, bq = _init_linear(ks[0], e, e)
    wkv, bkv = _init_linear(ks[1], e, 2 * e)
    wo, bo = _init_linear(ks[2], e, e)
    return dict(ca_wq=wq, ca_bq=bq, ca_wkv=wkv, ca_bkv=bkv, ca_wo=wo, ca_bo=bo)


def _init_layer(key, e, f):
    ks = jax.random.split(key, 4)
    wqkv, bqkv = _init_linear(ks[0], e, 3 * e)
    wo, bo = _init_linear(ks[1], e, e)
    w1, b1 = _init_linear(ks[2], e, f)
    w2, b2 = _init_linear(ks[3], f, e)
    ones = jnp.ones((1, e), jnp.float32)
    zeros = jnp.zeros((1, e), jnp.float32)
    return dict(wqkv=wqkv, bqkv=bqkv, wo=wo, bo=bo,
                ln1_g=ones, ln1_b=zeros, w1=w1, b1=b1, w2=w2, b2=b2,
                ln2_g=ones, ln2_b=zeros)


def init_params(key, d_struct, d_model, n_vocab, n_head, d_ffn, n_layer):
    # TODO(synk): PyTorch's nn.MultiheadAttention packs q/k/v in one in_proj
    # weight; here the packing layout (wq + wkv / wqkv) differs but the math
    # is identical.
    ks = jax.random.split(key, 4 + n_layer)
    p = {}
    p["lin1_w"], p["lin1_b"] = _init_linear(ks[0], d_struct, d_model)

    v_rows = _round_up(n_vocab, 8)                 # aligned one-hot contraction
    emb = 0.1 * jax.random.normal(ks[1], (n_vocab, d_model), jnp.float32)
    p["emb"] = jnp.zeros((v_rows, d_model), jnp.float32).at[:n_vocab].set(emb)

    p.update(_init_cross_attn(ks[2], d_model))

    layers = [_init_layer(ks[3 + i], d_model, d_ffn) for i in range(n_layer)]
    for name in layers[0]:
        p[name] = jnp.stack([lyr[name] for lyr in layers], axis=0)

    w2_, b2_ = _init_linear(ks[3 + n_layer], d_model, n_vocab)
    v_out = _round_up(n_vocab, 128)                # lane-dense output columns
    p["lin2_w"] = jnp.zeros((d_model, v_out), jnp.float32).at[:, :n_vocab].set(w2_)
    p["lin2_b"] = jnp.zeros((1, v_out), jnp.float32).at[:, :n_vocab].set(b2_)
    return p


# ----------------------------- main ------------------------------------------

if __name__ == "__main__":
    # cfg.CrossAttn: d_struct=8, d_model=32, n_vocab=21, n_head=4, d_ffn=64, nlayer=2
    L, N = 8, 2
    d_struct, d_model, n_vocab, n_head, d_ffn, n_layer = 8, 32, 21, 4, 64, 2

    key = jax.random.PRNGKey(0)
    k_param, k_struct, k_seq = jax.random.split(key, 3)

    params = init_params(k_param, d_struct, d_model, n_vocab, n_head,
                         d_ffn, n_layer)

    struct = jax.random.normal(k_struct, (L, N, d_struct), jnp.float32)
    seq_tokens = jax.random.randint(k_seq, (L, N), 0, n_vocab, dtype=jnp.int32)
    # additive square-subsequent (causal) mask for encoder self-attention
    seq_mask = jnp.where(
        jnp.triu(jnp.ones((L, L), dtype=bool), k=1), -1e9, 0.0
    ).astype(jnp.float32)

    fwd = jax.jit(functools.partial(cross_attn_forward,
                                    n_head=n_head, n_vocab=n_vocab))
    out = jax.block_until_ready(fwd(params, struct, seq_tokens, seq_mask))

    assert out.shape == (L, N, n_vocab), out.shape
    assert bool(jnp.all(jnp.isfinite(out)))
    print("KERNEL_OK")
</pallas_src>

<mosaic_0001>
module attributes {stable_mosaic.version = 11 : i64} {
  func.func @_cross_attn_kernel(%arg0: i32, %arg1: memref<1x8x8xf32, #tpu.memory_space<vmem>>, %arg2: memref<1x8x1xi32, #tpu.memory_space<vmem>>, %arg3: memref<8x8xf32, #tpu.memory_space<vmem>>, %arg4: memref<8x32xf32, #tpu.memory_space<vmem>>, %arg5: memref<1x32xf32, #tpu.memory_space<vmem>>, %arg6: memref<24x32xf32, #tpu.memory_space<vmem>>, %arg7: memref<32x32xf32, #tpu.memory_space<vmem>>, %arg8: memref<1x32xf32, #tpu.memory_space<vmem>>, %arg9: memref<32x64xf32, #tpu.memory_space<vmem>>, %arg10: memref<1x64xf32, #tpu.memory_space<vmem>>, %arg11: memref<32x32xf32, #tpu.memory_space<vmem>>, %arg12: memref<1x32xf32, #tpu.memory_space<vmem>>, %arg13: memref<2x32x96xf32, #tpu.memory_space<vmem>>, %arg14: memref<2x1x96xf32, #tpu.memory_space<vmem>>, %arg15: memref<2x32x32xf32, #tpu.memory_space<vmem>>, %arg16: memref<2x1x32xf32, #tpu.memory_space<vmem>>, %arg17: memref<2x1x32xf32, #tpu.memory_space<vmem>>, %arg18: memref<2x1x32xf32, #tpu.memory_space<vmem>>, %arg19: memref<2x32x64xf32, #tpu.memory_space<vmem>>, %arg20: memref<2x1x64xf32, #tpu.memory_space<vmem>>, %arg21: memref<2x64x32xf32, #tpu.memory_space<vmem>>, %arg22: memref<2x1x32xf32, #tpu.memory_space<vmem>>, %arg23: memref<2x1x32xf32, #tpu.memory_space<vmem>>, %arg24: memref<2x1x32xf32, #tpu.memory_space<vmem>>, %arg25: memref<32x128xf32, #tpu.memory_space<vmem>>, %arg26: memref<1x128xf32, #tpu.memory_space<vmem>>, %arg27: memref<1x8x128xf32, #tpu.memory_space<vmem>>) attributes {dimension_semantics = [#tpu.dimension_semantics<parallel>], iteration_bounds = array<i64: 2>, scalar_prefetch = 0 : i64, scratch_operands = 0 : i64, tpu.core_type = #tpu.core_type<tc>, window_params = [{transform_indices = @transform_0, window_bounds = array<i64: 1, 8, 8>}, {transform_indices = @transform_1, window_bounds = array<i64: 1, 8, 1>}, {pipeline_mode = #tpu.pipeline_mode<synchronous>, transform_indices = @transform_2, window_bounds = array<i64: 8, 8>}, {pipeline_mode = #tpu.pipeline_mode<synchronous>, transform_indices = @transform_3, window_bounds = array<i64: 8, 32>}, {pipeline_mode = #tpu.pipeline_mode<synchronous>, transform_indices = @transform_4, window_bounds = array<i64: 1, 32>}, {pipeline_mode = #tpu.pipeline_mode<synchronous>, transform_indices = @transform_5, window_bounds = array<i64: 24, 32>}, {pipeline_mode = #tpu.pipeline_mode<synchronous>, transform_indices = @transform_6, window_bounds = array<i64: 32, 32>}, {pipeline_mode = #tpu.pipeline_mode<synchronous>, transform_indices = @transform_7, window_bounds = array<i64: 1, 32>}, {pipeline_mode = #tpu.pipeline_mode<synchronous>, transform_indices = @transform_8, window_bounds = array<i64: 32, 64>}, {pipeline_mode = #tpu.pipeline_mode<synchronous>, transform_indices = @transform_9, window_bounds = array<i64: 1, 64>}, {pipeline_mode = #tpu.pipeline_mode<synchronous>, transform_indices = @transform_10, window_bounds = array<i64: 32, 32>}, {pipeline_mode = #tpu.pipeline_mode<synchronous>, transform_indices = @transform_11, window_bounds = array<i64: 1, 32>}, {pipeline_mode = #tpu.pipeline_mode<synchronous>, transform_indices = @transform_12, window_bounds = array<i64: 2, 32, 96>}, {pipeline_mode = #tpu.pipeline_mode<synchronous>, transform_indices = @transform_13, window_bounds = array<i64: 2, 1, 96>}, {pipeline_mode = #tpu.pipeline_mode<synchronous>, transform_indices = @transform_14, window_bounds = array<i64: 2, 32, 32>}, {pipeline_mode = #tpu.pipeline_mode<synchronous>, transform_indices = @transform_15, window_bounds = array<i64: 2, 1, 32>}, {pipeline_mode = #tpu.pipeline_mode<synchronous>, transform_indices = @transform_16, window_bounds = array<i64: 2, 1, 32>}, {pipeline_mode = #tpu.pipeline_mode<synchronous>, transform_indices = @transform_17, window_bounds = array<i64: 2, 1, 32>}, {pipeline_mode = #tpu.pipeline_mode<synchronous>, transform_indices = @transform_18, window_bounds = array<i64: 2, 32, 64>}, {pipeline_mode = #tpu.pipeline_mode<synchronous>, transform_indices = @transform_19, window_bounds = array<i64: 2, 1, 64>}, {pipeline_mode = #tpu.pipeline_mode<synchronous>, transform_indices = @transform_20, window_bounds = array<i64: 2, 64, 32>}, {pipeline_mode = #tpu.pipeline_mode<synchronous>, transform_indices = @transform_21, window_bounds = array<i64: 2, 1, 32>}, {pipeline_mode = #tpu.pipeline_mode<synchronous>, transform_indices = @transform_22, window_bounds = array<i64: 2, 1, 32>}, {pipeline_mode = #tpu.pipeline_mode<synchronous>, transform_indices = @transform_23, window_bounds = array<i64: 2, 1, 32>}, {pipeline_mode = #tpu.pipeline_mode<synchronous>, transform_indices = @transform_24, window_bounds = array<i64: 32, 128>}, {pipeline_mode = #tpu.pipeline_mode<synchronous>, transform_indices = @transform_25, window_bounds = array<i64: 1, 128>}, {transform_indices = @transform_26, window_bounds = array<i64: 1, 8, 128>}]} {
    %c0 = arith.constant 0 : index
    %c0_0 = arith.constant 0 : index
    %c0_1 = arith.constant 0 : index
    %0 = vector.load %arg1[%c0, %c0_0, %c0_1] : memref<1x8x8xf32, #tpu.memory_space<vmem>>, vector<1x8x8xf32>
    %1 = vector.shape_cast %0 : vector<1x8x8xf32> to vector<8x8xf32>
    %c0_2 = arith.constant 0 : index
    %c0_3 = arith.constant 0 : index
    %2 = vector.load %arg4[%c0_2, %c0_3] : memref<8x32xf32, #tpu.memory_space<vmem>>, vector<8x32xf32>
    %cst = arith.constant dense<0.000000e+00> : vector<8x32xf32>
    %3 = tpu.matmul %1, %2, %cst {dimension_numbers = #tpu.dot_dimension_numbers<[1], [0], [0], [1], [0, 0, 1, 1], [], []>} : vector<8x8xf32>, vector<8x32xf32>, vector<8x32xf32> -> vector<8x32xf32>
    %c0_4 = arith.constant 0 : index
    %c0_5 = arith.constant 0 : index
    %4 = vector.load %arg5[%c0_4, %c0_5] : memref<1x32xf32, #tpu.memory_space<vmem>>, vector<1x32xf32>
    %5 = vector.broadcast %4 : vector<1x32xf32> to vector<8x32xf32>
    %6 = arith.addf %3, %5 : vector<8x32xf32>
    %c0_6 = arith.constant 0 : index
    %c0_7 = arith.constant 0 : index
    %c0_8 = arith.constant 0 : index
    %7 = vector.load %arg2[%c0_6, %c0_7, %c0_8] : memref<1x8x1xi32, #tpu.memory_space<vmem>>, vector<1x8x1xi32>
    %8 = vector.shape_cast %7 : vector<1x8x1xi32> to vector<8x1xi32>
    %9 = tpu.iota {dimensions = array<i32: 1>} : vector<8x24xi32>
    %10 = vector.broadcast %8 : vector<8x1xi32> to vector<8x24xi32>
    %11 = arith.cmpi eq, %9, %10 : vector<8x24xi32>
    %cst_9 = arith.constant 1.000000e+00 : f32
    %cst_10 = arith.constant 0.000000e+00 : f32
    %12 = vector.broadcast %cst_9 : f32 to vector<8x24xf32>
    %13 = vector.broadcast %cst_10 : f32 to vector<8x24xf32>
    %14 = arith.select %11, %12, %13 : vector<8x24xi1>, vector<8x24xf32>
    %c0_11 = arith.constant 0 : index
    %c0_12 = arith.constant 0 : index
    %15 = vector.load %arg6[%c0_11, %c0_12] : memref<24x32xf32, #tpu.memory_space<vmem>>, vector<24x32xf32>
    %cst_13 = arith.constant dense<0.000000e+00> : vector<8x32xf32>
    %16 = tpu.matmul %14, %15, %cst_13 {dimension_numbers = #tpu.dot_dimension_numbers<[1], [0], [0], [1], [0, 0, 1, 1], [], []>} : vector<8x24xf32>, vector<24x32xf32>, vector<8x32xf32> -> vector<8x32xf32>
    %c0_14 = arith.constant 0 : index
    %c0_15 = arith.constant 0 : index
    %17 = vector.load %arg7[%c0_14, %c0_15] : memref<32x32xf32, #tpu.memory_space<vmem>>, vector<32x32xf32>
    %cst_16 = arith.constant dense<0.000000e+00> : vector<8x32xf32>
    %18 = tpu.matmul %6, %17, %cst_16 {dimension_numbers = #tpu.dot_dimension_numbers<[1], [0], [0], [1], [0, 0, 1, 1], [], []>} : vector<8x32xf32>, vector<32x32xf32>, vector<8x32xf32> -> vector<8x32xf32>
    %c0_17 = arith.constant 0 : index
    %c0_18 = arith.constant 0 : index
    %19 = vector.load %arg8[%c0_17, %c0_18] : memref<1x32xf32, #tpu.memory_space<vmem>>, vector<1x32xf32>
    %20 = vector.broadcast %19 : vector<1x32xf32> to vector<8x32xf32>
    %21 = arith.addf %18, %20 : vector<8x32xf32>
    %cst_19 = arith.constant 0.353553385 : f32
    %22 = vector.broadcast %cst_19 : f32 to vector<8x32xf32>
    %23 = arith.mulf %21, %22 : vector<8x32xf32>
    %c0_20 = arith.constant 0 : index
    %c0_21 = arith.constant 0 : index
    %24 = vector.load %arg9[%c0_20, %c0_21] : memref<32x64xf32, #tpu.memory_space<vmem>>, vector<32x64xf32>
    %cst_22 = arith.constant dense<0.000000e+00> : vector<8x64xf32>
    %25 = tpu.matmul %16, %24, %cst_22 {dimension_numbers = #tpu.dot_dimension_numbers<[1], [0], [0], [1], [0, 0, 1, 1], [], []>} : vector<8x32xf32>, vector<32x64xf32>, vector<8x64xf32> -> vector<8x64xf32>
    %c0_23 = arith.constant 0 : index
    %c0_24 = arith.constant 0 : index
    %26 = vector.load %arg10[%c0_23, %c0_24] : memref<1x64xf32, #tpu.memory_space<vmem>>, vector<1x64xf32>
    %27 = vector.broadcast %26 : vector<1x64xf32> to vector<8x64xf32>
    %28 = arith.addf %25, %27 : vector<8x64xf32>
    %29 = vector.extract_strided_slice %28 {offsets = [0, 0], sizes = [8, 32], strides = [1, 1]} : vector<8x64xf32> to vector<8x32xf32>
    %30 = vector.extract_strided_slice %28 {offsets = [0, 32], sizes = [8, 32], strides = [1, 1]} : vector<8x64xf32> to vector<8x32xf32>
    %c0_25 = arith.constant 0 : index
    %c0_26 = arith.constant 0 : index
    %31 = vector.load %arg11[%c0_25, %c0_26] : memref<32x32xf32, #tpu.memory_space<vmem>>, vector<32x32xf32>
    %c0_27 = arith.constant 0 : index
    %c0_28 = arith.constant 0 : index
    %32 = vector.load %arg12[%c0_27, %c0_28] : memref<1x32xf32, #tpu.memory_space<vmem>>, vector<1x32xf32>
    %33 = vector.extract_strided_slice %23 {offsets = [0, 0], sizes = [8, 8], strides = [1, 1]} : vector<8x32xf32> to vector<8x8xf32>
    %34 = vector.extract_strided_slice %29 {offsets = [0, 0], sizes = [8, 8], strides = [1, 1]} : vector<8x32xf32> to vector<8x8xf32>
    %35 = vector.extract_strided_slice %30 {offsets = [0, 0], sizes = [8, 8], strides = [1, 1]} : vector<8x32xf32> to vector<8x8xf32>
    %cst_29 = arith.constant dense<0.000000e+00> : vector<8x8xf32>
    %36 = tpu.matmul %33, %34, %cst_29 {dimension_numbers = #tpu.dot_dimension_numbers<[1], [1], [0], [0], [0, 0, 1, 0], [], []>} : vector<8x8xf32>, vector<8x8xf32>, vector<8x8xf32> -> vector<8x8xf32>
    %cst_30 = arith.constant dense<0xFF800000> : vector<8xf32>
    %37 = vector.multi_reduction <maximumf>, %36, %cst_30 [1] : vector<8x8xf32> to vector<8xf32>
    %38 = vector.shape_cast %37 : vector<8xf32> to vector<8x1xf32>
    %39 = vector.broadcast %38 : vector<8x1xf32> to vector<8x8xf32>
    %40 = arith.subf %36, %39 : vector<8x8xf32>
    %41 = math.exp %40 : vector<8x8xf32>
    %cst_31 = arith.constant dense<0.000000e+00> : vector<8xf32>
    %42 = vector.multi_reduction <add>, %41, %cst_31 [1] : vector<8x8xf32> to vector<8xf32>
    %43 = vector.shape_cast %42 : vector<8xf32> to vector<8x1xf32>
    %44 = tpu.reciprocal %43 {approx = true} : vector<8x1xf32> -> vector<8x1xf32>
    %45 = vector.broadcast %44 : vector<8x1xf32> to vector<8x8xf32>
    %46 = arith.mulf %41, %45 : vector<8x8xf32>
    %cst_32 = arith.constant dense<0.000000e+00> : vector<8x8xf32>
    %47 = tpu.matmul %46, %35, %cst_32 {dimension_numbers = #tpu.dot_dimension_numbers<[1], [0], [0], [1], [0, 0, 1, 1], [], []>} : vector<8x8xf32>, vector<8x8xf32>, vector<8x8xf32> -> vector<8x8xf32>
    %48 = vector.extract_strided_slice %31 {offsets = [0, 0], sizes = [8, 32], strides = [1, 1]} : vector<32x32xf32> to vector<8x32xf32>
    %cst_33 = arith.constant dense<0.000000e+00> : vector<8x32xf32>
    %49 = tpu.matmul %47, %48, %cst_33 {dimension_numbers = #tpu.dot_dimension_numbers<[1], [0], [0], [1], [0, 0, 1, 1], [], []>} : vector<8x8xf32>, vector<8x32xf32>, vector<8x32xf32> -> vector<8x32xf32>
    %50 = vector.extract_strided_slice %23 {offsets = [0, 8], sizes = [8, 8], strides = [1, 1]} : vector<8x32xf32> to vector<8x8xf32>
    %51 = vector.extract_strided_slice %29 {offsets = [0, 8], sizes = [8, 8], strides = [1, 1]} : vector<8x32xf32> to vector<8x8xf32>
    %52 = vector.extract_strided_slice %30 {offsets = [0, 8], sizes = [8, 8], strides = [1, 1]} : vector<8x32xf32> to vector<8x8xf32>
    %cst_34 = arith.constant dense<0.000000e+00> : vector<8x8xf32>
    %53 = tpu.matmul %50, %51, %cst_34 {dimension_numbers = #tpu.dot_dimension_numbers<[1], [1], [0], [0], [0, 0, 1, 0], [], []>} : vector<8x8xf32>, vector<8x8xf32>, vector<8x8xf32> -> vector<8x8xf32>
    %cst_35 = arith.constant dense<0xFF800000> : vector<8xf32>
    %54 = vector.multi_reduction <maximumf>, %53, %cst_35 [1] : vector<8x8xf32> to vector<8xf32>
    %55 = vector.shape_cast %54 : vector<8xf32> to vector<8x1xf32>
    %56 = vector.broadcast %55 : vector<8x1xf32> to vector<8x8xf32>
    %57 = arith.subf %53, %56 : vector<8x8xf32>
    %58 = math.exp %57 : vector<8x8xf32>
    %cst_36 = arith.constant dense<0.000000e+00> : vector<8xf32>
    %59 = vector.multi_reduction <add>, %58, %cst_36 [1] : vector<8x8xf32> to vector<8xf32>
    %60 = vector.shape_cast %59 : vector<8xf32> to vector<8x1xf32>
    %61 = tpu.reciprocal %60 {approx = true} : vector<8x1xf32> -> vector<8x1xf32>
    %62 = vector.broadcast %61 : vector<8x1xf32> to vector<8x8xf32>
    %63 = arith.mulf %58, %62 : vector<8x8xf32>
    %cst_37 = arith.constant dense<0.000000e+00> : vector<8x8xf32>
    %64 = tpu.matmul %63, %52, %cst_37 {dimension_numbers = #tpu.dot_dimension_numbers<[1], [0], [0], [1], [0, 0, 1, 1], [], []>} : vector<8x8xf32>, vector<8x8xf32>, vector<8x8xf32> -> vector<8x8xf32>
    %65 = vector.extract_strided_slice %31 {offsets = [8, 0], sizes = [8, 32], strides = [1, 1]} : vector<32x32xf32> to vector<8x32xf32>
    %cst_38 = arith.constant dense<0.000000e+00> : vector<8x32xf32>
    %66 = tpu.matmul %64, %65, %cst_38 {dimension_numbers = #tpu.dot_dimension_numbers<[1], [0], [0], [1], [0, 0, 1, 1], [], []>} : vector<8x8xf32>, vector<8x32xf32>, vector<8x32xf32> -> vector<8x32xf32>
    %67 = arith.addf %49, %66 : vector<8x32xf32>
    %68 = vector.extract_strided_slice %23 {offsets = [0, 16], sizes = [8, 8], strides = [1, 1]} : vector<8x32xf32> to vector<8x8xf32>
    %69 = vector.extract_strided_slice %29 {offsets = [0, 16], sizes = [8, 8], strides = [1, 1]} : vector<8x32xf32> to vector<8x8xf32>
    %70 = vector.extract_strided_slice %30 {offsets = [0, 16], sizes = [8, 8], strides = [1, 1]} : vector<8x32xf32> to vector<8x8xf32>
    %cst_39 = arith.constant dense<0.000000e+00> : vector<8x8xf32>
    %71 = tpu.matmul %68, %69, %cst_39 {dimension_numbers = #tpu.dot_dimension_numbers<[1], [1], [0], [0], [0, 0, 1, 0], [], []>} : vector<8x8xf32>, vector<8x8xf32>, vector<8x8xf32> -> vector<8x8xf32>
    %cst_40 = arith.constant dense<0xFF800000> : vector<8xf32>
    %72 = vector.multi_reduction <maximumf>, %71, %cst_40 [1] : vector<8x8xf32> to vector<8xf32>
    %73 = vector.shape_cast %72 : vector<8xf32> to vector<8x1xf32>
    %74 = vector.broadcast %73 : vector<8x1xf32> to vector<8x8xf32>
    %75 = arith.subf %71, %74 : vector<8x8xf32>
    %76 = math.exp %75 : vector<8x8xf32>
    %cst_41 = arith.constant dense<0.000000e+00> : vector<8xf32>
    %77 = vector.multi_reduction <add>, %76, %cst_41 [1] : vector<8x8xf32> to vector<8xf32>
    %78 = vector.shape_cast %77 : vector<8xf32> to vector<8x1xf32>
    %79 = tpu.reciprocal %78 {approx = true} : vector<8x1xf32> -> vector<8x1xf32>
    %80 = vector.broadcast %79 : vector<8x1xf32> to vector<8x8xf32>
    %81 = arith.mulf %76, %80 : vector<8x8xf32>
    %cst_42 = arith.constant dense<0.000000e+00> : vector<8x8xf32>
    %82 = tpu.matmul %81, %70, %cst_42 {dimension_numbers = #tpu.dot_dimension_numbers<[1], [0], [0], [1], [0, 0, 1, 1], [], []>} : vector<8x8xf32>, vector<8x8xf32>, vector<8x8xf32> -> vector<8x8xf32>
    %83 = vector.extract_strided_slice %31 {offsets = [16, 0], sizes = [8, 32], strides = [1, 1]} : vector<32x32xf32> to vector<8x32xf32>
    %cst_43 = arith.constant dense<0.000000e+00> : vector<8x32xf32>
    %84 = tpu.matmul %82, %83, %cst_43 {dimension_numbers = #tpu.dot_dimension_numbers<[1], [0], [0], [1], [0, 0, 1, 1], [], []>} : vector<8x8xf32>, vector<8x32xf32>, vector<8x32xf32> -> vector<8x32xf32>
    %85 = arith.addf %67, %84 : vector<8x32xf32>
    %86 = vector.extract_strided_slice %23 {offsets = [0, 24], sizes = [8, 8], strides = [1, 1]} : vector<8x32xf32> to vector<8x8xf32>
    %87 = vector.extract_strided_slice %29 {offsets = [0, 24], sizes = [8, 8], strides = [1, 1]} : vector<8x32xf32> to vector<8x8xf32>
    %88 = vector.extract_strided_slice %30 {offsets = [0, 24], sizes = [8, 8], strides = [1, 1]} : vector<8x32xf32> to vector<8x8xf32>
    %cst_44 = arith.constant dense<0.000000e+00> : vector<8x8xf32>
    %89 = tpu.matmul %86, %87, %cst_44 {dimension_numbers = #tpu.dot_dimension_numbers<[1], [1], [0], [0], [0, 0, 1, 0], [], []>} : vector<8x8xf32>, vector<8x8xf32>, vector<8x8xf32> -> vector<8x8xf32>
    %cst_45 = arith.constant dense<0xFF800000> : vector<8xf32>
    %90 = vector.multi_reduction <maximumf>, %89, %cst_45 [1] : vector<8x8xf32> to vector<8xf32>
    %91 = vector.shape_cast %90 : vector<8xf32> to vector<8x1xf32>
    %92 = vector.broadcast %91 : vector<8x1xf32> to vector<8x8xf32>
    %93 = arith.subf %89, %92 : vector<8x8xf32>
    %94 = math.exp %93 : vector<8x8xf32>
    %cst_46 = arith.constant dense<0.000000e+00> : vector<8xf32>
    %95 = vector.multi_reduction <add>, %94, %cst_46 [1] : vector<8x8xf32> to vector<8xf32>
    %96 = vector.shape_cast %95 : vector<8xf32> to vector<8x1xf32>
    %97 = tpu.reciprocal %96 {approx = true} : vector<8x1xf32> -> vector<8x1xf32>
    %98 = vector.broadcast %97 : vector<8x1xf32> to vector<8x8xf32>
    %99 = arith.mulf %94, %98 : vector<8x8xf32>
    %cst_47 = arith.constant dense<0.000000e+00> : vector<8x8xf32>
    %100 = tpu.matmul %99, %88, %cst_47 {dimension_numbers = #tpu.dot_dimension_numbers<[1], [0], [0], [1], [0, 0, 1, 1], [], []>} : vector<8x8xf32>, vector<8x8xf32>, vector<8x8xf32> -> vector<8x8xf32>
    %101 = vector.extract_strided_slice %31 {offsets = [24, 0], sizes = [8, 32], strides = [1, 1]} : vector<32x32xf32> to vector<8x32xf32>
    %cst_48 = arith.constant dense<0.000000e+00> : vector<8x32xf32>
    %102 = tpu.matmul %100, %101, %cst_48 {dimension_numbers = #tpu.dot_dimension_numbers<[1], [0], [0], [1], [0, 0, 1, 1], [], []>} : vector<8x8xf32>, vector<8x32xf32>, vector<8x32xf32> -> vector<8x32xf32>
    %103 = arith.addf %85, %102 : vector<8x32xf32>
    %104 = vector.broadcast %32 : vector<1x32xf32> to vector<8x32xf32>
    %105 = arith.addf %103, %104 : vector<8x32xf32>
    %106 = arith.addf %16, %105 : vector<8x32xf32>
    %c0_49 = arith.constant 0 : index
    %c0_50 = arith.constant 0 : index
    %107 = vector.load %arg3[%c0_49, %c0_50] : memref<8x8xf32, #tpu.memory_space<vmem>>, vector<8x8xf32>
    %c0_51 = arith.constant 0 : index
    %c0_52 = arith.constant 0 : index
    %c0_53 = arith.constant 0 : index
    %108 = vector.load %arg13[%c0_51, %c0_52, %c0_53] : memref<2x32x96xf32, #tpu.memory_space<vmem>>, vector<1x32x96xf32>
    %109 = vector.shape_cast %108 : vector<1x32x96xf32> to vector<32x96xf32>
    %cst_54 = arith.constant dense<0.000000e+00> : vector<8x96xf32>
    %110 = tpu.matmul %106, %109, %cst_54 {dimension_numbers = #tpu.dot_dimension_numbers<[1], [0], [0], [1], [0, 0, 1, 1], [], []>} : vector<8x32xf32>, vector<32x96xf32>, vector<8x96xf32> -> vector<8x96xf32>
    %c0_55 = arith.constant 0 : index
    %c0_56 = arith.constant 0 : index
    %c0_57 = arith.constant 0 : index
    %111 = vector.load %arg14[%c0_55, %c0_56, %c0_57] : memref<2x1x96xf32, #tpu.memory_space<vmem>>, vector<1x1x96xf32>
    %112 = vector.shape_cast %111 : vector<1x1x96xf32> to vector<1x96xf32>
    %113 = vector.broadcast %112 : vector<1x96xf32> to vector<8x96xf32>
    %114 = arith.addf %110, %113 : vector<8x96xf32>
    %115 = vector.extract_strided_slice %114 {offsets = [0, 0], sizes = [8, 32], strides = [1, 1]} : vector<8x96xf32> to vector<8x32xf32>
    %cst_58 = arith.constant 0.353553385 : f32
    %116 = vector.broadcast %cst_58 : f32 to vector<8x32xf32>
    %117 = arith.mulf %115, %116 : vector<8x32xf32>
    %118 = vector.extract_strided_slice %114 {offsets = [0, 32], sizes = [8, 32], strides = [1, 1]} : vector<8x96xf32> to vector<8x32xf32>
    %119 = vector.extract_strided_slice %114 {offsets = [0, 64], sizes = [8, 32], strides = [1, 1]} : vector<8x96xf32> to vector<8x32xf32>
    %c0_59 = arith.constant 0 : index
    %c0_60 = arith.constant 0 : index
    %c0_61 = arith.constant 0 : index
    %120 = vector.load %arg15[%c0_59, %c0_60, %c0_61] : memref<2x32x32xf32, #tpu.memory_space<vmem>>, vector<1x32x32xf32>
    %121 = vector.shape_cast %120 : vector<1x32x32xf32> to vector<32x32xf32>
    %c0_62 = arith.constant 0 : index
    %c0_63 = arith.constant 0 : index
    %c0_64 = arith.constant 0 : index
    %122 = vector.load %arg16[%c0_62, %c0_63, %c0_64] : memref<2x1x32xf32, #tpu.memory_space<vmem>>, vector<1x1x32xf32>
    %123 = vector.shape_cast %122 : vector<1x1x32xf32> to vector<1x32xf32>
    %124 = vector.extract_strided_slice %117 {offsets = [0, 0], sizes = [8, 8], strides = [1, 1]} : vector<8x32xf32> to vector<8x8xf32>
    %125 = vector.extract_strided_slice %118 {offsets = [0, 0], sizes = [8, 8], strides = [1, 1]} : vector<8x32xf32> to vector<8x8xf32>
    %126 = vector.extract_strided_slice %119 {offsets = [0, 0], sizes = [8, 8], strides = [1, 1]} : vector<8x32xf32> to vector<8x8xf32>
    %cst_65 = arith.constant dense<0.000000e+00> : vector<8x8xf32>
    %127 = tpu.matmul %124, %125, %cst_65 {dimension_numbers = #tpu.dot_dimension_numbers<[1], [1], [0], [0], [0, 0, 1, 0], [], []>} : vector<8x8xf32>, vector<8x8xf32>, vector<8x8xf32> -> vector<8x8xf32>
    %128 = arith.addf %127, %107 : vector<8x8xf32>
    %cst_66 = arith.constant dense<0xFF800000> : vector<8xf32>
    %129 = vector.multi_reduction <maximumf>, %128, %cst_66 [1] : vector<8x8xf32> to vector<8xf32>
    %130 = vector.shape_cast %129 : vector<8xf32> to vector<8x1xf32>
    %131 = vector.broadcast %130 : vector<8x1xf32> to vector<8x8xf32>
    %132 = arith.subf %128, %131 : vector<8x8xf32>
    %133 = math.exp %132 : vector<8x8xf32>
    %cst_67 = arith.constant dense<0.000000e+00> : vector<8xf32>
    %134 = vector.multi_reduction <add>, %133, %cst_67 [1] : vector<8x8xf32> to vector<8xf32>
    %135 = vector.shape_cast %134 : vector<8xf32> to vector<8x1xf32>
    %136 = tpu.reciprocal %135 {approx = true} : vector<8x1xf32> -> vector<8x1xf32>
    %137 = vector.broadcast %136 : vector<8x1xf32> to vector<8x8xf32>
    %138 = arith.mulf %133, %137 : vector<8x8xf32>
    %cst_68 = arith.constant dense<0.000000e+00> : vector<8x8xf32>
    %139 = tpu.matmul %138, %126, %cst_68 {dimension_numbers = #tpu.dot_dimension_numbers<[1], [0], [0], [1], [0, 0, 1, 1], [], []>} : vector<8x8xf32>, vector<8x8xf32>, vector<8x8xf32> -> vector<8x8xf32>
    %140 = vector.extract_strided_slice %121 {offsets = [0, 0], sizes = [8, 32], strides = [1, 1]} : vector<32x32xf32> to vector<8x32xf32>
    %cst_69 = arith.constant dense<0.000000e+00> : vector<8x32xf32>
    %141 = tpu.matmul %139, %140, %cst_69 {dimension_numbers = #tpu.dot_dimension_numbers<[1], [0], [0], [1], [0, 0, 1, 1], [], []>} : vector<8x8xf32>, vector<8x32xf32>, vector<8x32xf32> -> vector<8x32xf32>
    %142 = vector.extract_strided_slice %117 {offsets = [0, 8], sizes = [8, 8], strides = [1, 1]} : vector<8x32xf32> to vector<8x8xf32>
    %143 = vector.extract_strided_slice %118 {offsets = [0, 8], sizes = [8, 8], strides = [1, 1]} : vector<8x32xf32> to vector<8x8xf32>
    %144 = vector.extract_strided_slice %119 {offsets = [0, 8], sizes = [8, 8], strides = [1, 1]} : vector<8x32xf32> to vector<8x8xf32>
    %cst_70 = arith.constant dense<0.000000e+00> : vector<8x8xf32>
    %145 = tpu.matmul %142, %143, %cst_70 {dimension_numbers = #tpu.dot_dimension_numbers<[1], [1], [0], [0], [0, 0, 1, 0], [], []>} : vector<8x8xf32>, vector<8x8xf32>, vector<8x8xf32> -> vector<8x8xf32>
    %146 = arith.addf %145, %107 : vector<8x8xf32>
    %cst_71 = arith.constant dense<0xFF800000> : vector<8xf32>
    %147 = vector.multi_reduction <maximumf>, %146, %cst_71 [1] : vector<8x8xf32> to vector<8xf32>
    %148 = vector.shape_cast %147 : vector<8xf32> to vector<8x1xf32>
    %149 = vector.broadcast %148 : vector<8x1xf32> to vector<8x8xf32>
    %150 = arith.subf %146, %149 : vector<8x8xf32>
    %151 = math.exp %150 : vector<8x8xf32>
    %cst_72 = arith.constant dense<0.000000e+00> : vector<8xf32>
    %152 = vector.multi_reduction <add>, %151, %cst_72 [1] : vector<8x8xf32> to vector<8xf32>
    %153 = vector.shape_cast %152 : vector<8xf32> to vector<8x1xf32>
    %154 = tpu.reciprocal %153 {approx = true} : vector<8x1xf32> -> vector<8x1xf32>
    %155 = vector.broadcast %154 : vector<8x1xf32> to vector<8x8xf32>
    %156 = arith.mulf %151, %155 : vector<8x8xf32>
    %cst_73 = arith.constant dense<0.000000e+00> : vector<8x8xf32>
    %157 = tpu.matmul %156, %144, %cst_73 {dimension_numbers = #tpu.dot_dimension_numbers<[1], [0], [0], [1], [0, 0, 1, 1], [], []>} : vector<8x8xf32>, vector<8x8xf32>, vector<8x8xf32> -> vector<8x8xf32>
    %158 = vector.extract_strided_slice %121 {offsets = [8, 0], sizes = [8, 32], strides = [1, 1]} : vector<32x32xf32> to vector<8x32xf32>
    %cst_74 = arith.constant dense<0.000000e+00> : vector<8x32xf32>
    %159 = tpu.matmul %157, %158, %cst_74 {dimension_numbers = #tpu.dot_dimension_numbers<[1], [0], [0], [1], [0, 0, 1, 1], [], []>} : vector<8x8xf32>, vector<8x32xf32>, vector<8x32xf32> -> vector<8x32xf32>
    %160 = arith.addf %141, %159 : vector<8x32xf32>
    %161 = vector.extract_strided_slice %117 {offsets = [0, 16], sizes = [8, 8], strides = [1, 1]} : vector<8x32xf32> to vector<8x8xf32>
    %162 = vector.extract_strided_slice %118 {offsets = [0, 16], sizes = [8, 8], strides = [1, 1]} : vector<8x32xf32> to vector<8x8xf32>
    %163 = vector.extract_strided_slice %119 {offsets = [0, 16], sizes = [8, 8], strides = [1, 1]} : vector<8x32xf32> to vector<8x8xf32>
    %cst_75 = arith.constant dense<0.000000e+00> : vector<8x8xf32>
    %164 = tpu.matmul %161, %162, %cst_75 {dimension_numbers = #tpu.dot_dimension_numbers<[1], [1], [0], [0], [0, 0, 1, 0], [], []>} : vector<8x8xf32>, vector<8x8xf32>, vector<8x8xf32> -> vector<8x8xf32>
    %165 = arith.addf %164, %107 : vector<8x8xf32>
    %cst_76 = arith.constant dense<0xFF800000> : vector<8xf32>
    %166 = vector.multi_reduction <maximumf>, %165, %cst_76 [1] : vector<8x8xf32> to vector<8xf32>
    %167 = vector.shape_cast %166 : vector<8xf32> to vector<8x1xf32>
    %168 = vector.broadcast %167 : vector<8x1xf32> to vector<8x8xf32>
    %169 = arith.subf %165, %168 : vector<8x8xf32>
    %170 = math.exp %169 : vector<8x8xf32>
    %cst_77 = arith.constant dense<0.000000e+00> : vector<8xf32>
    %171 = vector.multi_reduction <add>, %170, %cst_77 [1] : vector<8x8xf32> to vector<8xf32>
    %172 = vector.shape_cast %171 : vector<8xf32> to vector<8x1xf32>
    %173 = tpu.reciprocal %172 {approx = true} : vector<8x1xf32> -> vector<8x1xf32>
    %174 = vector.broadcast %173 : vector<8x1xf32> to vector<8x8xf32>
    %175 = arith.mulf %170, %174 : vector<8x8xf32>
    %cst_78 = arith.constant dense<0.000000e+00> : vector<8x8xf32>
    %176 = tpu.matmul %175, %163, %cst_78 {dimension_numbers = #tpu.dot_dimension_numbers<[1], [0], [0], [1], [0, 0, 1, 1], [], []>} : vector<8x8xf32>, vector<8x8xf32>, vector<8x8xf32> -> vector<8x8xf32>
    %177 = vector.extract_strided_slice %121 {offsets = [16, 0], sizes = [8, 32], strides = [1, 1]} : vector<32x32xf32> to vector<8x32xf32>
    %cst_79 = arith.constant dense<0.000000e+00> : vector<8x32xf32>
    %178 = tpu.matmul %176, %177, %cst_79 {dimension_numbers = #tpu.dot_dimension_numbers<[1], [0], [0], [1], [0, 0, 1, 1], [], []>} : vector<8x8xf32>, vector<8x32xf32>, vector<8x32xf32> -> vector<8x32xf32>
    %179 = arith.addf %160, %178 : vector<8x32xf32>
    %180 = vector.extract_strided_slice %117 {offsets = [0, 24], sizes = [8, 8], strides = [1, 1]} : vector<8x32xf32> to vector<8x8xf32>
    %181 = vector.extract_strided_slice %118 {offsets = [0, 24], sizes = [8, 8], strides = [1, 1]} : vector<8x32xf32> to vector<8x8xf32>
    %182 = vector.extract_strided_slice %119 {offsets = [0, 24], sizes = [8, 8], strides = [1, 1]} : vector<8x32xf32> to vector<8x8xf32>
    %cst_80 = arith.constant dense<0.000000e+00> : vector<8x8xf32>
    %183 = tpu.matmul %180, %181, %cst_80 {dimension_numbers = #tpu.dot_dimension_numbers<[1], [1], [0], [0], [0, 0, 1, 0], [], []>} : vector<8x8xf32>, vector<8x8xf32>, vector<8x8xf32> -> vector<8x8xf32>
    %184 = arith.addf %183, %107 : vector<8x8xf32>
    %cst_81 = arith.constant dense<0xFF800000> : vector<8xf32>
    %185 = vector.multi_reduction <maximumf>, %184, %cst_81 [1] : vector<8x8xf32> to vector<8xf32>
    %186 = vector.shape_cast %185 : vector<8xf32> to vector<8x1xf32>
    %187 = vector.broadcast %186 : vector<8x1xf32> to vector<8x8xf32>
    %188 = arith.subf %184, %187 : vector<8x8xf32>
    %189 = math.exp %188 : vector<8x8xf32>
    %cst_82 = arith.constant dense<0.000000e+00> : vector<8xf32>
    %190 = vector.multi_reduction <add>, %189, %cst_82 [1] : vector<8x8xf32> to vector<8xf32>
    %191 = vector.shape_cast %190 : vector<8xf32> to vector<8x1xf32>
    %192 = tpu.reciprocal %191 {approx = true} : vector<8x1xf32> -> vector<8x1xf32>
    %193 = vector.broadcast %192 : vector<8x1xf32> to vector<8x8xf32>
    %194 = arith.mulf %189, %193 : vector<8x8xf32>
    %cst_83 = arith.constant dense<0.000000e+00> : vector<8x8xf32>
    %195 = tpu.matmul %194, %182, %cst_83 {dimension_numbers = #tpu.dot_dimension_numbers<[1], [0], [0], [1], [0, 0, 1, 1], [], []>} : vector<8x8xf32>, vector<8x8xf32>, vector<8x8xf32> -> vector<8x8xf32>
    %196 = vector.extract_strided_slice %121 {offsets = [24, 0], sizes = [8, 32], strides = [1, 1]} : vector<32x32xf32> to vector<8x32xf32>
    %cst_84 = arith.constant dense<0.000000e+00> : vector<8x32xf32>
    %197 = tpu.matmul %195, %196, %cst_84 {dimension_numbers = #tpu.dot_dimension_numbers<[1], [0], [0], [1], [0, 0, 1, 1], [], []>} : vector<8x8xf32>, vector<8x32xf32>, vector<8x32xf32> -> vector<8x32xf32>
    %198 = arith.addf %179, %197 : vector<8x32xf32>
    %199 = vector.broadcast %123 : vector<1x32xf32> to vector<8x32xf32>
    %200 = arith.addf %198, %199 : vector<8x32xf32>
    %201 = arith.addf %106, %200 : vector<8x32xf32>
    %c0_85 = arith.constant 0 : index
    %c0_86 = arith.constant 0 : index
    %c0_87 = arith.constant 0 : index
    %202 = vector.load %arg17[%c0_85, %c0_86, %c0_87] : memref<2x1x32xf32, #tpu.memory_space<vmem>>, vector<1x1x32xf32>
    %203 = vector.shape_cast %202 : vector<1x1x32xf32> to vector<1x32xf32>
    %c0_88 = arith.constant 0 : index
    %c0_89 = arith.constant 0 : index
    %c0_90 = arith.constant 0 : index
    %204 = vector.load %arg18[%c0_88, %c0_89, %c0_90] : memref<2x1x32xf32, #tpu.memory_space<vmem>>, vector<1x1x32xf32>
    %205 = vector.shape_cast %204 : vector<1x1x32xf32> to vector<1x32xf32>
    %cst_91 = arith.constant dense<0.000000e+00> : vector<8xf32>
    %206 = vector.multi_reduction <add>, %201, %cst_91 [1] : vector<8x32xf32> to vector<8xf32>
    %207 = vector.shape_cast %206 : vector<8xf32> to vector<8x1xf32>
    %cst_92 = arith.constant 3.200000e+01 : f32
    %208 = vector.broadcast %cst_92 : f32 to vector<8x1xf32>
    %209 = arith.divf %207, %208 : vector<8x1xf32>
    %210 = vector.broadcast %209 : vector<8x1xf32> to vector<8x32xf32>
    %211 = arith.subf %201, %210 : vector<8x32xf32>
    %212 = arith.mulf %211, %211 : vector<8x32xf32>
    %cst_93 = arith.constant dense<0.000000e+00> : vector<8xf32>
    %213 = vector.multi_reduction <add>, %212, %cst_93 [1] : vector<8x32xf32> to vector<8xf32>
    %214 = vector.shape_cast %213 : vector<8xf32> to vector<8x1xf32>
    %cst_94 = arith.constant 3.200000e+01 : f32
    %215 = vector.broadcast %cst_94 : f32 to vector<8x1xf32>
    %216 = arith.divf %214, %215 : vector<8x1xf32>
    %cst_95 = arith.constant 9.99999974E-6 : f32
    %217 = vector.broadcast %cst_95 : f32 to vector<8x1xf32>
    %218 = arith.addf %216, %217 : vector<8x1xf32>
    %219 = math.rsqrt %218 : vector<8x1xf32>
    %220 = vector.broadcast %219 : vector<8x1xf32> to vector<8x32xf32>
    %221 = arith.mulf %211, %220 : vector<8x32xf32>
    %222 = vector.broadcast %203 : vector<1x32xf32> to vector<8x32xf32>
    %223 = arith.mulf %221, %222 : vector<8x32xf32>
    %224 = vector.broadcast %205 : vector<1x32xf32> to vector<8x32xf32>
    %225 = arith.addf %223, %224 : vector<8x32xf32>
    %c0_96 = arith.constant 0 : index
    %c0_97 = arith.constant 0 : index
    %c0_98 = arith.constant 0 : index
    %226 = vector.load %arg19[%c0_96, %c0_97, %c0_98] : memref<2x32x64xf32, #tpu.memory_space<vmem>>, vector<1x32x64xf32>
    %227 = vector.shape_cast %226 : vector<1x32x64xf32> to vector<32x64xf32>
    %cst_99 = arith.constant dense<0.000000e+00> : vector<8x64xf32>
    %228 = tpu.matmul %225, %227, %cst_99 {dimension_numbers = #tpu.dot_dimension_numbers<[1], [0], [0], [1], [0, 0, 1, 1], [], []>} : vector<8x32xf32>, vector<32x64xf32>, vector<8x64xf32> -> vector<8x64xf32>
    %c0_100 = arith.constant 0 : index
    %c0_101 = arith.constant 0 : index
    %c0_102 = arith.constant 0 : index
    %229 = vector.load %arg20[%c0_100, %c0_101, %c0_102] : memref<2x1x64xf32, #tpu.memory_space<vmem>>, vector<1x1x64xf32>
    %230 = vector.shape_cast %229 : vector<1x1x64xf32> to vector<1x64xf32>
    %231 = vector.broadcast %230 : vector<1x64xf32> to vector<8x64xf32>
    %232 = arith.addf %228, %231 : vector<8x64xf32>
    %cst_103 = arith.constant 0.000000e+00 : f32
    %233 = vector.broadcast %cst_103 : f32 to vector<8x64xf32>
    %234 = arith.maximumf %232, %233 : vector<8x64xf32>
    %c0_104 = arith.constant 0 : index
    %c0_105 = arith.constant 0 : index
    %c0_106 = arith.constant 0 : index
    %235 = vector.load %arg21[%c0_104, %c0_105, %c0_106] : memref<2x64x32xf32, #tpu.memory_space<vmem>>, vector<1x64x32xf32>
    %236 = vector.shape_cast %235 : vector<1x64x32xf32> to vector<64x32xf32>
    %cst_107 = arith.constant dense<0.000000e+00> : vector<8x32xf32>
    %237 = tpu.matmul %234, %236, %cst_107 {dimension_numbers = #tpu.dot_dimension_numbers<[1], [0], [0], [1], [0, 0, 1, 1], [], []>} : vector<8x64xf32>, vector<64x32xf32>, vector<8x32xf32> -> vector<8x32xf32>
    %c0_108 = arith.constant 0 : index
    %c0_109 = arith.constant 0 : index
    %c0_110 = arith.constant 0 : index
    %238 = vector.load %arg22[%c0_108, %c0_109, %c0_110] : memref<2x1x32xf32, #tpu.memory_space<vmem>>, vector<1x1x32xf32>
    %239 = vector.shape_cast %238 : vector<1x1x32xf32> to vector<1x32xf32>
    %240 = vector.broadcast %239 : vector<1x32xf32> to vector<8x32xf32>
    %241 = arith.addf %237, %240 : vector<8x32xf32>
    %242 = arith.addf %225, %241 : vector<8x32xf32>
    %c0_111 = arith.constant 0 : index
    %c0_112 = arith.constant 0 : index
    %c0_113 = arith.constant 0 : index
    %243 = vector.load %arg23[%c0_111, %c0_112, %c0_113] : memref<2x1x32xf32, #tpu.memory_space<vmem>>, vector<1x1x32xf32>
    %244 = vector.shape_cast %243 : vector<1x1x32xf32> to vector<1x32xf32>
    %c0_114 = arith.constant 0 : index
    %c0_115 = arith.constant 0 : index
    %c0_116 = arith.constant 0 : index
    %245 = vector.load %arg24[%c0_114, %c0_115, %c0_116] : memref<2x1x32xf32, #tpu.memory_space<vmem>>, vector<1x1x32xf32>
    %246 = vector.shape_cast %245 : vector<1x1x32xf32> to vector<1x32xf32>
    %cst_117 = arith.constant dense<0.000000e+00> : vector<8xf32>
    %247 = vector.multi_reduction <add>, %242, %cst_117 [1] : vector<8x32xf32> to vector<8xf32>
    %248 = vector.shape_cast %247 : vector<8xf32> to vector<8x1xf32>
    %cst_118 = arith.constant 3.200000e+01 : f32
    %249 = vector.broadcast %cst_118 : f32 to vector<8x1xf32>
    %250 = arith.divf %248, %249 : vector<8x1xf32>
    %251 = vector.broadcast %250 : vector<8x1xf32> to vector<8x32xf32>
    %252 = arith.subf %242, %251 : vector<8x32xf32>
    %253 = arith.mulf %252, %252 : vector<8x32xf32>
    %cst_119 = arith.constant dense<0.000000e+00> : vector<8xf32>
    %254 = vector.multi_reduction <add>, %253, %cst_119 [1] : vector<8x32xf32> to vector<8xf32>
    %255 = vector.shape_cast %254 : vector<8xf32> to vector<8x1xf32>
    %cst_120 = arith.constant 3.200000e+01 : f32
    %256 = vector.broadcast %cst_120 : f32 to vector<8x1xf32>
    %257 = arith.divf %255, %256 : vector<8x1xf32>
    %cst_121 = arith.constant 9.99999974E-6 : f32
    %258 = vector.broadcast %cst_121 : f32 to vector<8x1xf32>
    %259 = arith.addf %257, %258 : vector<8x1xf32>
    %260 = math.rsqrt %259 : vector<8x1xf32>
    %261 = vector.broadcast %260 : vector<8x1xf32> to vector<8x32xf32>
    %262 = arith.mulf %252, %261 : vector<8x32xf32>
    %263 = vector.broadcast %244 : vector<1x32xf32> to vector<8x32xf32>
    %264 = arith.mulf %262, %263 : vector<8x32xf32>
    %265 = vector.broadcast %246 : vector<1x32xf32> to vector<8x32xf32>
    %266 = arith.addf %264, %265 : vector<8x32xf32>
    %c1 = arith.constant 1 : index
    %c0_122 = arith.constant 0 : index
    %c0_123 = arith.constant 0 : index
    %267 = vector.load %arg13[%c1, %c0_122, %c0_123] : memref<2x32x96xf32, #tpu.memory_space<vmem>>, vector<1x32x96xf32>
    %268 = vector.shape_cast %267 : vector<1x32x96xf32> to vector<32x96xf32>
    %cst_124 = arith.constant dense<0.000000e+00> : vector<8x96xf32>
    %269 = tpu.matmul %266, %268, %cst_124 {dimension_numbers = #tpu.dot_dimension_numbers<[1], [0], [0], [1], [0, 0, 1, 1], [], []>} : vector<8x32xf32>, vector<32x96xf32>, vector<8x96xf32> -> vector<8x96xf32>
    %c1_125 = arith.constant 1 : index
    %c0_126 = arith.constant 0 : index
    %c0_127 = arith.constant 0 : index
    %270 = vector.load %arg14[%c1_125, %c0_126, %c0_127] : memref<2x1x96xf32, #tpu.memory_space<vmem>>, vector<1x1x96xf32>
    %271 = vector.shape_cast %270 : vector<1x1x96xf32> to vector<1x96xf32>
    %272 = vector.broadcast %271 : vector<1x96xf32> to vector<8x96xf32>
    %273 = arith.addf %269, %272 : vector<8x96xf32>
    %274 = vector.extract_strided_slice %273 {offsets = [0, 0], sizes = [8, 32], strides = [1, 1]} : vector<8x96xf32> to vector<8x32xf32>
    %cst_128 = arith.constant 0.353553385 : f32
    %275 = vector.broadcast %cst_128 : f32 to vector<8x32xf32>
    %276 = arith.mulf %274, %275 : vector<8x32xf32>
    %277 = vector.extract_strided_slice %273 {offsets = [0, 32], sizes = [8, 32], strides = [1, 1]} : vector<8x96xf32> to vector<8x32xf32>
    %278 = vector.extract_strided_slice %273 {offsets = [0, 64], sizes = [8, 32], strides = [1, 1]} : vector<8x96xf32> to vector<8x32xf32>
    %c1_129 = arith.constant 1 : index
    %c0_130 = arith.constant 0 : index
    %c0_131 = arith.constant 0 : index
    %279 = vector.load %arg15[%c1_129, %c0_130, %c0_131] : memref<2x32x32xf32, #tpu.memory_space<vmem>>, vector<1x32x32xf32>
    %280 = vector.shape_cast %279 : vector<1x32x32xf32> to vector<32x32xf32>
    %c1_132 = arith.constant 1 : index
    %c0_133 = arith.constant 0 : index
    %c0_134 = arith.constant 0 : index
    %281 = vector.load %arg16[%c1_132, %c0_133, %c0_134] : memref<2x1x32xf32, #tpu.memory_space<vmem>>, vector<1x1x32xf32>
    %282 = vector.shape_cast %281 : vector<1x1x32xf32> to vector<1x32xf32>
    %283 = vector.extract_strided_slice %276 {offsets = [0, 0], sizes = [8, 8], strides = [1, 1]} : vector<8x32xf32> to vector<8x8xf32>
    %284 = vector.extract_strided_slice %277 {offsets = [0, 0], sizes = [8, 8], strides = [1, 1]} : vector<8x32xf32> to vector<8x8xf32>
    %285 = vector.extract_strided_slice %278 {offsets = [0, 0], sizes = [8, 8], strides = [1, 1]} : vector<8x32xf32> to vector<8x8xf32>
    %cst_135 = arith.constant dense<0.000000e+00> : vector<8x8xf32>
    %286 = tpu.matmul %283, %284, %cst_135 {dimension_numbers = #tpu.dot_dimension_numbers<[1], [1], [0], [0], [0, 0, 1, 0], [], []>} : vector<8x8xf32>, vector<8x8xf32>, vector<8x8xf32> -> vector<8x8xf32>
    %287 = arith.addf %286, %107 : vector<8x8xf32>
    %cst_136 = arith.constant dense<0xFF800000> : vector<8xf32>
    %288 = vector.multi_reduction <maximumf>, %287, %cst_136 [1] : vector<8x8xf32> to vector<8xf32>
    %289 = vector.shape_cast %288 : vector<8xf32> to vector<8x1xf32>
    %290 = vector.broadcast %289 : vector<8x1xf32> to vector<8x8xf32>
    %291 = arith.subf %287, %290 : vector<8x8xf32>
    %292 = math.exp %291 : vector<8x8xf32>
    %cst_137 = arith.constant dense<0.000000e+00> : vector<8xf32>
    %293 = vector.multi_reduction <add>, %292, %cst_137 [1] : vector<8x8xf32> to vector<8xf32>
    %294 = vector.shape_cast %293 : vector<8xf32> to vector<8x1xf32>
    %295 = tpu.reciprocal %294 {approx = true} : vector<8x1xf32> -> vector<8x1xf32>
    %296 = vector.broadcast %295 : vector<8x1xf32> to vector<8x8xf32>
    %297 = arith.mulf %292, %296 : vector<8x8xf32>
    %cst_138 = arith.constant dense<0.000000e+00> : vector<8x8xf32>
    %298 = tpu.matmul %297, %285, %cst_138 {dimension_numbers = #tpu.dot_dimension_numbers<[1], [0], [0], [1], [0, 0, 1, 1], [], []>} : vector<8x8xf32>, vector<8x8xf32>, vector<8x8xf32> -> vector<8x8xf32>
    %299 = vector.extract_strided_slice %280 {offsets = [0, 0], sizes = [8, 32], strides = [1, 1]} : vector<32x32xf32> to vector<8x32xf32>
    %cst_139 = arith.constant dense<0.000000e+00> : vector<8x32xf32>
    %300 = tpu.matmul %298, %299, %cst_139 {dimension_numbers = #tpu.dot_dimension_numbers<[1], [0], [0], [1], [0, 0, 1, 1], [], []>} : vector<8x8xf32>, vector<8x32xf32>, vector<8x32xf32> -> vector<8x32xf32>
    %301 = vector.extract_strided_slice %276 {offsets = [0, 8], sizes = [8, 8], strides = [1, 1]} : vector<8x32xf32> to vector<8x8xf32>
    %302 = vector.extract_strided_slice %277 {offsets = [0, 8], sizes = [8, 8], strides = [1, 1]} : vector<8x32xf32> to vector<8x8xf32>
    %303 = vector.extract_strided_slice %278 {offsets = [0, 8], sizes = [8, 8], strides = [1, 1]} : vector<8x32xf32> to vector<8x8xf32>
    %cst_140 = arith.constant dense<0.000000e+00> : vector<8x8xf32>
    %304 = tpu.matmul %301, %302, %cst_140 {dimension_numbers = #tpu.dot_dimension_numbers<[1], [1], [0], [0], [0, 0, 1, 0], [], []>} : vector<8x8xf32>, vector<8x8xf32>, vector<8x8xf32> -> vector<8x8xf32>
    %305 = arith.addf %304, %107 : vector<8x8xf32>
    %cst_141 = arith.constant dense<0xFF800000> : vector<8xf32>
    %306 = vector.multi_reduction <maximumf>, %305, %cst_141 [1] : vector<8x8xf32> to vector<8xf32>
    %307 = vector.shape_cast %306 : vector<8xf32> to vector<8x1xf32>
    %308 = vector.broadcast %307 : vector<8x1xf32> to vector<8x8xf32>
    %309 = arith.subf %305, %308 : vector<8x8xf32>
    %310 = math.exp %309 : vector<8x8xf32>
    %cst_142 = arith.constant dense<0.000000e+00> : vector<8xf32>
    %311 = vector.multi_reduction <add>, %310, %cst_142 [1] : vector<8x8xf32> to vector<8xf32>
    %312 = vector.shape_cast %311 : vector<8xf32> to vector<8x1xf32>
    %313 = tpu.reciprocal %312 {approx = true} : vector<8x1xf32> -> vector<8x1xf32>
    %314 = vector.broadcast %313 : vector<8x1xf32> to vector<8x8xf32>
    %315 = arith.mulf %310, %314 : vector<8x8xf32>
    %cst_143 = arith.constant dense<0.000000e+00> : vector<8x8xf32>
    %316 = tpu.matmul %315, %303, %cst_143 {dimension_numbers = #tpu.dot_dimension_numbers<[1], [0], [0], [1], [0, 0, 1, 1], [], []>} : vector<8x8xf32>, vector<8x8xf32>, vector<8x8xf32> -> vector<8x8xf32>
    %317 = vector.extract_strided_slice %280 {offsets = [8, 0], sizes = [8, 32], strides = [1, 1]} : vector<32x32xf32> to vector<8x32xf32>
    %cst_144 = arith.constant dense<0.000000e+00> : vector<8x32xf32>
    %318 = tpu.matmul %316, %317, %cst_144 {dimension_numbers = #tpu.dot_dimension_numbers<[1], [0], [0], [1], [0, 0, 1, 1], [], []>} : vector<8x8xf32>, vector<8x32xf32>, vector<8x32xf32> -> vector<8x32xf32>
    %319 = arith.addf %300, %318 : vector<8x32xf32>
    %320 = vector.extract_strided_slice %276 {offsets = [0, 16], sizes = [8, 8], strides = [1, 1]} : vector<8x32xf32> to vector<8x8xf32>
    %321 = vector.extract_strided_slice %277 {offsets = [0, 16], sizes = [8, 8], strides = [1, 1]} : vector<8x32xf32> to vector<8x8xf32>
    %322 = vector.extract_strided_slice %278 {offsets = [0, 16], sizes = [8, 8], strides = [1, 1]} : vector<8x32xf32> to vector<8x8xf32>
    %cst_145 = arith.constant dense<0.000000e+00> : vector<8x8xf32>
    %323 = tpu.matmul %320, %321, %cst_145 {dimension_numbers = #tpu.dot_dimension_numbers<[1], [1], [0], [0], [0, 0, 1, 0], [], []>} : vector<8x8xf32>, vector<8x8xf32>, vector<8x8xf32> -> vector<8x8xf32>
    %324 = arith.addf %323, %107 : vector<8x8xf32>
    %cst_146 = arith.constant dense<0xFF800000> : vector<8xf32>
    %325 = vector.multi_reduction <maximumf>, %324, %cst_146 [1] : vector<8x8xf32> to vector<8xf32>
    %326 = vector.shape_cast %325 : vector<8xf32> to vector<8x1xf32>
    %327 = vector.broadcast %326 : vector<8x1xf32> to vector<8x8xf32>
    %328 = arith.subf %324, %327 : vector<8x8xf32>
    %329 = math.exp %328 : vector<8x8xf32>
    %cst_147 = arith.constant dense<0.000000e+00> : vector<8xf32>
    %330 = vector.multi_reduction <add>, %329, %cst_147 [1] : vector<8x8xf32> to vector<8xf32>
    %331 = vector.shape_cast %330 : vector<8xf32> to vector<8x1xf32>
    %332 = tpu.reciprocal %331 {approx = true} : vector<8x1xf32> -> vector<8x1xf32>
    %333 = vector.broadcast %332 : vector<8x1xf32> to vector<8x8xf32>
    %334 = arith.mulf %329, %333 : vector<8x8xf32>
    %cst_148 = arith.constant dense<0.000000e+00> : vector<8x8xf32>
    %335 = tpu.matmul %334, %322, %cst_148 {dimension_numbers = #tpu.dot_dimension_numbers<[1], [0], [0], [1], [0, 0, 1, 1], [], []>} : vector<8x8xf32>, vector<8x8xf32>, vector<8x8xf32> -> vector<8x8xf32>
    %336 = vector.extract_strided_slice %280 {offsets = [16, 0], sizes = [8, 32], strides = [1, 1]} : vector<32x32xf32> to vector<8x32xf32>
    %cst_149 = arith.constant dense<0.000000e+00> : vector<8x32xf32>
    %337 = tpu.matmul %335, %336, %cst_149 {dimension_numbers = #tpu.dot_dimension_numbers<[1], [0], [0], [1], [0, 0, 1, 1], [], []>} : vector<8x8xf32>, vector<8x32xf32>, vector<8x32xf32> -> vector<8x32xf32>
    %338 = arith.addf %319, %337 : vector<8x32xf32>
    %339 = vector.extract_strided_slice %276 {offsets = [0, 24], sizes = [8, 8], strides = [1, 1]} : vector<8x32xf32> to vector<8x8xf32>
    %340 = vector.extract_strided_slice %277 {offsets = [0, 24], sizes = [8, 8], strides = [1, 1]} : vector<8x32xf32> to vector<8x8xf32>
    %341 = vector.extract_strided_slice %278 {offsets = [0, 24], sizes = [8, 8], strides = [1, 1]} : vector<8x32xf32> to vector<8x8xf32>
    %cst_150 = arith.constant dense<0.000000e+00> : vector<8x8xf32>
    %342 = tpu.matmul %339, %340, %cst_150 {dimension_numbers = #tpu.dot_dimension_numbers<[1], [1], [0], [0], [0, 0, 1, 0], [], []>} : vector<8x8xf32>, vector<8x8xf32>, vector<8x8xf32> -> vector<8x8xf32>
    %343 = arith.addf %342, %107 : vector<8x8xf32>
    %cst_151 = arith.constant dense<0xFF800000> : vector<8xf32>
    %344 = vector.multi_reduction <maximumf>, %343, %cst_151 [1] : vector<8x8xf32> to vector<8xf32>
    %345 = vector.shape_cast %344 : vector<8xf32> to vector<8x1xf32>
    %346 = vector.broadcast %345 : vector<8x1xf32> to vector<8x8xf32>
    %347 = arith.subf %343, %346 : vector<8x8xf32>
    %348 = math.exp %347 : vector<8x8xf32>
    %cst_152 = arith.constant dense<0.000000e+00> : vector<8xf32>
    %349 = vector.multi_reduction <add>, %348, %cst_152 [1] : vector<8x8xf32> to vector<8xf32>
    %350 = vector.shape_cast %349 : vector<8xf32> to vector<8x1xf32>
    %351 = tpu.reciprocal %350 {approx = true} : vector<8x1xf32> -> vector<8x1xf32>
    %352 = vector.broadcast %351 : vector<8x1xf32> to vector<8x8xf32>
    %353 = arith.mulf %348, %352 : vector<8x8xf32>
    %cst_153 = arith.constant dense<0.000000e+00> : vector<8x8xf32>
    %354 = tpu.matmul %353, %341, %cst_153 {dimension_numbers = #tpu.dot_dimension_numbers<[1], [0], [0], [1], [0, 0, 1, 1], [], []>} : vector<8x8xf32>, vector<8x8xf32>, vector<8x8xf32> -> vector<8x8xf32>
    %355 = vector.extract_strided_slice %280 {offsets = [24, 0], sizes = [8, 32], strides = [1, 1]} : vector<32x32xf32> to vector<8x32xf32>
    %cst_154 = arith.constant dense<0.000000e+00> : vector<8x32xf32>
    %356 = tpu.matmul %354, %355, %cst_154 {dimension_numbers = #tpu.dot_dimension_numbers<[1], [0], [0], [1], [0, 0, 1, 1], [], []>} : vector<8x8xf32>, vector<8x32xf32>, vector<8x32xf32> -> vector<8x32xf32>
    %357 = arith.addf %338, %356 : vector<8x32xf32>
    %358 = vector.broadcast %282 : vector<1x32xf32> to vector<8x32xf32>
    %359 = arith.addf %357, %358 : vector<8x32xf32>
    %360 = arith.addf %266, %359 : vector<8x32xf32>
    %c1_155 = arith.constant 1 : index
    %c0_156 = arith.constant 0 : index
    %c0_157 = arith.constant 0 : index
    %361 = vector.load %arg17[%c1_155, %c0_156, %c0_157] : memref<2x1x32xf32, #tpu.memory_space<vmem>>, vector<1x1x32xf32>
    %362 = vector.shape_cast %361 : vector<1x1x32xf32> to vector<1x32xf32>
    %c1_158 = arith.constant 1 : index
    %c0_159 = arith.constant 0 : index
    %c0_160 = arith.constant 0 : index
    %363 = vector.load %arg18[%c1_158, %c0_159, %c0_160] : memref<2x1x32xf32, #tpu.memory_space<vmem>>, vector<1x1x32xf32>
    %364 = vector.shape_cast %363 : vector<1x1x32xf32> to vector<1x32xf32>
    %cst_161 = arith.constant dense<0.000000e+00> : vector<8xf32>
    %365 = vector.multi_reduction <add>, %360, %cst_161 [1] : vector<8x32xf32> to vector<8xf32>
    %366 = vector.shape_cast %365 : vector<8xf32> to vector<8x1xf32>
    %cst_162 = arith.constant 3.200000e+01 : f32
    %367 = vector.broadcast %cst_162 : f32 to vector<8x1xf32>
    %368 = arith.divf %366, %367 : vector<8x1xf32>
    %369 = vector.broadcast %368 : vector<8x1xf32> to vector<8x32xf32>
    %370 = arith.subf %360, %369 : vector<8x32xf32>
    %371 = arith.mulf %370, %370 : vector<8x32xf32>
    %cst_163 = arith.constant dense<0.000000e+00> : vector<8xf32>
    %372 = vector.multi_reduction <add>, %371, %cst_163 [1] : vector<8x32xf32> to vector<8xf32>
    %373 = vector.shape_cast %372 : vector<8xf32> to vector<8x1xf32>
    %cst_164 = arith.constant 3.200000e+01 : f32
    %374 = vector.broadcast %cst_164 : f32 to vector<8x1xf32>
    %375 = arith.divf %373, %374 : vector<8x1xf32>
    %cst_165 = arith.constant 9.99999974E-6 : f32
    %376 = vector.broadcast %cst_165 : f32 to vector<8x1xf32>
    %377 = arith.addf %375, %376 : vector<8x1xf32>
    %378 = math.rsqrt %377 : vector<8x1xf32>
    %379 = vector.broadcast %378 : vector<8x1xf32> to vector<8x32xf32>
    %380 = arith.mulf %370, %379 : vector<8x32xf32>
    %381 = vector.broadcast %362 : vector<1x32xf32> to vector<8x32xf32>
    %382 = arith.mulf %380, %381 : vector<8x32xf32>
    %383 = vector.broadcast %364 : vector<1x32xf32> to vector<8x32xf32>
    %384 = arith.addf %382, %383 : vector<8x32xf32>
    %c1_166 = arith.constant 1 : index
    %c0_167 = arith.constant 0 : index
    %c0_168 = arith.constant 0 : index
    %385 = vector.load %arg19[%c1_166, %c0_167, %c0_168] : memref<2x32x64xf32, #tpu.memory_space<vmem>>, vector<1x32x64xf32>
    %386 = vector.shape_cast %385 : vector<1x32x64xf32> to vector<32x64xf32>
    %cst_169 = arith.constant dense<0.000000e+00> : vector<8x64xf32>
    %387 = tpu.matmul %384, %386, %cst_169 {dimension_numbers = #tpu.dot_dimension_numbers<[1], [0], [0], [1], [0, 0, 1, 1], [], []>} : vector<8x32xf32>, vector<32x64xf32>, vector<8x64xf32> -> vector<8x64xf32>
    %c1_170 = arith.constant 1 : index
    %c0_171 = arith.constant 0 : index
    %c0_172 = arith.constant 0 : index
    %388 = vector.load %arg20[%c1_170, %c0_171, %c0_172] : memref<2x1x64xf32, #tpu.memory_space<vmem>>, vector<1x1x64xf32>
    %389 = vector.shape_cast %388 : vector<1x1x64xf32> to vector<1x64xf32>
    %390 = vector.broadcast %389 : vector<1x64xf32> to vector<8x64xf32>
    %391 = arith.addf %387, %390 : vector<8x64xf32>
    %cst_173 = arith.constant 0.000000e+00 : f32
    %392 = vector.broadcast %cst_173 : f32 to vector<8x64xf32>
    %393 = arith.maximumf %391, %392 : vector<8x64xf32>
    %c1_174 = arith.constant 1 : index
    %c0_175 = arith.constant 0 : index
    %c0_176 = arith.constant 0 : index
    %394 = vector.load %arg21[%c1_174, %c0_175, %c0_176] : memref<2x64x32xf32, #tpu.memory_space<vmem>>, vector<1x64x32xf32>
    %395 = vector.shape_cast %394 : vector<1x64x32xf32> to vector<64x32xf32>
    %cst_177 = arith.constant dense<0.000000e+00> : vector<8x32xf32>
    %396 = tpu.matmul %393, %395, %cst_177 {dimension_numbers = #tpu.dot_dimension_numbers<[1], [0], [0], [1], [0, 0, 1, 1], [], []>} : vector<8x64xf32>, vector<64x32xf32>, vector<8x32xf32> -> vector<8x32xf32>
    %c1_178 = arith.constant 1 : index
    %c0_179 = arith.constant 0 : index
    %c0_180 = arith.constant 0 : index
    %397 = vector.load %arg22[%c1_178, %c0_179, %c0_180] : memref<2x1x32xf32, #tpu.memory_space<vmem>>, vector<1x1x32xf32>
    %398 = vector.shape_cast %397 : vector<1x1x32xf32> to vector<1x32xf32>
    %399 = vector.broadcast %398 : vector<1x32xf32> to vector<8x32xf32>
    %400 = arith.addf %396, %399 : vector<8x32xf32>
    %401 = arith.addf %384, %400 : vector<8x32xf32>
    %c1_181 = arith.constant 1 : index
    %c0_182 = arith.constant 0 : index
    %c0_183 = arith.constant 0 : index
    %402 = vector.load %arg23[%c1_181, %c0_182, %c0_183] : memref<2x1x32xf32, #tpu.memory_space<vmem>>, vector<1x1x32xf32>
    %403 = vector.shape_cast %402 : vector<1x1x32xf32> to vector<1x32xf32>
    %c1_184 = arith.constant 1 : index
    %c0_185 = arith.constant 0 : index
    %c0_186 = arith.constant 0 : index
    %404 = vector.load %arg24[%c1_184, %c0_185, %c0_186] : memref<2x1x32xf32, #tpu.memory_space<vmem>>, vector<1x1x32xf32>
    %405 = vector.shape_cast %404 : vector<1x1x32xf32> to vector<1x32xf32>
    %cst_187 = arith.constant dense<0.000000e+00> : vector<8xf32>
    %406 = vector.multi_reduction <add>, %401, %cst_187 [1] : vector<8x32xf32> to vector<8xf32>
    %407 = vector.shape_cast %406 : vector<8xf32> to vector<8x1xf32>
    %cst_188 = arith.constant 3.200000e+01 : f32
    %408 = vector.broadcast %cst_188 : f32 to vector<8x1xf32>
    %409 = arith.divf %407, %408 : vector<8x1xf32>
    %410 = vector.broadcast %409 : vector<8x1xf32> to vector<8x32xf32>
    %411 = arith.subf %401, %410 : vector<8x32xf32>
    %412 = arith.mulf %411, %411 : vector<8x32xf32>
    %cst_189 = arith.constant dense<0.000000e+00> : vector<8xf32>
    %413 = vector.multi_reduction <add>, %412, %cst_189 [1] : vector<8x32xf32> to vector<8xf32>
    %414 = vector.shape_cast %413 : vector<8xf32> to vector<8x1xf32>
    %cst_190 = arith.constant 3.200000e+01 : f32
    %415 = vector.broadcast %cst_190 : f32 to vector<8x1xf32>
    %416 = arith.divf %414, %415 : vector<8x1xf32>
    %cst_191 = arith.constant 9.99999974E-6 : f32
    %417 = vector.broadcast %cst_191 : f32 to vector<8x1xf32>
    %418 = arith.addf %416, %417 : vector<8x1xf32>
    %419 = math.rsqrt %418 : vector<8x1xf32>
    %420 = vector.broadcast %419 : vector<8x1xf32> to vector<8x32xf32>
    %421 = arith.mulf %411, %420 : vector<8x32xf32>
    %422 = vector.broadcast %403 : vector<1x32xf32> to vector<8x32xf32>
    %423 = arith.mulf %421, %422 : vector<8x32xf32>
    %424 = vector.broadcast %405 : vector<1x32xf32> to vector<8x32xf32>
    %425 = arith.addf %423, %424 : vector<8x32xf32>
    %c0_192 = arith.constant 0 : index
    %c0_193 = arith.constant 0 : index
    %426 = vector.load %arg25[%c0_192, %c0_193] : memref<32x128xf32, #tpu.memory_space<vmem>>, vector<32x128xf32>
    %cst_194 = arith.constant dense<0.000000e+00> : vector<8x128xf32>
    %427 = tpu.matmul %425, %426, %cst_194 {dimension_numbers = #tpu.dot_dimension_numbers<[1], [0], [0], [1], [0, 0, 1, 1], [], []>} : vector<8x32xf32>, vector<32x128xf32>, vector<8x128xf32> -> vector<8x128xf32>
    %c0_195 = arith.constant 0 : index
    %c0_196 = arith.constant 0 : index
    %428 = vector.load %arg26[%c0_195, %c0_196] : memref<1x128xf32, #tpu.memory_space<vmem>>, vector<1x128xf32>
    %429 = vector.broadcast %428 : vector<1x128xf32> to vector<8x128xf32>
    %430 = arith.addf %427, %429 : vector<8x128xf32>
    %c0_197 = arith.constant 0 : index
    %c0_198 = arith.constant 0 : index
    %c0_199 = arith.constant 0 : index
    %431 = vector.load %arg27[%c0_197, %c0_198, %c0_199] : memref<1x8x128xf32, #tpu.memory_space<vmem>>, vector<1x8x128xf32>
    %432 = vector.shape_cast %431 : vector<1x8x128xf32> to vector<8x128xf32>
    %433 = vector.shape_cast %430 : vector<8x128xf32> to vector<1x8x128xf32>
    tpu.vector_store %arg27[%c0_197, %c0_198, %c0_199], %433 {strides = array<i32>} : memref<1x8x128xf32, #tpu.memory_space<vmem>>, vector<1x8x128xf32>,
    return
  }
  func.func @transform_0(%arg0: i32) -> (i32, i32, i32) {
    %c0_i32 = arith.constant 0 : i32
    %c0_i32_0 = arith.constant 0 : i32
    %c0_i32_1 = arith.constant 0 : i32
    return %arg0, %c0_i32, %c0_i32_0 : i32, i32, i32
  }
  func.func @transform_1(%arg0: i32) -> (i32, i32, i32) {
    %c0_i32 = arith.constant 0 : i32
    %c0_i32_0 = arith.constant 0 : i32
    %c0_i32_1 = arith.constant 0 : i32
    return %arg0, %c0_i32, %c0_i32_0 : i32, i32, i32
  }
  func.func @transform_2(%arg0: i32) -> (i32, i32) {
    %c0_i32 = arith.constant 0 : i32
    %c0_i32_0 = arith.constant 0 : i32
    %c0_i32_1 = arith.constant 0 : i32
    return %c0_i32, %c0_i32_0 : i32, i32
  }
  func.func @transform_3(%arg0: i32) -> (i32, i32) {
    %c0_i32 = arith.constant 0 : i32
    %c0_i32_0 = arith.constant 0 : i32
    %c0_i32_1 = arith.constant 0 : i32
    return %c0_i32, %c0_i32_0 : i32, i32
  }
  func.func @transform_4(%arg0: i32) -> (i32, i32) {
    %c0_i32 = arith.constant 0 : i32
    %c0_i32_0 = arith.constant 0 : i32
    %c0_i32_1 = arith.constant 0 : i32
    return %c0_i32, %c0_i32_0 : i32, i32
  }
  func.func @transform_5(%arg0: i32) -> (i32, i32) {
    %c0_i32 = arith.constant 0 : i32
    %c0_i32_0 = arith.constant 0 : i32
    %c0_i32_1 = arith.constant 0 : i32
    return %c0_i32, %c0_i32_0 : i32, i32
  }
  func.func @transform_6(%arg0: i32) -> (i32, i32) {
    %c0_i32 = arith.constant 0 : i32
    %c0_i32_0 = arith.constant 0 : i32
    %c0_i32_1 = arith.constant 0 : i32
    return %c0_i32, %c0_i32_0 : i32, i32
  }
  func.func @transform_7(%arg0: i32) -> (i32, i32) {
    %c0_i32 = arith.constant 0 : i32
    %c0_i32_0 = arith.constant 0 : i32
    %c0_i32_1 = arith.constant 0 : i32
    return %c0_i32, %c0_i32_0 : i32, i32
  }
  func.func @transform_8(%arg0: i32) -> (i32, i32) {
    %c0_i32 = arith.constant 0 : i32
    %c0_i32_0 = arith.constant 0 : i32
    %c0_i32_1 = arith.constant 0 : i32
    return %c0_i32, %c0_i32_0 : i32, i32
  }
  func.func @transform_9(%arg0: i32) -> (i32, i32) {
    %c0_i32 = arith.constant 0 : i32
    %c0_i32_0 = arith.constant 0 : i32
    %c0_i32_1 = arith.constant 0 : i32
    return %c0_i32, %c0_i32_0 : i32, i32
  }
  func.func @transform_10(%arg0: i32) -> (i32, i32) {
    %c0_i32 = arith.constant 0 : i32
    %c0_i32_0 = arith.constant 0 : i32
    %c0_i32_1 = arith.constant 0 : i32
    return %c0_i32, %c0_i32_0 : i32, i32
  }
  func.func @transform_11(%arg0: i32) -> (i32, i32) {
    %c0_i32 = arith.constant 0 : i32
    %c0_i32_0 = arith.constant 0 : i32
    %c0_i32_1 = arith.constant 0 : i32
    return %c0_i32, %c0_i32_0 : i32, i32
  }
  func.func @transform_12(%arg0: i32) -> (i32, i32, i32) {
    %c0_i32 = arith.constant 0 : i32
    %c0_i32_0 = arith.constant 0 : i32
    %c0_i32_1 = arith.constant 0 : i32
    %c0_i32_2 = arith.constant 0 : i32
    return %c0_i32, %c0_i32_0, %c0_i32_1 : i32, i32, i32
  }
  func.func @transform_13(%arg0: i32) -> (i32, i32, i32) {
    %c0_i32 = arith.constant 0 : i32
    %c0_i32_0 = arith.constant 0 : i32
    %c0_i32_1 = arith.constant 0 : i32
    %c0_i32_2 = arith.constant 0 : i32
    return %c0_i32, %c0_i32_0, %c0_i32_1 : i32, i32, i32
  }
  func.func @transform_14(%arg0: i32) -> (i32, i32, i32) {
    %c0_i32 = arith.constant 0 : i32
    %c0_i32_0 = arith.constant 0 : i32
    %c0_i32_1 = arith.constant 0 : i32
    %c0_i32_2 = arith.constant 0 : i32
    return %c0_i32, %c0_i32_0, %c0_i32_1 : i32, i32, i32
  }
  func.func @transform_15(%arg0: i32) -> (i32, i32, i32) {
    %c0_i32 = arith.constant 0 : i32
    %c0_i32_0 = arith.constant 0 : i32
    %c0_i32_1 = arith.constant 0 : i32
    %c0_i32_2 = arith.constant 0 : i32
    return %c0_i32, %c0_i32_0, %c0_i32_1 : i32, i32, i32
  }
  func.func @transform_16(%arg0: i32) -> (i32, i32, i32) {
    %c0_i32 = arith.constant 0 : i32
    %c0_i32_0 = arith.constant 0 : i32
    %c0_i32_1 = arith.constant 0 : i32
    %c0_i32_2 = arith.constant 0 : i32
    return %c0_i32, %c0_i32_0, %c0_i32_1 : i32, i32, i32
  }
  func.func @transform_17(%arg0: i32) -> (i32, i32, i32) {
    %c0_i32 = arith.constant 0 : i32
    %c0_i32_0 = arith.constant 0 : i32
    %c0_i32_1 = arith.constant 0 : i32
    %c0_i32_2 = arith.constant 0 : i32
    return %c0_i32, %c0_i32_0, %c0_i32_1 : i32, i32, i32
  }
  func.func @transform_18(%arg0: i32) -> (i32, i32, i32) {
    %c0_i32 = arith.constant 0 : i32
    %c0_i32_0 = arith.constant 0 : i32
    %c0_i32_1 = arith.constant 0 : i32
    %c0_i32_2 = arith.constant 0 : i32
    return %c0_i32, %c0_i32_0, %c0_i32_1 : i32, i32, i32
  }
  func.func @transform_19(%arg0: i32) -> (i32, i32, i32) {
    %c0_i32 = arith.constant 0 : i32
    %c0_i32_0 = arith.constant 0 : i32
    %c0_i32_1 = arith.constant 0 : i32
    %c0_i32_2 = arith.constant 0 : i32
    return %c0_i32, %c0_i32_0, %c0_i32_1 : i32, i32, i32
  }
  func.func @transform_20(%arg0: i32) -> (i32, i32, i32) {
    %c0_i32 = arith.constant 0 : i32
    %c0_i32_0 = arith.constant 0 : i32
    %c0_i32_1 = arith.constant 0 : i32
    %c0_i32_2 = arith.constant 0 : i32
    return %c0_i32, %c0_i32_0, %c0_i32_1 : i32, i32, i32
  }
  func.func @transform_21(%arg0: i32) -> (i32, i32, i32) {
    %c0_i32 = arith.constant 0 : i32
    %c0_i32_0 = arith.constant 0 : i32
    %c0_i32_1 = arith.constant 0 : i32
    %c0_i32_2 = arith.constant 0 : i32
    return %c0_i32, %c0_i32_0, %c0_i32_1 : i32, i32, i32
  }
  func.func @transform_22(%arg0: i32) -> (i32, i32, i32) {
    %c0_i32 = arith.constant 0 : i32
    %c0_i32_0 = arith.constant 0 : i32
    %c0_i32_1 = arith.constant 0 : i32
    %c0_i32_2 = arith.constant 0 : i32
    return %c0_i32, %c0_i32_0, %c0_i32_1 : i32, i32, i32
  }
  func.func @transform_23(%arg0: i32) -> (i32, i32, i32) {
    %c0_i32 = arith.constant 0 : i32
    %c0_i32_0 = arith.constant 0 : i32
    %c0_i32_1 = arith.constant 0 : i32
    %c0_i32_2 = arith.constant 0 : i32
    return %c0_i32, %c0_i32_0, %c0_i32_1 : i32, i32, i32
  }
  func.func @transform_24(%arg0: i32) -> (i32, i32) {
    %c0_i32 = arith.constant 0 : i32
    %c0_i32_0 = arith.constant 0 : i32
    %c0_i32_1 = arith.constant 0 : i32
    return %c0_i32, %c0_i32_0 : i32, i32
  }
  func.func @transform_25(%arg0: i32) -> (i32, i32) {
    %c0_i32 = arith.constant 0 : i32
    %c0_i32_0 = arith.constant 0 : i32
    %c0_i32_1 = arith.constant 0 : i32
    return %c0_i32, %c0_i32_0 : i32, i32
  }
  func.func @transform_26(%arg0: i32) -> (i32, i32, i32) {
    %c0_i32 = arith.constant 0 : i32
    %c0_i32_0 = arith.constant 0 : i32
    %c0_i32_1 = arith.constant 0 : i32
    return %arg0, %c0_i32, %c0_i32_0 : i32, i32, i32
  }
}

</mosaic_0001>

<bundles_post_ra>
// kernel: cross_attn_forward.1
= control target key start
LH: loop header
LB: loop body
LE: loop exit
PB: predicated region body
PF: predicated region fallthrough
CT: control target
= control target key end

     0   :  { %s7749_s0 = inlined_call_operand.vmem [shape: f32[2,8,8], index: 0, kind: input, shape index: {}]   ;;  %s7750_s1 = inlined_call_operand.vmem [shape: s32[2,8,1], index: 1, kind: input, shape index: {}]   ;;  %s7751_s2 = inlined_call_operand.vmem [shape: f32[8,8], index: 2, kind: input, shape index: {}]   ;;  %s7752_s3 = inlined_call_operand.hbm [shape: f32[8,32], index: 3, kind: input, shape index: {}]   ;;  %s7753_s4 = inlined_call_operand.vmem [shape: f32[1,32], index: 4, kind: input, shape index: {}]   ;;  %s7754_s5 = inlined_call_operand.hbm [shape: f32[24,32], index: 5, kind: input, shape index: {}]   ;;  %s7755_s6 = inlined_call_operand.vmem [shape: f32[32,32], index: 6, kind: input, shape index: {}]   ;;  %s7756_s7 = inlined_call_operand.hbm [shape: f32[1,32], index: 7, kind: input, shape index: {}]   ;;  %s7757_s8 = inlined_call_operand.vmem [shape: f32[32,64], index: 8, kind: input, shape index: {}]   ;;  %s7758_s9 = inlined_call_operand.hbm [shape: f32[1,64], index: 9, kind: input, shape index: {}]   ;;  %s7759_s10 = inlined_call_operand.hbm [shape: f32[32,32], index: 10, kind: input, shape index: {}]   ;;  %s7760_s11 = inlined_call_operand.hbm [shape: f32[1,32], index: 11, kind: input, shape index: {}]   ;;  %s7761_s12 = inlined_call_operand.vmem [shape: f32[2,32,96], index: 12, kind: input, shape index: {}]   ;;  %s7762_s13 = inlined_call_operand.hbm [shape: f32[2,1,96], index: 13, kind: input, shape index: {}]   ;;  %s7763_s14 = inlined_call_operand.vmem [shape: f32[2,32,32], index: 14, kind: input, shape index: {}]   ;;  %s7764_s15 = inlined_call_operand.hbm [shape: f32[2,1,32], index: 15, kind: input, shape index: {}]   ;;  %s7765_s16 = inlined_call_operand.hbm [shape: f32[2,1,32], index: 16, kind: input, shape index: {}]   ;;  %s7766_s17 = inlined_call_operand.hbm [shape: f32[2,1,32], index: 17, kind: input, shape index: {}]   ;;  %s7767_s18 = inlined_call_operand.vmem [shape: f32[2,32,64], index: 18, kind: input, shape index: {}]   ;;  %s7768_s19 = inlined_call_operand.hbm [shape: f32[2,1,64], index: 19, kind: input, shape index: {}]   ;;  %s7769_s20 = inlined_call_operand.vmem [shape: f32[2,64,32], index: 20, kind: input, shape index: {}]   ;;  %s7770_s21 = inlined_call_operand.hbm [shape: f32[2,1,32], index: 21, kind: input, shape index: {}]   ;;  %s7771_s22 = inlined_call_operand.hbm [shape: f32[2,1,32], index: 22, kind: input, shape index: {}]   ;;  %s7772_s23 = inlined_call_operand.hbm [shape: f32[2,1,32], index: 23, kind: input, shape index: {}]   ;;  %s7773_s24 = inlined_call_operand.hbm [shape: f32[32,128], index: 24, kind: input, shape index: {}]   ;;  %s7774_s25 = inlined_call_operand.hbm [shape: f32[1,128], index: 25, kind: input, shape index: {}]   ;;  %s7775_s26 = inlined_call_operand.vmem [shape: f32[2,8,128], index: 26, kind: output, shape index: {}]  }
   0x1   :  { %7809 = sst [smem:[#allocation37_spill]] %s7749_s0 }
   0x2   :  { %7810 = sst [smem:[#allocation38_spill]] %s7750_s1 }
   0x3   :  { %7811 = sst [smem:[#allocation39_spill]] %s7751_s2 }
   0x4   :  { %7812 = sst [smem:[#allocation40_spill]] %s7752_s3 }
   0x5   :  { %7813 = sst [smem:[#allocation41_spill]] %s7753_s4 }
   0x6   :  { %7814 = sst [smem:[#allocation42_spill]] %s7754_s5 }
   0x7   :  { %7815 = sst [smem:[#allocation43_spill]] %s7755_s6 }
   0x8   :  { %7816 = sst [smem:[#allocation44_spill]] %s7756_s7 }
   0x9   :  { %7817 = sst [smem:[#allocation45_spill]] %s7757_s8 }
   0xa   :  { %7818 = sst [smem:[#allocation46_spill]] %s7758_s9 }
   0xb   :  { %7819 = sst [smem:[#allocation47_spill]] %s7759_s10 }
   0xc   :  { %7820 = sst [smem:[#allocation48_spill]] %s7760_s11 }
   0xd   :  { %7821 = sst [smem:[#allocation49_spill]] %s7761_s12 }
   0xe   :  { %7822 = sst [smem:[#allocation50_spill]] %s7763_s14 }
   0xf   :  { %7823 = sst [smem:[#allocation51_spill]] %s7764_s15 }
  0x10   :  { %7824 = sst [smem:[#allocation52_spill]] %s7767_s18 }
  0x11   :  { %7825 = sst [smem:[#allocation53_spill]] %s7769_s20 }
  0x12   :  { %7826 = sst [smem:[#allocation54_spill]] %s7775_s26 }
  0x13   :  { %31 = vsyncpa [#allocation3], 0 }
  0x14   :  { %32 = vsyncpa [#allocation5], 0 }
  0x15   :  { %33 = vsyncpa [#allocation8], 0 }
  0x16   :  { %34 = vsyncpa [#allocation11], 0 }
  0x17   :  { %35 = vsyncpa [#allocation14], 0 }
  0x18   :  { %36 = vsyncpa [#allocation17], 0 }
  0x19   :  { %37 = vsyncpa [#allocation20], 0 }
  0x1a   :  { %38 = vsyncpa [#allocation23], 0 }
  0x1b   :  { %39 = vsyncpa [#allocation26], 0  ;;  %s6776_s27 = smov 0  }
  0x1c LB: > { %7827 = sst [smem:[#allocation36_spill]] %s6604_s27  ;;  %s6606_s3 = smov [#allocation4]   ;;  %s6604_s27 = sphi %s6776_s27, %s45_s27  }
  0x1d   : > { %s661_s7 = sshll.u32 %s6606_s3, 4  ;;  %s6782_s28 = sadd.s32 4294967295, %s6604_s27   ;;  %s6787_s7 = int_to_ptr.vmem [resolvable:$true] %s661_s7 }
  0x1e   : > { %p5220_p0 = scmp.ge.s32.totalorder %s6604_s27, 1  ;;  %p632_p1 = scmp.lt.s32.totalorder %s6604_s27, 3 }
  0x1f   : > { %p7788_p2 = scmp.eq.s32.totalorder %s6782_s28, 0  ;;  %s6607_s4 = smov [#allocation7]  }
  0x20   : > { %p6789_p3 = pnand %p5220_p0, %p632_p1  ;;  %s692_s29 = sshll.u32 %s6607_s4, 4  ;;  %s6795_s29 = int_to_ptr.vmem [resolvable:$true] %s692_s29 }
  0x21   : > { %s6608_s9 = smov [#allocation10]   ;;  %s7830_s10 = sld [smem:[#allocation42_spill]] }
  0x22   : > { %s7828_s8 = scalar_select %p6789_p3, 1, 0 }
  0x23   : > { %p5933_p4 = pneg %p6789_p3  ;;  %s716_s30 = sshll.u32 %s6608_s9, 4  ;;  %s6803_s30 = int_to_ptr.vmem [resolvable:$true] %s716_s30 }
  0x25   : > { %p6799_p5 = pnand %p7788_p2, %p5933_p4 }
  0x27   : > { %s6114_s6 = scalar_lea.hbm %s7830_s10, 384  ;;  %p6813_p7 = pneg %p6799_p5 }
  0x28   : > { %p6115_p6 = scmp.ne.s32.totalorder %s7830_s10, %s6114_s6  ;;  %p6121_p10 = scmp.lt.u32.totalorder %s6114_s6, %s7830_s10 }
  0x2a   : > { %p6117_p8 = pnand %p6813_p7, %p6115_p6 }
  0x2c   : > { %p6118_p9 = pneg %p6117_p8 }
  0x2e   : > { %p6123_p11 = pnand %p6121_p10, %p6118_p9 }
  0x30   : > { %6126 = shalt.err (!%p6123_p11)
}
  0x31   : > { %s6127_s2 = scalar_lea.vmem %s6787_s7, 384  ;;  %p6135_p1 = scmp.lt.s32.totalorder %s6787_s7, %s6787_s7 }
  0x32   : > { %p6128_p12 = scmp.ne.s32.totalorder %s6787_s7, %s6127_s2  ;;  %p6136_p4 = scmp.lt.s32.totalorder %s6127_s2, %s6127_s2 }
  0x34   : > { %p6130_p13 = pnand %p6128_p12, %p6813_p7  ;;  %p6137_p6 = por %p6136_p4, %p6135_p1 }
  0x36   : > { %p6131_p0 = pneg %p6130_p13 }
  0x38   : > { %p6138_p8 = pnand %p6137_p6, %p6131_p0 }
  0x3a   : > { %6141 = shalt.err (!%p6138_p8)
}
  0x3b   : > { %s7790_s5 = smov 128   ;;  %s7792_s27 = smov 8  }
  0x3c   : > { %5939 = dma.hbm_to_vmem [thread:$0]  (!%p6799_p5), %s7830_s10, 384, %s6787_s7, [#allocation5], %s7790_s5, %s7790_s5, %s7792_s27  }
  0x3d   : > { %s7832_s26 = sld [smem:[#allocation46_spill]] }
  0x43   : > { %s6142_s2 = scalar_lea.hbm %s7832_s26, 16 }
  0x44   : > { %p6143_p9 = scmp.ne.s32.totalorder %s7832_s26, %s6142_s2  ;;  %p6149_p12 = scmp.lt.u32.totalorder %s6142_s2, %s7832_s26 }
  0x46   : > { %p6145_p10 = pnand %p6143_p9, %p6813_p7 }
  0x48   : > { %p6146_p11 = pneg %p6145_p10 }
  0x4a   : > { %p6151_p13 = pnand %p6149_p12, %p6146_p11 }
  0x4c   : > { %6154 = shalt.err (!%p6151_p13)
}
  0x4d   : > { %s6155_s7 = scalar_lea.vmem %s6795_s29, 16  ;;  %s6162_s18 = scalar_lea.vmem %s6795_s29, 32 }
  0x4e   : > { %p6156_p0 = scmp.ne.s32.totalorder %s6795_s29, %s6155_s7  ;;  %p6163_p6 = scmp.lt.s32.totalorder %s6795_s29, %s6795_s29 }
  0x4f   : > { %p6164_p8 = scmp.lt.s32.totalorder %s6162_s18, %s6155_s7 }
  0x50   : > { %p6158_p1 = pnand %p6156_p0, %p6813_p7 }
  0x51   : > { %p6165_p9 = por %p6164_p8, %p6163_p6 }
  0x52   : > { %p6159_p4 = pneg %p6158_p1 }
  0x54   : > { %p6166_p10 = pnand %p6165_p9, %p6159_p4 }
  0x56   : > { %6169 = shalt.err (!%p6166_p10)
}
  0x57   : > { %5945 = dma.hbm_to_vmem [thread:$0]  (!%p6799_p5), %s7832_s26, 16, %s6795_s29, [#allocation8]  }
  0x58   : > { %s7833_s11 = sld [smem:[#allocation48_spill]] }
  0x5e   : > { %s6170_s1 = scalar_lea.hbm %s7833_s11, 16 }
  0x5f   : > { %p6171_p11 = scmp.ne.s32.totalorder %s7833_s11, %s6170_s1  ;;  %p6177_p0 = scmp.lt.u32.totalorder %s6170_s1, %s7833_s11 }
  0x61   : > { %p6173_p12 = pnand %p6171_p11, %p6813_p7 }
  0x63   : > { %p6174_p13 = pneg %p6173_p12 }
  0x65   : > { %p6179_p1 = pnand %p6177_p0, %p6174_p13 }
  0x67   : > { %6182 = shalt.err (!%p6179_p1)
}
  0x68   : > { %s6183_s29 = scalar_lea.vmem %s6803_s30, 16  ;;  %s6190_s18 = scalar_lea.vmem %s6803_s30, 32 }
  0x69   : > { %p6184_p4 = scmp.ne.s32.totalorder %s6803_s30, %s6183_s29  ;;  %p6191_p9 = scmp.lt.s32.totalorder %s6803_s30, %s6803_s30 }
  0x6a   : > { %p6192_p10 = scmp.lt.s32.totalorder %s6190_s18, %s6183_s29 }
  0x6b   : > { %p6186_p6 = pnand %p6184_p4, %p6813_p7 }
  0x6c   : > { %p6193_p11 = por %p6192_p10, %p6191_p9 }
  0x6d   : > { %p6187_p8 = pneg %p6186_p6 }
  0x6f   : > { %p6194_p12 = pnand %p6193_p11, %p6187_p8 }
  0x71   : > { %6197 = shalt.err (!%p6194_p12)
}
  0x72   : > { %5951 = dma.hbm_to_vmem [thread:$0]  (!%p6799_p5), %s7833_s11, 16, %s6803_s30, [#allocation11]  }
  0x73   : > { %s6611_s20 = smov [#allocation13]   ;;  %s6612_s1 = smov [#allocation16]  }
  0x74   : > { %s745_s6 = sshll.u32 %s6611_s20, 4  ;;  %s771_s3 = sshll.u32 %s6612_s1, 4  ;;  %s746_s6 = int_to_ptr.vmem [resolvable:$true] %s745_s6  ;;  %s6885_s3 = int_to_ptr.vmem [resolvable:$true] %s771_s3 }
  0x75   : > { %s7834_s15 = sld [smem:[#allocation51_spill]] }
  0x7b   : > { %s6198_s7 = scalar_lea.hbm %s7834_s15, 32 }
  0x7c   : > { %p6199_p13 = scmp.ne.s32.totalorder %s7834_s15, %s6198_s7  ;;  %p6205_p4 = scmp.lt.u32.totalorder %s6198_s7, %s7834_s15 }
  0x7e   : > { %p6201_p0 = pnand %p6199_p13, %p6813_p7 }
  0x80   : > { %p6202_p1 = pneg %p6201_p0 }
  0x82   : > { %p6207_p6 = pnand %p6205_p4, %p6202_p1 }
  0x84   : > { %6210 = shalt.err (!%p6207_p6)
}
  0x85   : > { %s6211_s14 = scalar_lea.vmem %s746_s6, 32  ;;  %p6219_p11 = scmp.lt.s32.totalorder %s746_s6, %s746_s6 }
  0x86   : > { %p6212_p8 = scmp.ne.s32.totalorder %s746_s6, %s6211_s14  ;;  %p6220_p12 = scmp.lt.s32.totalorder %s6211_s14, %s6211_s14 }
  0x88   : > { %p6214_p9 = pnand %p6212_p8, %p6813_p7  ;;  %p6221_p2 = por %p6220_p12, %p6219_p11 }
  0x8a   : > { %p6215_p10 = pneg %p6214_p9 }
  0x8c   : > { %p6222_p3 = pnand %p6221_p2, %p6215_p10 }
  0x8e   : > { %6225 = shalt.err (!%p6222_p3)
}
  0x8f   : > { %s7795_s20 = smov 16   ;;  %s7797_s1 = smov 1  }
  0x90   : > { %5957 = dma.hbm_to_vmem [thread:$0]  (!%p6799_p5), %s7834_s15, 32, %s746_s6, [#allocation14], %s7795_s20, %s7795_s20, %s7797_s1  }
  0x91   : > { %s6226_s18 = scalar_lea.hbm %s7766_s17, 32 }
  0x92   : > { %p6227_p2 = scmp.ne.s32.totalorder %s7766_s17, %s6226_s18  ;;  %p6233_p0 = scmp.lt.u32.totalorder %s6226_s18, %s7766_s17 }
  0x94   : > { %p6229_p3 = pnand %p6227_p2, %p6813_p7 }
  0x96   : > { %p6230_p13 = pneg %p6229_p3 }
  0x98   : > { %p6235_p1 = pnand %p6233_p0, %p6230_p13 }
  0x9a   : > { %6238 = shalt.err (!%p6235_p1)
}
  0x9b   : > { %s6239_s6 = scalar_lea.vmem %s6885_s3, 32  ;;  %p6247_p9 = scmp.lt.s32.totalorder %s6885_s3, %s6885_s3 }
  0x9c   : > { %p6240_p4 = scmp.ne.s32.totalorder %s6885_s3, %s6239_s6  ;;  %p6248_p10 = scmp.lt.s32.totalorder %s6239_s6, %s6239_s6 }
  0x9e   : > { %p6242_p6 = pnand %p6240_p4, %p6813_p7  ;;  %p6249_p11 = por %p6248_p10, %p6247_p9 }
  0xa0   : > { %p6243_p8 = pneg %p6242_p6 }
  0xa2   : > { %p6250_p12 = pnand %p6249_p11, %p6243_p8 }
  0xa4   : > { %6253 = shalt.err (!%p6250_p12)
}
  0xa5   : > { %5963 = dma.hbm_to_vmem [thread:$0]  (!%p6799_p5), %s7766_s17, 32, %s6885_s3, [#allocation17], %s7795_s20, %s7795_s20, %s7797_s1  }
  0xa6   : > { %s6615_s2 = smov [#allocation19]   ;;  %s6616_s29 = smov [#allocation22]  }
  0xa7   : > { %s803_s7 = sshll.u32 %s6615_s2, 4  ;;  %s829_s18 = sshll.u32 %s6616_s29, 4  ;;  %s804_s7 = int_to_ptr.vmem [resolvable:$true] %s803_s7  ;;  %s6934_s18 = int_to_ptr.vmem [resolvable:$true] %s829_s18 }
  0xa8   : > { %s6254_s14 = scalar_lea.hbm %s7770_s21, 32 }
  0xa9   : > { %p6255_p2 = scmp.ne.s32.totalorder %s7770_s21, %s6254_s14  ;;  %p6261_p0 = scmp.lt.u32.totalorder %s6254_s14, %s7770_s21 }
  0xab   : > { %p6257_p3 = pnand %p6255_p2, %p6813_p7 }
  0xad   : > { %p6258_p13 = pneg %p6257_p3 }
  0xaf   : > { %p6263_p1 = pnand %p6261_p0, %p6258_p13 }
  0xb1   : > { %6266 = shalt.err (!%p6263_p1)
}
  0xb2   : > { %s6267_s9 = scalar_lea.vmem %s804_s7, 32  ;;  %p6275_p9 = scmp.lt.s32.totalorder %s804_s7, %s804_s7 }
  0xb3   : > { %p6268_p4 = scmp.ne.s32.totalorder %s804_s7, %s6267_s9  ;;  %p6276_p10 = scmp.lt.s32.totalorder %s6267_s9, %s6267_s9 }
  0xb5   : > { %p6270_p6 = pnand %p6268_p4, %p6813_p7  ;;  %p6277_p11 = por %p6276_p10, %p6275_p9 }
  0xb7   : > { %p6271_p8 = pneg %p6270_p6 }
  0xb9   : > { %p6278_p12 = pnand %p6277_p11, %p6271_p8 }
  0xbb   : > { %6281 = shalt.err (!%p6278_p12)
}
  0xbc   : > { %5969 = dma.hbm_to_vmem [thread:$0]  (!%p6799_p5), %s7770_s21, 32, %s804_s7, [#allocation20], %s7795_s20, %s7795_s20, %s7797_s1  }
  0xbd   : > { %s6282_s30 = scalar_lea.hbm %s7772_s23, 32 }
  0xbe   : > { %p6283_p2 = scmp.ne.s32.totalorder %s7772_s23, %s6282_s30  ;;  %p6289_p0 = scmp.lt.u32.totalorder %s6282_s30, %s7772_s23 }
  0xc0   : > { %p6285_p3 = pnand %p6283_p2, %p6813_p7 }
  0xc2   : > { %p6286_p13 = pneg %p6285_p3 }
  0xc4   : > { %p6291_p1 = pnand %p6289_p0, %p6286_p13 }
  0xc6   : > { %6294 = shalt.err (!%p6291_p1)
}
  0xc7   : > { %s6295_s7 = scalar_lea.vmem %s6934_s18, 32  ;;  %p6303_p9 = scmp.lt.s32.totalorder %s6934_s18, %s6934_s18 }
  0xc8   : > { %p6296_p4 = scmp.ne.s32.totalorder %s6934_s18, %s6295_s7  ;;  %p6304_p10 = scmp.lt.s32.totalorder %s6295_s7, %s6295_s7 }
  0xca   : > { %p6298_p6 = pnand %p6296_p4, %p6813_p7  ;;  %p6305_p11 = por %p6304_p10, %p6303_p9 }
  0xcc   : > { %p6299_p8 = pneg %p6298_p6 }
  0xce   : > { %p6306_p12 = pnand %p6305_p11, %p6299_p8 }
  0xd0   : > { %6309 = shalt.err (!%p6306_p12)
}
  0xd1   : > { %5975 = dma.hbm_to_vmem [thread:$0]  (!%p6799_p5), %s7772_s23, 32, %s6934_s18, [#allocation23], %s7795_s20, %s7795_s20, %s7797_s1  }
  0xd2   : > { %s6617_s2 = smov [#allocation2]   ;;  %s6618_s12 = smov [#allocation6]  }
  0xd3   : > { %s648_s29 = sshll.u32 %s6617_s2, 4  ;;  %s678_s30 = sshll.u32 %s6618_s12, 4  ;;  %s649_s29 = int_to_ptr.vmem [resolvable:$true] %s648_s29  ;;  %s6983_s30 = int_to_ptr.vmem [resolvable:$true] %s678_s30 }
  0xd4   : > { %s7835_s5 = sld [smem:[#allocation40_spill]] }
  0xda   : > { %s6310_s3 = scalar_lea.hbm %s7835_s5, 128 }
  0xdb   : > { %p6311_p2 = scmp.ne.s32.totalorder %s7835_s5, %s6310_s3  ;;  %p6317_p0 = scmp.lt.u32.totalorder %s6310_s3, %s7835_s5 }
  0xdd   : > { %p6313_p3 = pnand %p6311_p2, %p6813_p7 }
  0xdf   : > { %p6314_p13 = pneg %p6313_p3 }
  0xe1   : > { %p6319_p1 = pnand %p6317_p0, %p6314_p13 }
  0xe3   : > { %6322 = shalt.err (!%p6319_p1)
}
  0xe4   : > { %s6323_s27 = scalar_lea.vmem %s649_s29, 128  ;;  %p6331_p9 = scmp.lt.s32.totalorder %s649_s29, %s649_s29 }
  0xe5   : > { %p6324_p4 = scmp.ne.s32.totalorder %s649_s29, %s6323_s27  ;;  %p6332_p10 = scmp.lt.s32.totalorder %s6323_s27, %s6323_s27 }
  0xe7   : > { %p6326_p6 = pnand %p6324_p4, %p6813_p7  ;;  %p6333_p11 = por %p6332_p10, %p6331_p9 }
  0xe9   : > { %p6327_p8 = pneg %p6326_p6 }
  0xeb   : > { %p6334_p12 = pnand %p6333_p11, %p6327_p8 }
  0xed   : > { %6337 = shalt.err (!%p6334_p12)
}
  0xee   : > { %5936 = dma.hbm_to_vmem [thread:$0]  (!%p6799_p5), %s7835_s5, 128, %s649_s29, [#allocation3]  }
  0xef   : > { %s7836_s6 = sld [smem:[#allocation44_spill]] }
  0xf5   : > { %s6338_s3 = scalar_lea.hbm %s7836_s6, 16 }
  0xf6   : > { %p6339_p2 = scmp.ne.s32.totalorder %s7836_s6, %s6338_s3  ;;  %p6345_p0 = scmp.lt.u32.totalorder %s6338_s3, %s7836_s6 }
  0xf8   : > { %p6341_p3 = pnand %p6339_p2, %p6813_p7 }
  0xfa   : > { %p6342_p13 = pneg %p6341_p3 }
  0xfc   : > { %p6347_p1 = pnand %p6345_p0, %p6342_p13 }
  0xfe   : > { %6350 = shalt.err (!%p6347_p1)
}
  0xff   : > { %s6351_s29 = scalar_lea.vmem %s6983_s30, 16  ;;  %s6358_s10 = scalar_lea.vmem %s6983_s30, 32 }
 0x100   : > { %p6352_p4 = scmp.ne.s32.totalorder %s6983_s30, %s6351_s29  ;;  %p6359_p9 = scmp.lt.s32.totalorder %s6983_s30, %s6983_s30 }
 0x101   : > { %p6360_p10 = scmp.lt.s32.totalorder %s6358_s10, %s6351_s29 }
 0x102   : > { %p6354_p6 = pnand %p6352_p4, %p6813_p7 }
 0x103   : > { %p6361_p11 = por %p6360_p10, %p6359_p9 }
 0x104   : > { %p6355_p8 = pneg %p6354_p6 }
 0x106   : > { %p6362_p12 = pnand %p6361_p11, %p6355_p8 }
 0x108   : > { %6365 = shalt.err (!%p6362_p12)
}
 0x109   : > { %5942 = dma.hbm_to_vmem [thread:$0]  (!%p6799_p5), %s7836_s6, 16, %s6983_s30, [#allocation5]  }
 0x10a   : > { %s6619_s14 = smov [#allocation9]   ;;  %s6620_s7 = smov [#allocation12]  }
 0x10b   : > { %s702_s3 = sshll.u32 %s6619_s14, 4  ;;  %s729_s9 = sshll.u32 %s6620_s7, 4  ;;  %s703_s3 = int_to_ptr.vmem [resolvable:$true] %s702_s3  ;;  %s7027_s9 = int_to_ptr.vmem [resolvable:$true] %s729_s9 }
 0x10c   : > { %s7837_s29 = sld [smem:[#allocation47_spill]] }
 0x112   : > { %s6366_s10 = scalar_lea.hbm %s7837_s29, 512 }
 0x113   : > { %p6367_p2 = scmp.ne.s32.totalorder %s7837_s29, %s6366_s10  ;;  %p6373_p0 = scmp.lt.u32.totalorder %s6366_s10, %s7837_s29 }
 0x115   : > { %p6369_p3 = pnand %p6367_p2, %p6813_p7 }
 0x117   : > { %p6370_p13 = pneg %p6369_p3 }
 0x119   : > { %p6375_p1 = pnand %p6373_p0, %p6370_p13 }
 0x11b   : > { %6378 = shalt.err (!%p6375_p1)
}
 0x11c   : > { %s6379_s12 = scalar_lea.vmem %s703_s3, 512  ;;  %p6387_p9 = scmp.lt.s32.totalorder %s703_s3, %s703_s3 }
 0x11d   : > { %p6380_p4 = scmp.ne.s32.totalorder %s703_s3, %s6379_s12  ;;  %p6388_p10 = scmp.lt.s32.totalorder %s6379_s12, %s6379_s12 }
 0x11f   : > { %p6382_p6 = pnand %p6380_p4, %p6813_p7  ;;  %p6389_p11 = por %p6388_p10, %p6387_p9 }
 0x121   : > { %p6383_p8 = pneg %p6382_p6 }
 0x123   : > { %p6390_p12 = pnand %p6389_p11, %p6383_p8 }
 0x125   : > { %6393 = shalt.err (!%p6390_p12)
}
 0x126   : > { %s7838_s20 = smov 8   ;;  %s7839_s1 = smov 128  }
 0x127   : > { %5948 = dma.hbm_to_vmem [thread:$0]  (!%p6799_p5), %s7837_s29, 512, %s703_s3, [#allocation8], %s7839_s1, %s7839_s1, %s7838_s20  }
 0x128   : > { %s6394_s10 = scalar_lea.hbm %s7762_s13, 32 }
 0x129   : > { %p6395_p2 = scmp.ne.s32.totalorder %s7762_s13, %s6394_s10  ;;  %p6401_p0 = scmp.lt.u32.totalorder %s6394_s10, %s7762_s13 }
 0x12b   : > { %p6397_p3 = pnand %p6395_p2, %p6813_p7 }
 0x12d   : > { %p6398_p13 = pneg %p6397_p3 }
 0x12f   : > { %p6403_p1 = pnand %p6401_p0, %p6398_p13 }
 0x131   : > { %6406 = shalt.err (!%p6403_p1)
}
 0x132   : > { %s6407_s3 = scalar_lea.vmem %s7027_s9, 32  ;;  %p6415_p9 = scmp.lt.s32.totalorder %s7027_s9, %s7027_s9 }
 0x133   : > { %p6408_p4 = scmp.ne.s32.totalorder %s7027_s9, %s6407_s3  ;;  %p6416_p10 = scmp.lt.s32.totalorder %s6407_s3, %s6407_s3 }
 0x135   : > { %p6410_p6 = pnand %p6408_p4, %p6813_p7  ;;  %p6417_p11 = por %p6416_p10, %p6415_p9 }
 0x137   : > { %p6411_p8 = pneg %p6410_p6 }
 0x139   : > { %p6418_p12 = pnand %p6417_p11, %p6411_p8 }
 0x13b   : > { %6421 = shalt.err (!%p6418_p12)
}
 0x13c   : > { %s7840_s5 = smov 1   ;;  %s7841_s14 = smov 16  }
 0x13d   : > { %5954 = dma.hbm_to_vmem [thread:$0]  (!%p6799_p5), %s7762_s13, 32, %s7027_s9, [#allocation11], %s7841_s14, %s7841_s14, %s7840_s5  }
 0x13e   : > { %s6621_s27 = smov [#allocation15]   ;;  %s6622_s2 = smov [#allocation18]  }
 0x13f   : > { %s758_s10 = sshll.u32 %s6621_s27, 4  ;;  %s787_s30 = sshll.u32 %s6622_s2, 4  ;;  %s759_s10 = int_to_ptr.vmem [resolvable:$true] %s758_s10  ;;  %s7076_s30 = int_to_ptr.vmem [resolvable:$true] %s787_s30 }
 0x140   : > { %s6422_s6 = scalar_lea.hbm %s7765_s16, 32 }
 0x141   : > { %p6423_p2 = scmp.ne.s32.totalorder %s7765_s16, %s6422_s6  ;;  %p6429_p0 = scmp.lt.u32.totalorder %s6422_s6, %s7765_s16 }
 0x143   : > { %p6425_p3 = pnand %p6423_p2, %p6813_p7 }
 0x145   : > { %p6426_p13 = pneg %p6425_p3 }
 0x147   : > { %p6431_p1 = pnand %p6429_p0, %p6426_p13 }
 0x149   : > { %6434 = shalt.err (!%p6431_p1)
}
 0x14a   : > { %s6435_s18 = scalar_lea.vmem %s759_s10, 32  ;;  %p6443_p9 = scmp.lt.s32.totalorder %s759_s10, %s759_s10 }
 0x14b   : > { %p6436_p4 = scmp.ne.s32.totalorder %s759_s10, %s6435_s18  ;;  %p6444_p10 = scmp.lt.s32.totalorder %s6435_s18, %s6435_s18 }
 0x14d   : > { %p6438_p6 = pnand %p6436_p4, %p6813_p7  ;;  %p6445_p11 = por %p6444_p10, %p6443_p9 }
 0x14f   : > { %p6439_p8 = pneg %p6438_p6 }
 0x151   : > { %p6446_p12 = pnand %p6445_p11, %p6439_p8 }
 0x153   : > { %6449 = shalt.err (!%p6446_p12)
}
 0x154   : > { %5960 = dma.hbm_to_vmem [thread:$0]  (!%p6799_p5), %s7765_s16, 32, %s759_s10, [#allocation14], %s7841_s14, %s7841_s14, %s7840_s5  }
 0x155   : > { %s6450_s2 = scalar_lea.hbm %s7768_s19, 32 }
 0x156   : > { %p6451_p2 = scmp.ne.s32.totalorder %s7768_s19, %s6450_s2  ;;  %p6457_p0 = scmp.lt.u32.totalorder %s6450_s2, %s7768_s19 }
 0x158   : > { %p6453_p3 = pnand %p6451_p2, %p6813_p7 }
 0x15a   : > { %p6454_p13 = pneg %p6453_p3 }
 0x15c   : > { %p6459_p1 = pnand %p6457_p0, %p6454_p13 }
 0x15e   : > { %6462 = shalt.err (!%p6459_p1)
}
 0x15f   : > { %s6463_s10 = scalar_lea.vmem %s7076_s30, 32  ;;  %p6471_p9 = scmp.lt.s32.totalorder %s7076_s30, %s7076_s30 }
 0x160   : > { %p6464_p4 = scmp.ne.s32.totalorder %s7076_s30, %s6463_s10  ;;  %p6472_p10 = scmp.lt.s32.totalorder %s6463_s10, %s6463_s10 }
 0x162   : > { %p6466_p6 = pnand %p6464_p4, %p6813_p7  ;;  %p6473_p11 = por %p6472_p10, %p6471_p9 }
 0x164   : > { %p6467_p8 = pneg %p6466_p6 }
 0x166   : > { %p6474_p12 = pnand %p6473_p11, %p6467_p8 }
 0x168   : > { %6477 = shalt.err (!%p6474_p12)
}
 0x169   : > { %5966 = dma.hbm_to_vmem [thread:$0]  (!%p6799_p5), %s7768_s19, 32, %s7076_s30, [#allocation17], %s7841_s14, %s7841_s14, %s7840_s5  }
 0x16a   : > { %s6623_s15 = smov [#allocation21]   ;;  %s6624_s27 = smov [#allocation24]  }
 0x16b   : > { %s816_s6 = sshll.u32 %s6623_s15, 4  ;;  %s842_s2 = sshll.u32 %s6624_s27, 4  ;;  %s817_s6 = int_to_ptr.vmem [resolvable:$true] %s816_s6  ;;  %s7125_s2 = int_to_ptr.vmem [resolvable:$true] %s842_s2 }
 0x16c   : > { %s6478_s7 = scalar_lea.hbm %s7771_s22, 32 }
 0x16d   : > { %p6479_p2 = scmp.ne.s32.totalorder %s7771_s22, %s6478_s7  ;;  %p6485_p0 = scmp.lt.u32.totalorder %s6478_s7, %s7771_s22 }
 0x16f   : > { %p6481_p3 = pnand %p6479_p2, %p6813_p7 }
 0x171   : > { %p6482_p13 = pneg %p6481_p3 }
 0x173   : > { %p6487_p1 = pnand %p6485_p0, %p6482_p13 }
 0x175   : > { %6490 = shalt.err (!%p6487_p1)
}
 0x176   : > { %s6491_s11 = scalar_lea.vmem %s817_s6, 32  ;;  %p6499_p9 = scmp.lt.s32.totalorder %s817_s6, %s817_s6 }
 0x177   : > { %p6492_p4 = scmp.ne.s32.totalorder %s817_s6, %s6491_s11  ;;  %p6500_p10 = scmp.lt.s32.totalorder %s6491_s11, %s6491_s11 }
 0x179   : > { %p6494_p6 = pnand %p6492_p4, %p6813_p7  ;;  %p6501_p11 = por %p6500_p10, %p6499_p9 }
 0x17b   : > { %p6495_p8 = pneg %p6494_p6 }
 0x17d   : > { %p6502_p12 = pnand %p6501_p11, %p6495_p8 }
 0x17f   : > { %6505 = shalt.err (!%p6502_p12)
}
 0x180   : > { %5972 = dma.hbm_to_vmem [thread:$0]  (!%p6799_p5), %s7771_s22, 32, %s817_s6, [#allocation20], %s7841_s14, %s7841_s14, %s7840_s5  }
 0x181   : > { %s6506_s7 = scalar_lea.hbm %s7773_s24, 512 }
 0x182   : > { %p6507_p2 = scmp.ne.s32.totalorder %s7773_s24, %s6506_s7  ;;  %p6513_p0 = scmp.lt.u32.totalorder %s6506_s7, %s7773_s24 }
 0x184   : > { %p6509_p3 = pnand %p6507_p2, %p6813_p7 }
 0x186   : > { %p6510_p13 = pneg %p6509_p3 }
 0x188   : > { %p6515_p1 = pnand %p6513_p0, %p6510_p13 }
 0x18a   : > { %6518 = shalt.err (!%p6515_p1)
}
 0x18b   : > { %s6519_s5 = scalar_lea.vmem %s7125_s2, 512  ;;  %p6527_p9 = scmp.lt.s32.totalorder %s7125_s2, %s7125_s2 }
 0x18c   : > { %p6520_p4 = scmp.ne.s32.totalorder %s7125_s2, %s6519_s5  ;;  %p6528_p10 = scmp.lt.s32.totalorder %s6519_s5, %s6519_s5 }
 0x18e   : > { %p6522_p6 = pnand %p6520_p4, %p6813_p7  ;;  %p6529_p11 = por %p6528_p10, %p6527_p9 }
 0x190   : > { %p6523_p8 = pneg %p6522_p6 }
 0x192   : > { %p6530_p12 = pnand %p6529_p11, %p6523_p8 }
 0x194   : > { %6533 = shalt.err (!%p6530_p12)
}
 0x195   : > { %5978 = dma.hbm_to_vmem [thread:$0]  (!%p6799_p5), %s7773_s24, 512, %s7125_s2, [#allocation23], %s7839_s1, %s7839_s1, %s7838_s20  }
 0x196   : > { %s6625_s11 = smov [#allocation25]   ;;  %s6534_s3 = scalar_lea.hbm %s7774_s25, 16 }
 0x197   : > { %s856_s15 = sshll.u32 %s6625_s11, 4  ;;  %p6535_p2 = scmp.ne.s32.totalorder %s7774_s25, %s6534_s3  ;;  %s857_s15 = int_to_ptr.vmem [resolvable:$true] %s856_s15 }
 0x198   : > { %p6541_p0 = scmp.lt.u32.totalorder %s6534_s3, %s7774_s25 }
 0x199   : > { %p6537_p3 = pnand %p6535_p2, %p6813_p7 }
 0x19b   : > { %p6538_p13 = pneg %p6537_p3 }
 0x19d   : > { %p6543_p1 = pnand %p6541_p0, %p6538_p13 }
 0x19f   : > { %6546 = shalt.err (!%p6543_p1)
}
 0x1a0   : > { %s6547_s20 = scalar_lea.vmem %s857_s15, 16  ;;  %s6554_s1 = scalar_lea.vmem %s857_s15, 32 }
 0x1a1   : > { %p6548_p4 = scmp.ne.s32.totalorder %s857_s15, %s6547_s20  ;;  %p6555_p9 = scmp.lt.s32.totalorder %s857_s15, %s857_s15 }
 0x1a2   : > { %p6556_p10 = scmp.lt.s32.totalorder %s6554_s1, %s6547_s20 }
 0x1a3   : > { %p6550_p6 = pnand %p6548_p4, %p6813_p7 }
 0x1a4   : > { %p6557_p11 = por %p6556_p10, %p6555_p9 }
 0x1a5   : > { %p6551_p8 = pneg %p6550_p6 }
 0x1a7   : > { %p6558_p12 = pnand %p6557_p11, %p6551_p8 }
 0x1a9   : > { %6561 = shalt.err (!%p6558_p12)
}
 0x1aa   : > { %5981 = dma.hbm_to_vmem [thread:$0]  (!%p6799_p5), %s7774_s25, 16, %s857_s15, [#allocation26]  }
 0x1ab   : > { %p7842_p2 = scmp.ne.s32.totalorder %s7828_s8, 0 }
 0x1ac   : > { %p7843_p3 = scmp.eq.s32.totalorder (!%p7842_p2), %s6782_s28, 0 }
 0x1ad   : > { %883 = sbr.rel (%p7842_p2) target bundleno = 10844 (0x2a5c), region = 124 }
 0x1b4   : > { %6567 = dma.done.wait (%p7843_p3), [#allocation3], 128   ;;  %p7844_p7 = pmov %p7843_p3 }
 0x1b5   : > { %p7845_p13 = pmov %p7843_p3 }
 0x1b6   : > { %6569 = vsyncadd (%p7844_p7), [#allocation3], 4294967168 }
 0x1b7   : > { %6571 = dma.done.wait (%p7845_p13), [#allocation5], 400   ;;  %p7846_p0 = pmov %p7843_p3 }
 0x1b9   : > { %6573 = vsyncadd (%p7846_p0), [#allocation5], 4294966896  ;;  %p7847_p1 = pmov %p7846_p0 }
 0x1ba   : > { %p7848_p5 = pmov %p7846_p0 }
 0x1bb   : > { %6575 = dma.done.wait (%p7847_p1), [#allocation8], 528  }
 0x1bc   : > { %6577 = vsyncadd (%p7848_p5), [#allocation8], 4294966768  ;;  %p7849_p4 = pmov %p7846_p0 }
 0x1bd   : > { %p7850_p6 = pmov %p7846_p0 }
 0x1be   : > { %6579 = dma.done.wait (%p7849_p4), [#allocation11], 48  }
 0x1bf   : > { %6581 = vsyncadd (%p7850_p6), [#allocation11], 4294967248  ;;  %p7851_p8 = pmov %p7846_p0 }
 0x1c0   : > { %p7852_p9 = pmov %p7846_p0 }
 0x1c1   : > { %6583 = dma.done.wait (%p7851_p8), [#allocation14], 64  }
 0x1c2   : > { %6585 = vsyncadd (%p7852_p9), [#allocation14], 4294967232  ;;  %p7853_p10 = pmov %p7846_p0 }
 0x1c3   : > { %p7854_p11 = pmov %p7846_p0 }
 0x1c4   : > { %6587 = dma.done.wait (%p7853_p10), [#allocation17], 64  }
 0x1c5   : > { %6589 = vsyncadd (%p7854_p11), [#allocation17], 4294967232  ;;  %p7855_p12 = pmov %p7846_p0 }
 0x1c6   : > { %p7856_p2 = pmov %p7846_p0 }
 0x1c7   : > { %6591 = dma.done.wait (%p7855_p12), [#allocation20], 64  }
 0x1c8   : > { %6593 = vsyncadd (%p7856_p2), [#allocation20], 4294967232  ;;  %p7857_p3 = pmov %p7846_p0 }
 0x1c9   : > { %p7858_p7 = pmov %p7846_p0 }
 0x1ca   : > { %6595 = dma.done.wait (%p7857_p3), [#allocation23], 544  }
 0x1cb   : > { %6597 = vsyncadd (%p7858_p7), [#allocation23], 4294966752  ;;  %p7859_p13 = pmov %p7846_p0 }
 0x1cd   : > { %6599 = dma.done.wait (%p7859_p13), [#allocation26], 16  }
 0x1ce   : > { %6601 = vsyncadd (%p7846_p0), [#allocation26], 4294967280  ;;  %p1015_p1 = scmp.lt.s32.totalorder %s6782_s28, 1  ;;  %v6626_v0 = vmov 0   ;;  %v6627_v1 = vmov 0.0   ;;  %vm6628_vm0 = vmmov 0   ;;  %v1111_v16 = vlaneseq }
 0x1cf   : > { %6057 = vset.pattern.permute.xlu0 %v6626_v0  ;;  %5491 = vmatprep.subr.mxu1 %v6627_v1  ;;  %v6629_v2 = vmov 0.0|0.0   ;;  %s7860_s5 = sld [smem:[#allocation38_spill]]  ;;  %s7861_s15 = sld [smem:[#allocation37_spill]]  ;;  %vm1036_vm1 = vcmask 64512   ;;  %v1028_v4 = vld [vmem:[#allocation2] sm:$0xff]  ;;  %v1118_v6 = vld [vmem:[#allocation4] sm:$0xff] }
 0x1d0   : > { %s7883_s28 = smov (!%p1015_p1, %s6782_s28), 1  ;;  %5493 = vmatprep.mubr.msk.f32.mxu1 %vm6628_vm0, %v6627_v1  ;;  %5803 = vmatprep.subr.bf16.mxu0 %v6629_v2  ;;  %v1119_v7 = vld [vmem:[#allocation4 + $0x8] sm:$0xff]  ;;  %s7862_s3 = sld [smem:[#allocation43_spill]]  ;;  %v1120_v12 = vld [vmem:[#allocation4 + $0x10] sm:$0xff]  ;;  %v1112_v17 = vand.u32 127, %v1111_v16  ;;  %vm1121_vm2 = vcmask 195584  }
 0x1d1   : > { %5513 = vmatprep.mubr.msk.f32.mxu0 %vm6628_vm0, %v6627_v1  ;;  %s7238_s8 = sshll.u32 %s7883_s28, 3  ;;  %5492 = vmatpush3.msra.mxu1 %v1028_v4  ;;  %v5801_v8 = vpack.c.bf16 %v1119_v7, %v1118_v6  ;;  %s7863_s0 = sld [smem:[#allocation45_spill]]  ;;  %vm1206_vm4 = vcmask 261120   ;;  %v5261_v32 = vld [vmem:[#allocation6] ss:$0 sm:$0xff]  ;;  %v1366_v63 = vld [vmem:[#allocation9 + $0x8] sm:$0xff] }
 0x1d2   : > { %5800 = vmatprep.subr.bf16.mxu1 %v6629_v2  ;;  %s7864_s12 = sld [smem:[#allocation41_spill]]  ;;  %s6630_s7 = smov 120   ;;  %v5263_v37 = vld [vmem:[#allocation7] ss:$0 sm:$0xff]  ;;  %v1365_v6 = vld [vmem:[#allocation9] sm:$0xff]  ;;  %vm3513_vm5 = vcmask 523264  }
 0x1d3   : > { %s6631_s9 = smov 96   ;;  %s7805_s10 = smov 112  }
 0x1d4   : > { %s6633_s18 = smov 88   ;;  %s7803_s20 = smov 104  }
 0x1d5   : > { %s1022_s14 = scalar_lea.vmem %s7860_s5, %s7238_s8  ;;  %s1018_s27 = scalar_lea.vmem %s7861_s15, %s7238_s8 }
 0x1d6   : > { %v1110_v3 = vld [vmem:[%s1022_s14] sm:$0xff]  ;;  %v1196_v10 = vld [vmem:[%s7862_s3 + $0x8] sm:$0xff]  ;;  %v1197_v13 = vld [vmem:[%s7862_s3 + $0x10] sm:$0xff]  ;;  %s7807_s1 = smov 80   ;;  %s7804_s2 = smov 72  }
 0x1d7   : > { %v1027_v5 = vld [vmem:[%s1018_s27] sm:$0xff]  ;;  %1114 = vperm.xlu0 %6057, %v1110_v3   ;;  %v1198_v14 = vld [vmem:[%s7862_s3 + $0x18] sm:$0xff]  ;;  %v1282_v19 = vld [vmem:[%s7863_s0 + $0x8] sm:$0xff]  ;;  %s7865_s5 = sld [smem:[#allocation49_spill]]  ;;  %s7866_s4 = sld [smem:[#allocation39_spill]] }
 0x1d8   : > { %5494 = vmatmul.mubr.msk.f32.vlgmr.msra.gmra.mrb[0].mxu1 %vm1036_vm1, %v1027_v5  ;;  %v1195_v9 = vld [vmem:[%s7862_s3] sm:$0xff]  ;;  %v5807_v15 = vpack.c.bf16 %v1198_v14, %v1197_v13  ;;  %v1283_v22 = vld [vmem:[%s7863_s0 + $0x10] sm:$0xff]  ;;  %v1284_v23 = vld [vmem:[%s7863_s0 + $0x18] sm:$0xff]  ;;  %s7806_s14 = smov 64   ;;  %s7808_s6 = smov 56  }
 0x1d9   : > { %5502 = vmatprep.mubr.msk.f32.mxu1 %vm6628_vm0, %v6627_v1  ;;  %5802 = vmatpush3.bf16.msra.mxu1 %v5801_v8  ;;  %v5804_v11 = vpack.c.bf16 %v1196_v10, %v1195_v9  ;;  %v1281_v18 = vld [vmem:[%s7863_s0] sm:$0xff]  ;;  %v5813_v25 = vpack.c.bf16 %v1284_v23, %v1283_v22  ;;  %s7867_s27 = sld [smem:[#allocation50_spill]]  ;;  %s7876_s11 = smov 72  }
 0x1da   : > { %5500 = vmatprep.subr.mxu1 %v6627_v1  ;;  %v5810_v21 = vpack.c.bf16 %v1282_v19, %v1281_v18  ;;  %v5258_v26 = vld [vmem:[%s7864_s12] ss:$0 sm:$0xff]  ;;  %s7869_s12 = sld [smem:[#allocation52_spill]]  ;;  %s7877_s15 = smov 104  }
 0x1db   : > { %5805 = vmatpush3.bf16.msra.mxu0 %v5804_v11 }
 0x1dc   : > { %5806 = vmatprep.subr.bf16.mxu0 %v6629_v2 }
 0x1dd   : > { %5501 = vmatpush3.msra.mxu1 %v1120_v12 }
 0x1de   : > { %5809 = vmatprep.subr.bf16.mxu1 %v6629_v2 }
 0x1df   : > { %5808 = vmatpush3.bf16.msra.mxu0 %v5807_v15  ;;  %s7868_s28 = smov %s7867_s27 }
 0x1e0   : > { %5527 = vmatprep.subr.mxu0 %v6627_v1 }
 0x256   : > { %v1115_v20 = vpop.permute.xlu0 %1114 }
 0x257   : > { %vm1116_vm3 = vcmp.eq.s32.totalorder %v1112_v17, %v1115_v20 }
 0x258   : > { %v1117_v24 = vsel %vm1116_vm3, 1.0, %v6627_v1 }
 0x259   : > { %5503 = vmatmul.mubr.msk.f32.vlgmr.msra.gmra.mrb[2].mxu1 %vm1121_vm2, %v1117_v24 }
 0x25a   : > { %5811 = vmatpush3.bf16.msra.mxu1 %v5810_v21  ;;  %5524 = vmatprep.mubr.msk.f32.mxu1 %vm6628_vm0, %v6627_v1 }
 0x25b   : > { %5812 = vmatprep.subr.bf16.mxu1 %v6629_v2 }
 0x25e   : > { %5814 = vmatpush3.bf16.msra.mxu1 %v5813_v25 }
 0x25f   : > { %5537 = vmatprep.subr.mxu1 %v6627_v1 }
 0x2ab   : > { %v1106_v27 = vpop.f32.mrb[0].mxu1 }
 0x2ac   : > { %v1107_v28 = vadd.f32 %v5258_v26, %v1106_v27  ;;  %v5495_v29 = vpop.f32.mrb[1].mxu1 }
 0x2ae   : > { %5514 = vmatmul.mubr.msk.f32.vlgmr.msra.gmra.mrb[0].mxu0 %vm1206_vm4, %v1107_v28 }
 0x2af   : > { %5529 = vmatprep.mubr.msk.f32.mxu0 %vm6628_vm0, %v6627_v1 }
 0x32c   : > { %v7291_v30 = vpop.f32.mrb[2].mxu1 }
 0x32d   : > { %v5504_v31 = vpop.f32.mrb[3].mxu1  ;;  %5525 = vmatmul.mubr.msk.f32.vlgmr.msra.gmra.mrb[4].mxu1 %vm1206_vm4, %v7291_v30 }
 0x32e   : > { %5539 = vmatprep.mubr.msk.f32.mxu1 %vm6628_vm0, %v6627_v1 }
 0x381   : > { %v1276_v33 = vpop.f32.mrb[0].mxu0 }
 0x382   : > { %v1277_v34 = vadd.f32 %v5261_v32, %v1276_v33  ;;  %v5515_v35 = vpop.f32.mrb[1].mxu0  ;;  %v1367_v33 = vld [vmem:[#allocation9 + $0x10] sm:$0xff] }
 0x384   : > { %v7297_v36 = vmul.f32 0.35355338, %v1277_v34 }
 0x386   : > { %1533 = vrot.lane.b32.xlu1 %v7297_v36, %s6630_s7 }
 0x3f8   : > { %v1534_v42 = vpop.permute.xlu1 %1533 }
 0x400   : > { %v1361_v38 = vpop.f32.mrb[4].mxu1 }
 0x401   : > { %v7301_v39 = vadd.f32 %v5263_v37, %v1361_v38  ;;  %v5526_v40 = vpop.f32.mrb[5].mxu1 }
 0x403   : > { %1535 = vrot.lane.b32.xlu0 %v7301_v39, %s6630_s7  ;;  %5528 = vmatpush3.xpose.msk.msra.mxu0 %vm1036_vm1, %v7301_v39 }
 0x404   : > { %5532 = vmatprep.subr.mxu0 %v6627_v1 }
 0x406   : > { %5530 = vmatmul.mubr.msk.f32.vlgmr.msra.gmra.mrb[2].mxu0 %vm1036_vm1, %v7297_v36 }
 0x407   : > { %5534 = vmatprep.mubr.msk.f32.mxu0 %vm6628_vm0, %v6627_v1 }
 0x475   : > { %v1536_v41 = vpop.permute.xlu0 %1535 }
 0x476   : > { %5538 = vmatpush3.xpose.msk.msra.mxu1 %vm1036_vm1, %v1536_v41 }
 0x477   : > { %5547 = vmatprep.subr.mxu1 %v6627_v1 }
 0x479   : > { %5540 = vmatmul.mubr.msk.f32.vlgmr.msra.gmra.mrb[6].mxu1 %vm1036_vm1, %v1534_v42 }
 0x47a   : > { %5549 = vmatprep.mubr.msk.f32.mxu1 %vm6628_vm0, %v6627_v1  ;;  %5548 = vmatpush3.msra.mxu1 %v1366_v63 }
 0x47b   : > { %5557 = vmatprep.subr.mxu1 %v6627_v1 }
 0x4d9   : > { %v1442_v43 = vpop.f32.mrb[2].mxu0 }
 0x4da   : > { %v5531_v44 = vpop.f32.mrb[3].mxu0  ;;  %v1446_v45 = vsel %vm1036_vm1, %v1442_v43, -inf }
 0x4db   : > { %1447 = vmax.xlane.f32.xlu1 %v1446_v45 }
 0x54c   : > { %v1607_v46 = vpop.f32.mrb[6].mxu1 }
 0x54d   : > { %v5541_v47 = vpop.f32.mrb[7].mxu1  ;;  %v1611_v48 = vsel %vm1036_vm1, %v1607_v46, -inf }
 0x54e   : > { %1612 = vmax.xlane.f32.xlu0 %v1611_v48 }
 0x568   : > { %v1448_v49 = vpop.xlane.xlu1 %1447 }
 0x569   : > { %v1449_v50 = vsub.f32 %v1442_v43, %v1448_v49 }
 0x56b   : > { %v1450_v51 = vmul.f32 1.442695, %v1449_v50 }
 0x56d   : > { %6058 = vpow2.f32 %v1450_v51 }
 0x577   : > { %v6059_v52 = vpop.eup %6058 }
 0x578   : > { %v1452_v53 = vsel %vm1036_vm1, %v6059_v52, 0.0 }
 0x579   : > { %1453 = vadd.xlane.f32.xlu0 %v1452_v53 }
 0x58f   : > { %1457 = vrot.lane.b32.xlu0 %v7301_v39, %s6631_s9 }
 0x593   : > { %1844 = vrot.lane.b32.xlu0 %v7297_v36, %s7805_s10 }
 0x5db   : > { %v1613_v54 = vpop.xlane.xlu0 %1612 }
 0x5dc   : > { %v1614_v55 = vsub.f32 %v1607_v46, %v1613_v54  ;;  %v1368_v46 = vld [vmem:[#allocation9 + $0x18] sm:$0xff] }
 0x5dd   : > { %v2331_v54 = vld [vmem:[%s7865_s5] sm:$0xff] }
 0x5de   : > { %v1615_v56 = vmul.f32 1.442695, %v1614_v55  ;;  %v2332_v55 = vld [vmem:[%s7865_s5 + $0x8] sm:$0xff] }
 0x5e0   : > { %6060 = vpow2.f32 %v1615_v56  ;;  %v5816_v56 = vpack.c.bf16 %v2332_v55, %v2331_v54 }
 0x5ea   : > { %v6061_v57 = vpop.eup %6060 }
 0x5eb   : > { %v1617_v58 = vsel %vm1036_vm1, %v6061_v57, 0.0 }
 0x5ec   : > { %1618 = vadd.xlane.f32.xlu1 %v1617_v58  ;;  %v2334_v58 = vld [vmem:[%s7865_s5 + $0x18] sm:$0xff] }
 0x5fd   : > { %1622 = vrot.lane.b32.xlu1 %v7301_v39, %s6633_s18 }
 0x601   : > { %1846 = vrot.lane.b32.xlu1 %v7301_v39, %s7805_s10 }
 0x606   : > { %v1454_v59 = vpop.xlane.xlu0 %1453 }
 0x607   : > { %6062 = vrcp.f32 %v1454_v59 }
 0x60a   : > { %v1458_v60 = vpop.permute.xlu0 %1457 }
 0x60b   : > { %5533 = vmatpush3.msra.mxu0 %v1458_v60  ;;  %v5281_v60 = vld [vmem:[#allocation10] ss:$0 sm:$0xff] }
 0x60c   : > { %5542 = vmatprep.subr.mxu0 %v6627_v1 }
 0x60e   : > { %v1845_v12 = vpop.permute.xlu0 %1844 }
 0x611   : > { %v6063_v61 = vpop.eup %6062 }
 0x612   : > { %v1456_v62 = vmul.f32 %v6063_v61, %v6059_v52 }
 0x614   : > { %5535 = vmatmul.mubr.msk.f32.vlgmr.msra.gmra.mrb[4].mxu0 %vm1036_vm1, %v1456_v62 }
 0x615   : > { %5544 = vmatprep.mubr.msk.f32.mxu0 %vm6628_vm0, %v6627_v1 }
 0x679   : > { %v1619_v0 = vpop.xlane.xlu1 %1618 }
 0x67a   : > { %6064 = vrcp.f32 %v1619_v0 }
 0x67d   : > { %v1623_v3 = vpop.permute.xlu1 %1622 }
 0x67e   : > { %5543 = vmatpush3.msra.mxu0 %v1623_v3 }
 0x67f   : > { %5552 = vmatprep.subr.mxu0 %v6627_v1 }
 0x681   : > { %v1847_v10 = vpop.permute.xlu1 %1846 }
 0x684   : > { %v6065_v4 = vpop.eup %6064 }
 0x685   : > { %v1621_v5 = vmul.f32 %v6065_v4, %v6061_v57  ;;  %v2333_v57 = vld [vmem:[%s7865_s5 + $0x10] sm:$0xff]  ;;  %v5282_v4 = vld [vmem:[#allocation12] ss:$0 sm:$0xff] }
 0x686   : > { %v5819_v59 = vpack.c.bf16 %v2334_v58, %v2333_v57 }
 0x687   : > { %5545 = vmatmul.mubr.msk.f32.vlgmr.msra.gmra.mrb[6].mxu0 %vm1036_vm1, %v1621_v5 }
 0x688   : > { %5553 = vmatpush3.msra.mxu0 %v1365_v6  ;;  %5554 = vmatprep.mubr.msk.f32.mxu0 %vm6628_vm0, %v6627_v1 }
 0x689   : > { %5562 = vmatprep.subr.mxu0 %v6627_v1 }
 0x6e7   : > { %v1529_v7 = vpop.f32.mrb[4].mxu0 }
 0x6e8   : > { %v5536_v8 = vpop.f32.mrb[5].mxu0  ;;  %5555 = vmatmul.mubr.msk.f32.vlgmr.msra.gmra.mrb[8].mxu0 %vm1036_vm1, %v1529_v7 }
 0x6e9   : > { %5564 = vmatprep.mubr.msk.f32.mxu0 %vm6628_vm0, %v6627_v1 }
 0x75a   : > { %v1694_v9 = vpop.f32.mrb[6].mxu0 }
 0x75b   : > { %v5546_v11 = vpop.f32.mrb[7].mxu0  ;;  %5550 = vmatmul.mubr.msk.f32.vlgmr.msra.gmra.mrb[8].mxu1 %vm1036_vm1, %v1694_v9 }
 0x75c   : > { %5558 = vmatpush3.xpose.msk.msra.mxu1 %vm1036_vm1, %v1847_v10  ;;  %5559 = vmatprep.mubr.msk.f32.mxu1 %vm6628_vm0, %v6627_v1  ;;  %v7429_v11 = vld [vmem:[%s7866_s4] sm:$0xff]  ;;  %s7802_s4 = smov 48  }
 0x75d   : > { %5567 = vmatprep.subr.mxu1 %v6627_v1 }
 0x75f   : > { %5560 = vmatmul.mubr.msk.f32.vlgmr.msra.gmra.mrb[10].mxu1 %vm1036_vm1, %v1845_v12 }
 0x760   : > { %5569 = vmatprep.mubr.msk.f32.mxu1 %vm6628_vm0, %v6627_v1  ;;  %5568 = vmatpush3.msra.mxu1 %v1367_v33 }
 0x761   : > { %5577 = vmatprep.subr.mxu1 %v6627_v1 }
 0x7bb   : > { %v1840_v13 = vpop.f32.mrb[8].mxu0 }
 0x7bc   : > { %v5556_v14 = vpop.f32.mrb[9].mxu0 }
 0x82e   : > { %v1767_v15 = vpop.f32.mrb[8].mxu1 }
 0x82f   : > { %v1841_v16 = vadd.f32 %v1840_v13, %v1767_v15  ;;  %v5551_v17 = vpop.f32.mrb[9].mxu1 }
 0x832   : > { %v1918_v18 = vpop.f32.mrb[10].mxu1 }
 0x833   : > { %v5561_v19 = vpop.f32.mrb[11].mxu1  ;;  %v1922_v20 = vsel %vm1036_vm1, %v1918_v18, -inf }
 0x834   : > { %1923 = vmax.xlane.f32.xlu1 %v1922_v20 }
 0x845   : > { %2085 = vrot.lane.b32.xlu1 %v7301_v39, %s7803_s20 }
 0x849   : > { %2083 = vrot.lane.b32.xlu1 %v7297_v36, %s7803_s20 }
 0x8c1   : > { %v1924_v21 = vpop.xlane.xlu1 %1923 }
 0x8c2   : > { %v1925_v22 = vsub.f32 %v1918_v18, %v1924_v21 }
 0x8c4   : > { %v1926_v23 = vmul.f32 1.442695, %v1925_v22 }
 0x8c5   : > { %v2086_v29 = vpop.permute.xlu1 %2085 }
 0x8c6   : > { %6066 = vpow2.f32 %v1926_v23 }
 0x8c9   : > { %v2084_v32 = vpop.permute.xlu1 %2083 }
 0x8d0   : > { %v6067_v24 = vpop.eup %6066 }
 0x8d1   : > { %v1928_v25 = vsel %vm1036_vm1, %v6067_v24, 0.0 }
 0x8d2   : > { %1929 = vadd.xlane.f32.xlu0 %v1928_v25 }
 0x8e8   : > { %1933 = vrot.lane.b32.xlu0 %v7301_v39, %s7807_s1 }
 0x95f   : > { %v1930_v26 = vpop.xlane.xlu0 %1929 }
 0x960   : > { %6068 = vrcp.f32 %v1930_v26 }
 0x963   : > { %v1934_v27 = vpop.permute.xlu0 %1933 }
 0x964   : > { %5563 = vmatpush3.msra.mxu0 %v1934_v27 }
 0x965   : > { %5572 = vmatprep.subr.mxu0 %v6627_v1 }
 0x96a   : > { %v6069_v28 = vpop.eup %6068 }
 0x96b   : > { %v1932_v31 = vmul.f32 %v6069_v28, %v6067_v24 }
 0x96d   : > { %5565 = vmatmul.mubr.msk.f32.vlgmr.msra.gmra.mrb[10].mxu0 %vm1036_vm1, %v1932_v31 }
 0x96e   : > { %5573 = vmatpush3.xpose.msk.msra.mxu0 %vm1036_vm1, %v2086_v29  ;;  %5574 = vmatprep.mubr.msk.f32.mxu0 %vm6628_vm0, %v6627_v1 }
 0x96f   : > { %5582 = vmatprep.subr.mxu0 %v6627_v1 }
 0x971   : > { %5575 = vmatmul.mubr.msk.f32.vlgmr.msra.gmra.mrb[12].mxu0 %vm1036_vm1, %v2084_v32  ;;  %v2417_v32 = vld [vmem:[%s7867_s27 + $0x8] sm:$0xff]  ;;  %s7801_s27 = smov 40  }
 0x972   : > { %5584 = vmatprep.mubr.msk.f32.mxu0 %vm6628_vm0, %v6627_v1  ;;  %5583 = vmatpush3.msra.mxu0 %v1368_v46 }
 0x973   : > { %5598 = vmatprep.subr.mxu0 %v6627_v1 }
 0xa40   : > { %v2005_v34 = vpop.f32.mrb[10].mxu0 }
 0xa41   : > { %v5566_v35 = vpop.f32.mrb[11].mxu0  ;;  %5570 = vmatmul.mubr.msk.f32.vlgmr.msra.gmra.mrb[12].mxu1 %vm1036_vm1, %v2005_v34 }
 0xa42   : > { %5579 = vmatprep.mubr.msk.f32.mxu1 %vm6628_vm0, %v6627_v1 }
 0xa44   : > { %v2157_v36 = vpop.f32.mrb[12].mxu0 }
 0xa45   : > { %v5576_v37 = vpop.f32.mrb[13].mxu0  ;;  %v2161_v38 = vsel %vm1036_vm1, %v2157_v36, -inf }
 0xa46   : > { %2162 = vmax.xlane.f32.xlu0 %v2161_v38 }
 0xa5c   : > { %2172 = vrot.lane.b32.xlu0 %v7301_v39, %s7804_s2 }
 0xad3   : > { %v2163_v40 = vpop.xlane.xlu0 %2162 }
 0xad4   : > { %v2164_v41 = vsub.f32 %v2157_v36, %v2163_v40 }
 0xad6   : > { %v2165_v42 = vmul.f32 1.442695, %v2164_v41  ;;  %v2416_v41 = vld [vmem:[%s7868_s28] sm:$0xff] }
 0xad7   : > { %v2173_v43 = vpop.permute.xlu0 %2172 }
 0xad8   : > { %6070 = vpow2.f32 %v2165_v42  ;;  %5578 = vmatpush3.msra.mxu1 %v2173_v43 }
 0xad9   : > { %5815 = vmatprep.subr.bf16.mxu1 %v6629_v2 }
 0xae2   : > { %v6071_v44 = vpop.eup %6070 }
 0xae3   : > { %v2167_v45 = vsel %vm1036_vm1, %v6071_v44, 0.0 }
 0xae4   : > { %2168 = vadd.xlane.f32.xlu1 %v2167_v45 }
 0xb14   : > { %v2078_v47 = vpop.f32.mrb[12].mxu1 }
 0xb15   : > { %v2082_v48 = vadd.f32 %v2078_v47, %v1841_v16  ;;  %v5571_v49 = vpop.f32.mrb[13].mxu1 }
 0xb71   : > { %v2169_v39 = vpop.xlane.xlu1 %2168 }
 0xb72   : > { %6072 = vrcp.f32 %v2169_v39 }
 0xb7c   : > { %v6073_v50 = vpop.eup %6072 }
 0xb7d   : > { %v2171_v51 = vmul.f32 %v6073_v50, %v6071_v44 }
 0xb7f   : > { %5580 = vmatmul.mubr.msk.f32.vlgmr.msra.gmra.mrb[14].mxu1 %vm1036_vm1, %v2171_v51 }
 0xb80   : > { %5595 = vmatprep.mubr.msk.f32.mxu1 %vm6628_vm0, %v6627_v1  ;;  %5817 = vmatpush3.bf16.msra.mxu1 %v5816_v56 }
 0xb81   : > { %5818 = vmatprep.subr.bf16.mxu1 %v6629_v2 }
 0xb84   : > { %5820 = vmatpush3.bf16.msra.mxu1 %v5819_v59 }
 0xb85   : > { %5608 = vmatprep.subr.mxu1 %v6627_v1 }
 0xc52   : > { %v2244_v52 = vpop.f32.mrb[14].mxu1 }
 0xc53   : > { %v5581_v53 = vpop.f32.mrb[15].mxu1  ;;  %5585 = vmatmul.mubr.msk.f32.vlgmr.msra.gmra.mrb[14].mxu0 %vm1036_vm1, %v2244_v52 }
 0xc54   : > { %5600 = vmatprep.mubr.msk.f32.mxu0 %vm6628_vm0, %v6627_v1 }
 0xd26   : > { %v2317_v61 = vpop.f32.mrb[14].mxu0 }
 0xd27   : > { %v2321_v62 = vadd.f32 %v2317_v61, %v2082_v48  ;;  %v5586_v63 = vpop.f32.mrb[15].mxu0 }
 0xd29   : > { %v2328_v0 = vadd.f32 %v5281_v60, %v2321_v62 }
 0xd2b   : > { %v7398_v3 = vadd.f32 %v2328_v0, %v7291_v30 }
 0xd2d   : > { %5596 = vmatmul.mubr.msk.f32.vlgmr.msra.gmra.mrb[16].mxu1 %vm1206_vm4, %v7398_v3 }
 0xd2e   : > { %5610 = vmatprep.mubr.msk.f32.mxu1 %vm6628_vm0, %v6627_v1 }
 0xe00   : > { %v2411_v5 = vpop.f32.mrb[16].mxu1 }
 0xe01   : > { %v7404_v6 = vadd.f32 %v5282_v4, %v2411_v5  ;;  %v5597_v7 = vpop.f32.mrb[17].mxu1 }
 0xe02   : > { %v2418_v7 = vld [vmem:[%s7868_s28 + $0x10] sm:$0xff] }
 0xe03   : > { %2588 = vrot.lane.b32.xlu0 %v7404_v6, %s6633_s18  ;;  %2422 = vrot.lane.b32.xlu1 %v7404_v6, %s6631_s9  ;;  %v7411_v30 = vmul.f32 0.35355338, %v7404_v6 }
 0xe07   : > { %2586 = vrot.lane.b32.xlu1 %v7411_v30, %s6630_s7 }
 0xe75   : > { %v2589_v8 = vpop.permute.xlu0 %2588  ;;  %v2423_v9 = vpop.permute.xlu1 %2422 }
 0xe76   : > { %5599 = vmatpush3.xpose.msk.msra.mxu0 %vm1036_vm1, %v2423_v9  ;;  %5609 = vmatpush3.xpose.msk.msra.mxu1 %vm1036_vm1, %v2589_v8 }
 0xe77   : > { %5603 = vmatprep.subr.mxu0 %v6627_v1  ;;  %5618 = vmatprep.subr.mxu1 %v6627_v1 }
 0xe79   : > { %v2587_v10 = vpop.permute.xlu1 %2586  ;;  %5601 = vmatmul.mubr.msk.f32.vlgmr.msra.gmra.mrb[16].mxu0 %vm1036_vm1, %v7411_v30 }
 0xe7a   : > { %5611 = vmatmul.mubr.msk.f32.vlgmr.msra.gmra.mrb[18].mxu1 %vm1036_vm1, %v2587_v10  ;;  %5605 = vmatprep.mubr.msk.f32.mxu0 %vm6628_vm0, %v6627_v1 }
 0xe7b   : > { %5620 = vmatprep.mubr.msk.f32.mxu1 %vm6628_vm0, %v6627_v1  ;;  %5619 = vmatpush3.msra.mxu1 %v2417_v32 }
 0xe7c   : > { %5628 = vmatprep.subr.mxu1 %v6627_v1 }
 0xf4c   : > { %v2495_v12 = vpop.f32.mrb[16].mxu0 }
 0xf4d   : > { %v2496_v13 = vadd.f32 %v2495_v12, %v7429_v11  ;;  %v5602_v14 = vpop.f32.mrb[17].mxu0  ;;  %v2660_v15 = vpop.f32.mrb[18].mxu1 }
 0xf4e   : > { %v2661_v16 = vadd.f32 %v2660_v15, %v7429_v11  ;;  %v5612_v17 = vpop.f32.mrb[19].mxu1 }
 0xf4f   : > { %v2499_v18 = vsel %vm1036_vm1, %v2496_v13, -inf }
 0xf50   : > { %2500 = vmax.xlane.f32.xlu0 %v2499_v18  ;;  %v2664_v19 = vsel %vm1036_vm1, %v2661_v16, -inf }
 0xf51   : > { %2665 = vmax.xlane.f32.xlu1 %v2664_v19  ;;  %v2419_v19 = vld [vmem:[%s7868_s28 + $0x18] sm:$0xff] }
 0xf62   : > { %2510 = vrot.lane.b32.xlu1 %v7404_v6, %s7806_s14 }
 0xf66   : > { %2899 = vrot.lane.b32.xlu1 %v7404_v6, %s7807_s1  ;;  %s7878_s1 = smov 48  }
 0xf6a   : > { %2897 = vrot.lane.b32.xlu1 %v7411_v30, %s7805_s10 }
 0xfdd   : > { %v2501_v20 = vpop.xlane.xlu0 %2500 }
 0xfde   : > { %v2502_v21 = vsub.f32 %v2496_v13, %v2501_v20  ;;  %v2666_v22 = vpop.xlane.xlu1 %2665 }
 0xfdf   : > { %v2667_v23 = vsub.f32 %v2661_v16, %v2666_v22 }
 0xfe0   : > { %v2503_v24 = vmul.f32 1.442695, %v2502_v21 }
 0xfe1   : > { %v2668_v25 = vmul.f32 1.442695, %v2667_v23 }
 0xfe2   : > { %6074 = vpow2.f32 %v2503_v24  ;;  %v2511_v26 = vpop.permute.xlu1 %2510 }
 0xfe3   : > { %5604 = vmatpush3.msra.mxu0 %v2511_v26  ;;  %6076 = vpow2.f32 %v2668_v25 }
 0xfe4   : > { %5613 = vmatprep.subr.mxu0 %v6627_v1 }
 0xfe6   : > { %v2900_v44 = vpop.permute.xlu1 %2899 }
 0xfea   : > { %v2898_v47 = vpop.permute.xlu1 %2897 }
 0xfec   : > { %v6075_v27 = vpop.eup %6074 }
 0xfed   : > { %v2505_v28 = vsel %vm1036_vm1, %v6075_v27, 0.0  ;;  %v6077_v29 = vpop.eup %6076 }
 0xfee   : > { %2506 = vadd.xlane.f32.xlu0 %v2505_v28  ;;  %v2670_v31 = vsel %vm1036_vm1, %v6077_v29, 0.0  ;;  %v5300_v28 = vld [vmem:[#allocation13] ss:$0 sm:$0xff] }
 0xff2   : > { %2671 = vadd.xlane.f32.xlu0 %v2670_v31 }
0x1008   : > { %2675 = vrot.lane.b32.xlu0 %v7404_v6, %s7808_s6 }
0x107b   : > { %v2507_v33 = vpop.xlane.xlu0 %2506 }
0x107c   : > { %6078 = vrcp.f32 %v2507_v33 }
0x107f   : > { %v2672_v34 = vpop.xlane.xlu0 %2671 }
0x1080   : > { %6080 = vrcp.f32 %v2672_v34 }
0x1083   : > { %v2676_v37 = vpop.permute.xlu0 %2675 }
0x1086   : > { %v6079_v35 = vpop.eup %6078 }
0x1087   : > { %v2509_v36 = vmul.f32 %v6079_v35, %v6075_v27 }
0x1089   : > { %5606 = vmatmul.mubr.msk.f32.vlgmr.msra.gmra.mrb[18].mxu0 %vm1036_vm1, %v2509_v36 }
0x108a   : > { %v6081_v38 = vpop.eup %6080  ;;  %5614 = vmatpush3.msra.mxu0 %v2676_v37  ;;  %5615 = vmatprep.mubr.msk.f32.mxu0 %vm6628_vm0, %v6627_v1 }
0x108b   : > { %v2674_v40 = vmul.f32 %v6081_v38, %v6077_v29  ;;  %5623 = vmatprep.subr.mxu0 %v6627_v1 }
0x108d   : > { %5616 = vmatmul.mubr.msk.f32.vlgmr.msra.gmra.mrb[20].mxu0 %vm1036_vm1, %v2674_v40 }
0x108e   : > { %5625 = vmatprep.mubr.msk.f32.mxu0 %vm6628_vm0, %v6627_v1  ;;  %5624 = vmatpush3.msra.mxu0 %v2416_v41 }
0x108f   : > { %5633 = vmatprep.subr.mxu0 %v6627_v1 }
0x115c   : > { %v2582_v42 = vpop.f32.mrb[18].mxu0 }
0x115d   : > { %v5607_v43 = vpop.f32.mrb[19].mxu0  ;;  %5626 = vmatmul.mubr.msk.f32.vlgmr.msra.gmra.mrb[22].mxu0 %vm1036_vm1, %v2582_v42  ;;  %v3413_v42 = vld [vmem:[%s7869_s12] sm:$0xff] }
0x115e   : > { %5635 = vmatprep.mubr.msk.f32.mxu0 %vm6628_vm0, %v6627_v1  ;;  %v3414_v43 = vld [vmem:[%s7869_s12 + $0x8] sm:$0xff] }
0x1160   : > { %v2747_v45 = vpop.f32.mrb[20].mxu0 }
0x1161   : > { %v5617_v46 = vpop.f32.mrb[21].mxu0  ;;  %5621 = vmatmul.mubr.msk.f32.vlgmr.msra.gmra.mrb[20].mxu1 %vm1036_vm1, %v2747_v45  ;;  %v3416_v45 = vld [vmem:[%s7869_s12 + $0x18] sm:$0xff] }
0x1162   : > { %5629 = vmatpush3.xpose.msk.msra.mxu1 %vm1036_vm1, %v2900_v44  ;;  %5630 = vmatprep.mubr.msk.f32.mxu1 %vm6628_vm0, %v6627_v1  ;;  %v5822_v44 = vpack.c.bf16 %v3414_v43, %v3413_v42 }
0x1163   : > { %5638 = vmatprep.subr.mxu1 %v6627_v1 }
0x1165   : > { %5631 = vmatmul.mubr.msk.f32.vlgmr.msra.gmra.mrb[22].mxu1 %vm1036_vm1, %v2898_v47 }
0x1166   : > { %5640 = vmatprep.mubr.msk.f32.mxu1 %vm6628_vm0, %v6627_v1  ;;  %5639 = vmatpush3.msra.mxu1 %v2418_v7  ;;  %v5303_v7 = vld [vmem:[#allocation18] ss:$0 sm:$0xff] }
0x1167   : > { %5648 = vmatprep.subr.mxu1 %v6627_v1 }
0x1230   : > { %v2893_v48 = vpop.f32.mrb[22].mxu0 }
0x1231   : > { %v5627_v49 = vpop.f32.mrb[23].mxu0 }
0x1234   : > { %v2820_v39 = vpop.f32.mrb[20].mxu1 }
0x1235   : > { %v2894_v50 = vadd.f32 %v2893_v48, %v2820_v39  ;;  %v5622_v51 = vpop.f32.mrb[21].mxu1 }
0x1238   : > { %v2971_v52 = vpop.f32.mrb[22].mxu1 }
0x1239   : > { %v2972_v53 = vadd.f32 %v2971_v52, %v7429_v11  ;;  %v5632_v54 = vpop.f32.mrb[23].mxu1 }
0x123b   : > { %v2975_v55 = vsel %vm1036_vm1, %v2972_v53, -inf }
0x123c   : > { %2976 = vmax.xlane.f32.xlu0 %v2975_v55 }
0x1252   : > { %2986 = vrot.lane.b32.xlu0 %v7404_v6, %s7802_s4 }
0x1256   : > { %3136 = vrot.lane.b32.xlu0 %v7411_v30, %s7803_s20 }
0x12c9   : > { %v2977_v56 = vpop.xlane.xlu0 %2976 }
0x12ca   : > { %v2978_v57 = vsub.f32 %v2972_v53, %v2977_v56 }
0x12cc   : > { %v2979_v58 = vmul.f32 1.442695, %v2978_v57 }
0x12cd   : > { %v2987_v59 = vpop.permute.xlu0 %2986 }
0x12ce   : > { %6082 = vpow2.f32 %v2979_v58  ;;  %5634 = vmatpush3.msra.mxu0 %v2987_v59  ;;  %v5301_v59 = vld [vmem:[#allocation15] ss:$0 sm:$0xff] }
0x12cf   : > { %5643 = vmatprep.subr.mxu0 %v6627_v1 }
0x12d1   : > { %v3137_v5 = vpop.permute.xlu0 %3136 }
0x12d8   : > { %v6083_v60 = vpop.eup %6082 }
0x12d9   : > { %v2981_v61 = vsel %vm1036_vm1, %v6083_v60, 0.0 }
0x12da   : > { %2982 = vadd.xlane.f32.xlu1 %v2981_v61  ;;  %v5302_v61 = vld [vmem:[#allocation16] ss:$0 sm:$0xff] }
0x12eb   : > { %3138 = vrot.lane.b32.xlu1 %v7404_v6, %s7804_s2 }
0x1367   : > { %v2983_v62 = vpop.xlane.xlu1 %2982 }
0x1368   : > { %6084 = vrcp.f32 %v2983_v62 }
0x136b   : > { %v3139_v4 = vpop.permute.xlu1 %3138 }
0x1372   : > { %v6085_v63 = vpop.eup %6084 }
0x1373   : > { %v2985_v0 = vmul.f32 %v6085_v63, %v6083_v60 }
0x1375   : > { %5636 = vmatmul.mubr.msk.f32.vlgmr.msra.gmra.mrb[24].mxu0 %vm1036_vm1, %v2985_v0 }
0x1376   : > { %5644 = vmatpush3.xpose.msk.msra.mxu0 %vm1036_vm1, %v3139_v4  ;;  %5645 = vmatprep.mubr.msk.f32.mxu0 %vm6628_vm0, %v6627_v1 }
0x1377   : > { %5653 = vmatprep.subr.mxu0 %v6627_v1 }
0x1379   : > { %5646 = vmatmul.mubr.msk.f32.vlgmr.msra.gmra.mrb[26].mxu0 %vm1036_vm1, %v3137_v5 }
0x137a   : > { %5655 = vmatprep.mubr.msk.f32.mxu0 %vm6628_vm0, %v6627_v1  ;;  %5654 = vmatpush3.msra.mxu0 %v2419_v19 }
0x137b   : > { %5827 = vmatprep.subr.bf16.mxu0 %v6629_v2 }
0x1448   : > { %v3058_v30 = vpop.f32.mrb[24].mxu0 }
0x1449   : > { %v5637_v8 = vpop.f32.mrb[25].mxu0  ;;  %5641 = vmatmul.mubr.msk.f32.vlgmr.msra.gmra.mrb[24].mxu1 %vm1036_vm1, %v3058_v30 }
0x144a   : > { %5650 = vmatprep.mubr.msk.f32.mxu1 %vm6628_vm0, %v6627_v1 }
0x144c   : > { %v3210_v9 = vpop.f32.mrb[26].mxu0 }
0x144d   : > { %v3211_v10 = vadd.f32 %v3210_v9, %v7429_v11  ;;  %v5647_v12 = vpop.f32.mrb[27].mxu0 }
0x144e   : > { %v5305_v12 = vld [vmem:[#allocation19] ss:$0 sm:$0xff] }
0x144f   : > { %v3214_v13 = vsel %vm1036_vm1, %v3211_v10, -inf }
0x1450   : > { %3215 = vmax.xlane.f32.xlu1 %v3214_v13 }
0x14dd   : > { %v3216_v14 = vpop.xlane.xlu1 %3215 }
0x14de   : > { %v3217_v15 = vsub.f32 %v3211_v10, %v3216_v14 }
0x14e0   : > { %v3218_v16 = vmul.f32 1.442695, %v3217_v15 }
0x14e2   : > { %6086 = vpow2.f32 %v3218_v16 }
0x14ec   : > { %v6087_v17 = vpop.eup %6086 }
0x14ed   : > { %v3220_v18 = vsel %vm1036_vm1, %v6087_v17, 0.0 }
0x14ee   : > { %3221 = vadd.xlane.f32.xlu0 %v3220_v18 }
0x1504   : > { %3225 = vrot.lane.b32.xlu0 %v7404_v6, %s7801_s27  ;;  %s7870_s27 = sld [smem:[#allocation53_spill]] }
0x150a   : > { %s7871_s30 = smov %s7870_s27  ;;  %v3498_v47 = vld [vmem:[%s7870_s27] sm:$0xff]  ;;  %s7875_s27 = smov 112  }
0x150b   : > { %v3499_v48 = vld [vmem:[%s7871_s30 + $0x8] sm:$0xff]  ;;  %v3500_v49 = vld [vmem:[%s7871_s30 + $0x10] sm:$0xff]  ;;  %v3502_v52 = vld [vmem:[%s7871_s30 + $0x20] sm:$0xff] }
0x150c   : > { %v5828_v39 = vpack.c.bf16 %v3499_v48, %v3498_v47  ;;  %v3503_v53 = vld [vmem:[%s7871_s30 + $0x28] sm:$0xff]  ;;  %v3504_v0 = vld [vmem:[%s7871_s30 + $0x30] sm:$0xff]  ;;  %v3505_v4 = vld [vmem:[%s7871_s30 + $0x38] sm:$0xff] }
0x150d   : > { %v5834_v54 = vpack.c.bf16 %v3503_v53, %v3502_v52  ;;  %v5837_v5 = vpack.c.bf16 %v3505_v4, %v3504_v0 }
0x151c   : > { %v3131_v20 = vpop.f32.mrb[24].mxu1 }
0x151d   : > { %v3135_v21 = vadd.f32 %v3131_v20, %v2894_v50  ;;  %v5642_v22 = vpop.f32.mrb[25].mxu1  ;;  %v3501_v50 = vld [vmem:[%s7871_s30 + $0x18] sm:$0xff] }
0x151e   : > { %v5831_v51 = vpack.c.bf16 %v3501_v50, %v3500_v49 }
0x157b   : > { %v3222_v23 = vpop.xlane.xlu0 %3221 }
0x157c   : > { %6088 = vrcp.f32 %v3222_v23  ;;  %v5309_v23 = vld [vmem:[%s7865_s5 + $0x20] sm:$0xff] }
0x157f   : > { %v3226_v24 = vpop.permute.xlu0 %3225 }
0x1580   : > { %5649 = vmatpush3.msra.mxu1 %v3226_v24  ;;  %v5310_v24 = vld [vmem:[%s7865_s5 + $0x28] sm:$0xff] }
0x1581   : > { %5821 = vmatprep.subr.bf16.mxu1 %v6629_v2 }
0x1586   : > { %v6089_v25 = vpop.eup %6088 }
0x1587   : > { %v3224_v26 = vmul.f32 %v6089_v25, %v6087_v17  ;;  %v5840_v25 = vpack.c.bf16 %v5310_v24, %v5309_v23 }
0x1589   : > { %5651 = vmatmul.mubr.msk.f32.vlgmr.msra.gmra.mrb[26].mxu1 %vm1036_vm1, %v3224_v26  ;;  %v5311_v26 = vld [vmem:[%s7865_s5 + $0x30] sm:$0xff] }
0x158a   : > { %5666 = vmatprep.mubr.msk.f32.mxu1 %vm6628_vm0, %v6627_v1  ;;  %5823 = vmatpush3.bf16.msra.mxu1 %v5822_v44 }
0x158b   : > { %5824 = vmatprep.subr.bf16.mxu1 %v6629_v2 }
0x165c   : > { %v3297_v6 = vpop.f32.mrb[26].mxu1 }
0x165d   : > { %v5652_v27 = vpop.f32.mrb[27].mxu1  ;;  %5656 = vmatmul.mubr.msk.f32.vlgmr.msra.gmra.mrb[28].mxu0 %vm1036_vm1, %v3297_v6  ;;  %v5312_v6 = vld [vmem:[%s7865_s5 + $0x38] sm:$0xff] }
0x165e   : > { %5685 = vmatprep.mubr.msk.f32.mxu0 %vm6628_vm0, %v6627_v1  ;;  %5829 = vmatpush3.bf16.msra.mxu0 %v5828_v39  ;;  %v5843_v27 = vpack.c.bf16 %v5312_v6, %v5311_v26 }
0x165f   : > { %5830 = vmatprep.subr.bf16.mxu0 %v6629_v2 }
0x1662   : > { %5832 = vmatpush3.bf16.msra.mxu0 %v5831_v51 }
0x1663   : > { %5833 = vmatprep.subr.bf16.mxu0 %v6629_v2 }
0x1666   : > { %5835 = vmatpush3.bf16.msra.mxu0 %v5834_v54 }
0x1667   : > { %5836 = vmatprep.subr.bf16.mxu0 %v6629_v2 }
0x166a   : > { %5838 = vmatpush3.bf16.msra.mxu0 %v5837_v5 }
0x166b   : > { %5704 = vmatprep.subr.mxu0 %v6627_v1 }
0x1730   : > { %v3370_v29 = vpop.f32.mrb[28].mxu0 }
0x1731   : > { %v3374_v31 = vadd.f32 %v3370_v29, %v3135_v21  ;;  %v5657_v32 = vpop.f32.mrb[29].mxu0 }
0x1733   : > { %v3381_v33 = vadd.f32 %v5300_v28, %v3374_v31 }
0x1735   : > { %v3382_v34 = vadd.f32 %v3381_v33, %v7398_v3  ;;  %v3415_v3 = vld [vmem:[%s7869_s12 + $0x10] sm:$0xff] }
0x1736   : > { %v5825_v46 = vpack.c.bf16 %v3416_v45, %v3415_v3  ;;  %v5307_v33 = vld [vmem:[#allocation21] ss:$0 sm:$0xff] }
0x1737   : > { %v3385_v35 = vsel %vm1206_vm4, %v3382_v34, 0.0 }
0x1738   : > { %3386 = vadd.xlane.f32.xlu1 %v3385_v35  ;;  %5826 = vmatpush3.bf16.msra.mxu1 %v5825_v46  ;;  %v5308_v35 = vld [vmem:[#allocation22] ss:$0 sm:$0xff] }
0x1739   : > { %5839 = vmatprep.subr.bf16.mxu1 %v6629_v2 }
0x17c5   : > { %v3387_v36 = vpop.xlane.xlu1 %3386 }
0x17c6   : > { %v3389_v37 = vmul.f32 0.03125, %v3387_v36 }
0x17c8   : > { %v3390_v38 = vsub.f32 %v3382_v34, %v3389_v37 }
0x17ca   : > { %v3391_v40 = vmul.f32 %v3390_v38, %v3390_v38 }
0x17cc   : > { %v3392_v41 = vsel %vm1206_vm4, %v3391_v40, 0.0 }
0x17cd   : > { %3393 = vadd.xlane.f32.xlu1 %v3392_v41 }
0x185a   : > { %v3394_v55 = vpop.xlane.xlu1 %3393 }
0x185b   : > { %v3395_v56 = vmul.f32 0.03125, %v3394_v55 }
0x185d   : > { %v3396_v57 = vadd.f32 1e-05, %v3395_v56 }
0x185f   : > { %6090 = vrsqrt.f32 %v3396_v57 }
0x1869   : > { %v6091_v58 = vpop.eup %6090 }
0x186a   : > { %v3398_v60 = vmul.f32 %v6091_v58, %v3390_v38  ;;  %v5313_v38 = vld [vmem:[#allocation12 + $0x1] ss:$0 sm:$0xff] }
0x186c   : > { %v3405_v62 = vmul.f32 %v5301_v59, %v3398_v60 }
0x186e   : > { %v3412_v63 = vadd.f32 %v5302_v61, %v3405_v62 }
0x1870   : > { %5667 = vmatmul.mubr.msk.f32.vlgmr.msra.gmra.mrb[28].mxu1 %vm1206_vm4, %v3412_v63 }
0x1871   : > { %5696 = vmatprep.mubr.msk.f32.mxu1 %vm6628_vm0, %v6627_v1  ;;  %5841 = vmatpush3.bf16.msra.mxu1 %v5840_v25 }
0x1872   : > { %5842 = vmatprep.subr.bf16.mxu1 %v6629_v2 }
0x1875   : > { %5844 = vmatpush3.bf16.msra.mxu1 %v5843_v27 }
0x1876   : > { %5699 = vmatprep.subr.mxu1 %v6627_v1 }
0x1943   : > { %v3493_v30 = vpop.f32.mrb[28].mxu1 }
0x1944   : > { %v3494_v8 = vadd.f32 %v5303_v7, %v3493_v30  ;;  %v5668_v9 = vpop.f32.mrb[29].mxu1 }
0x1946   : > { %v3497_v10 = vmax.f32 %v3494_v8, 0.0 }
0x1948   : > { %5686 = vmatmul.mubr.msk.f32.vlgmr.msra.gmra.mrb[30].mxu0 %vm3513_vm5, %v3497_v10 }
0x1949   : > { %5706 = vmatprep.mubr.msk.f32.mxu0 %vm6628_vm0, %v6627_v1 }
0x1a1b   : > { %v3583_v13 = vpop.f32.mrb[30].mxu0 }
0x1a1c   : > { %v3584_v14 = vadd.f32 %v5305_v12, %v3583_v13  ;;  %v5687_v15 = vpop.f32.mrb[31].mxu0  ;;  %v5315_v12 = vld [vmem:[%s7868_s28 + $0x20] sm:$0xff] }
0x1a1e   : > { %v3587_v16 = vadd.f32 %v3584_v14, %v3412_v63  ;;  %v5316_v63 = vld [vmem:[%s7868_s28 + $0x28] sm:$0xff] }
0x1a20   : > { %v3590_v17 = vsel %vm1206_vm4, %v3587_v16, 0.0 }
0x1a21   : > { %3591 = vadd.xlane.f32.xlu1 %v3590_v17 }
0x1aae   : > { %v3592_v18 = vpop.xlane.xlu1 %3591 }
0x1aaf   : > { %v3593_v19 = vmul.f32 0.03125, %v3592_v18 }
0x1ab1   : > { %v3594_v20 = vsub.f32 %v3587_v16, %v3593_v19 }
0x1ab3   : > { %v3595_v21 = vmul.f32 %v3594_v20, %v3594_v20 }
0x1ab5   : > { %v3596_v22 = vsel %vm1206_vm4, %v3595_v21, 0.0 }
0x1ab6   : > { %3597 = vadd.xlane.f32.xlu1 %v3596_v22 }
0x1b43   : > { %v3598_v28 = vpop.xlane.xlu1 %3597 }
0x1b44   : > { %v3599_v29 = vmul.f32 0.03125, %v3598_v28 }
0x1b46   : > { %v3600_v31 = vadd.f32 1e-05, %v3599_v29 }
0x1b48   : > { %6092 = vrsqrt.f32 %v3600_v31 }
0x1b52   : > { %v6093_v32 = vpop.eup %6092 }
0x1b53   : > { %v3602_v34 = vmul.f32 %v6093_v32, %v3594_v20 }
0x1b55   : > { %v3609_v36 = vmul.f32 %v5307_v33, %v3602_v34 }
0x1b57   : > { %v7580_v37 = vadd.f32 %v5308_v35, %v3609_v36 }
0x1b59   : > { %5697 = vmatmul.mubr.msk.f32.vlgmr.msra.gmra.mrb[30].mxu1 %vm1206_vm4, %v7580_v37 }
0x1b5a   : > { %5701 = vmatprep.mubr.msk.f32.mxu1 %vm6628_vm0, %v6627_v1 }
0x1c2c   : > { %v3699_v40 = vpop.f32.mrb[30].mxu1 }
0x1c2d   : > { %v7586_v41 = vadd.f32 %v5313_v38, %v3699_v40  ;;  %v5698_v42 = vpop.f32.mrb[31].mxu1 }
0x1c2e   : > { %v5317_v42 = vld [vmem:[%s7868_s28 + $0x30] sm:$0xff] }
0x1c2f   : > { %3878 = vrot.lane.b32.xlu0 %v7586_v41, %s6633_s18  ;;  %3712 = vrot.lane.b32.xlu1 %v7586_v41, %s6631_s9  ;;  %v7593_v43 = vmul.f32 0.35355338, %v7586_v41  ;;  %s7873_s9 = smov 80   ;;  %s7874_s18 = smov 64  }
0x1c33   : > { %3876 = vrot.lane.b32.xlu0 %v7593_v43, %s6630_s7  ;;  %s7872_s7 = smov 56  }
0x1ca1   : > { %v3713_v44 = vpop.permute.xlu1 %3712  ;;  %v3879_v3 = vpop.permute.xlu0 %3878 }
0x1ca2   : > { %5700 = vmatpush3.xpose.msk.msra.mxu1 %vm1036_vm1, %v3713_v44 }
0x1ca3   : > { %5709 = vmatprep.subr.mxu1 %v6627_v1 }
0x1ca5   : > { %5702 = vmatmul.mubr.msk.f32.vlgmr.msra.gmra.mrb[32].mxu1 %vm1036_vm1, %v7593_v43  ;;  %v3877_v45 = vpop.permute.xlu0 %3876 }
0x1ca6   : > { %5710 = vmatpush3.xpose.msk.msra.mxu1 %vm1036_vm1, %v3879_v3  ;;  %5711 = vmatprep.mubr.msk.f32.mxu1 %vm6628_vm0, %v6627_v1 }
0x1ca7   : > { %5719 = vmatprep.subr.mxu1 %v6627_v1 }
0x1ca9   : > { %5712 = vmatmul.mubr.msk.f32.vlgmr.msra.gmra.mrb[34].mxu1 %vm1036_vm1, %v3877_v45 }
0x1caa   : > { %5721 = vmatprep.mubr.msk.f32.mxu1 %vm6628_vm0, %v6627_v1  ;;  %5720 = vmatpush3.msra.mxu1 %v5316_v63 }
0x1cab   : > { %5729 = vmatprep.subr.mxu1 %v6627_v1 }
0x1d78   : > { %v3785_v46 = vpop.f32.mrb[32].mxu1 }
0x1d79   : > { %v3786_v47 = vadd.f32 %v3785_v46, %v7429_v11  ;;  %v5703_v48 = vpop.f32.mrb[33].mxu1 }
0x1d7b   : > { %v3789_v49 = vsel %vm1036_vm1, %v3786_v47, -inf }
0x1d7c   : > { %3790 = vmax.xlane.f32.xlu0 %v3789_v49  ;;  %v3950_v39 = vpop.f32.mrb[34].mxu1 }
0x1d7d   : > { %v3951_v50 = vadd.f32 %v3950_v39, %v7429_v11  ;;  %v5713_v51 = vpop.f32.mrb[35].mxu1 }
0x1d7f   : > { %v3954_v52 = vsel %vm1036_vm1, %v3951_v50, -inf }
0x1d80   : > { %3955 = vmax.xlane.f32.xlu1 %v3954_v52 }
0x1d91   : > { %3965 = vrot.lane.b32.xlu1 %v7586_v41, %s7872_s7  ;;  %s7879_s7 = smov 40  }
0x1d95   : > { %4189 = vrot.lane.b32.xlu1 %v7586_v41, %s7873_s9 }
0x1e09   : > { %v3791_v53 = vpop.xlane.xlu0 %3790 }
0x1e0a   : > { %v3792_v54 = vsub.f32 %v3786_v47, %v3791_v53 }
0x1e0c   : > { %v3793_v55 = vmul.f32 1.442695, %v3792_v54 }
0x1e0d   : > { %v3956_v56 = vpop.xlane.xlu1 %3955 }
0x1e0e   : > { %6094 = vpow2.f32 %v3793_v55  ;;  %v3957_v57 = vsub.f32 %v3951_v50, %v3956_v56 }
0x1e10   : > { %v3958_v58 = vmul.f32 1.442695, %v3957_v57 }
0x1e11   : > { %v3966_v8 = vpop.permute.xlu1 %3965 }
0x1e12   : > { %6096 = vpow2.f32 %v3958_v58 }
0x1e15   : > { %v4190_v16 = vpop.permute.xlu1 %4189 }
0x1e18   : > { %v6095_v59 = vpop.eup %6094 }
0x1e19   : > { %v3795_v60 = vsel %vm1036_vm1, %v6095_v59, 0.0 }
0x1e1a   : > { %3796 = vadd.xlane.f32.xlu0 %v3795_v60  ;;  %v5335_v60 = vld [vmem:[#allocation13 + $0x1] ss:$0 sm:$0xff] }
0x1e1c   : > { %v6097_v61 = vpop.eup %6096 }
0x1e1d   : > { %v3960_v62 = vsel %vm1036_vm1, %v6097_v61, 0.0 }
0x1e1e   : > { %3961 = vadd.xlane.f32.xlu0 %v3960_v62 }
0x1e34   : > { %3800 = vrot.lane.b32.xlu0 %v7586_v41, %s7874_s18 }
0x1e38   : > { %4187 = vrot.lane.b32.xlu0 %v7593_v43, %s7875_s27  ;;  %s7880_s27 = sld [smem:[#allocation54_spill]] }
0x1e3e   : > { %s1026_s20 = scalar_lea.vmem %s7880_s27, %s7238_s8 }
0x1ea7   : > { %v3797_v0 = vpop.xlane.xlu0 %3796 }
0x1ea8   : > { %6098 = vrcp.f32 %v3797_v0 }
0x1eab   : > { %v3962_v4 = vpop.xlane.xlu0 %3961 }
0x1eac   : > { %6100 = vrcp.f32 %v3962_v4 }
0x1eaf   : > { %v3801_v5 = vpop.permute.xlu0 %3800 }
0x1eb0   : > { %5705 = vmatpush3.msra.mxu0 %v3801_v5 }
0x1eb1   : > { %5714 = vmatprep.subr.mxu0 %v6627_v1 }
0x1eb2   : > { %v6099_v7 = vpop.eup %6098 }
0x1eb3   : > { %v3799_v30 = vmul.f32 %v6099_v7, %v6095_v59  ;;  %v4188_v18 = vpop.permute.xlu0 %4187 }
0x1eb5   : > { %5707 = vmatmul.mubr.msk.f32.vlgmr.msra.gmra.mrb[32].mxu0 %vm1036_vm1, %v3799_v30 }
0x1eb6   : > { %v6101_v9 = vpop.eup %6100  ;;  %5715 = vmatpush3.msra.mxu0 %v3966_v8  ;;  %5716 = vmatprep.mubr.msk.f32.mxu0 %vm6628_vm0, %v6627_v1 }
0x1eb7   : > { %v3964_v10 = vmul.f32 %v6101_v9, %v6097_v61  ;;  %5724 = vmatprep.subr.mxu0 %v6627_v1 }
0x1eb9   : > { %5717 = vmatmul.mubr.msk.f32.vlgmr.msra.gmra.mrb[34].mxu0 %vm1036_vm1, %v3964_v10 }
0x1eba   : > { %5726 = vmatprep.mubr.msk.f32.mxu0 %vm6628_vm0, %v6627_v1  ;;  %5725 = vmatpush3.msra.mxu0 %v5315_v12  ;;  %v5338_v12 = vld [vmem:[%s7869_s12 + $0x20] sm:$0xff] }
0x1ebb   : > { %5734 = vmatprep.subr.mxu0 %v6627_v1 }
0x1f88   : > { %v3872_v13 = vpop.f32.mrb[32].mxu0 }
0x1f89   : > { %v5708_v14 = vpop.f32.mrb[33].mxu0  ;;  %5727 = vmatmul.mubr.msk.f32.vlgmr.msra.gmra.mrb[36].mxu0 %vm1036_vm1, %v3872_v13  ;;  %v5339_v13 = vld [vmem:[%s7869_s12 + $0x28] sm:$0xff] }
0x1f8a   : > { %5736 = vmatprep.mubr.msk.f32.mxu0 %vm6628_vm0, %v6627_v1  ;;  %v5846_v14 = vpack.c.bf16 %v5339_v13, %v5338_v12 }
0x1f8c   : > { %v4037_v15 = vpop.f32.mrb[34].mxu0 }
0x1f8d   : > { %v5718_v17 = vpop.f32.mrb[35].mxu0  ;;  %5722 = vmatmul.mubr.msk.f32.vlgmr.msra.gmra.mrb[36].mxu1 %vm1036_vm1, %v4037_v15  ;;  %v5341_v15 = vld [vmem:[%s7869_s12 + $0x38] sm:$0xff] }
0x1f8e   : > { %5730 = vmatpush3.xpose.msk.msra.mxu1 %vm1036_vm1, %v4190_v16  ;;  %5731 = vmatprep.mubr.msk.f32.mxu1 %vm6628_vm0, %v6627_v1  ;;  %v5344_v17 = vld [vmem:[%s7871_s30 + $0x40] sm:$0xff] }
0x1f8f   : > { %5739 = vmatprep.subr.mxu1 %v6627_v1 }
0x1f91   : > { %5732 = vmatmul.mubr.msk.f32.vlgmr.msra.gmra.mrb[38].mxu1 %vm1036_vm1, %v4188_v18  ;;  %v5345_v18 = vld [vmem:[%s7871_s30 + $0x48] sm:$0xff] }
0x1f92   : > { %5741 = vmatprep.mubr.msk.f32.mxu1 %vm6628_vm0, %v6627_v1  ;;  %5740 = vmatpush3.msra.mxu1 %v5317_v42 }
0x1f93   : > { %5749 = vmatprep.subr.mxu1 %v6627_v1 }
0x205c   : > { %v4183_v19 = vpop.f32.mrb[36].mxu0 }
0x205d   : > { %v5728_v20 = vpop.f32.mrb[37].mxu0 }
0x205e   : > { %v5852_v20 = vpack.c.bf16 %v5345_v18, %v5344_v17 }
0x2060   : > { %v4110_v21 = vpop.f32.mrb[36].mxu1 }
0x2061   : > { %v4184_v22 = vadd.f32 %v4183_v19, %v4110_v21  ;;  %v5723_v23 = vpop.f32.mrb[37].mxu1  ;;  %v5346_v19 = vld [vmem:[%s7871_s30 + $0x50] sm:$0xff]  ;;  %v5347_v21 = vld [vmem:[%s7871_s30 + $0x58] sm:$0xff] }
0x2062   : > { %v5348_v23 = vld [vmem:[%s7871_s30 + $0x60] sm:$0xff] }
0x2064   : > { %v4261_v24 = vpop.f32.mrb[38].mxu1 }
0x2065   : > { %v4262_v25 = vadd.f32 %v4261_v24, %v7429_v11  ;;  %v5733_v26 = vpop.f32.mrb[39].mxu1  ;;  %v5349_v24 = vld [vmem:[%s7871_s30 + $0x68] sm:$0xff] }
0x2067   : > { %v4265_v6 = vsel %vm1036_vm1, %v4262_v25, -inf }
0x2068   : > { %4266 = vmax.xlane.f32.xlu1 %v4265_v6 }
0x2079   : > { %4428 = vrot.lane.b32.xlu1 %v7586_v41, %s7876_s11 }
0x207d   : > { %4426 = vrot.lane.b32.xlu1 %v7593_v43, %s7877_s15 }
0x20f5   : > { %v4267_v27 = vpop.xlane.xlu1 %4266 }
0x20f6   : > { %v4268_v28 = vsub.f32 %v4262_v25, %v4267_v27  ;;  %v5858_v25 = vpack.c.bf16 %v5349_v24, %v5348_v23 }
0x20f8   : > { %v4269_v29 = vmul.f32 1.442695, %v4268_v28 }
0x20f9   : > { %v4429_v36 = vpop.permute.xlu1 %4428 }
0x20fa   : > { %6102 = vpow2.f32 %v4269_v29  ;;  %v5336_v29 = vld [vmem:[#allocation15 + $0x1] ss:$0 sm:$0xff] }
0x20fd   : > { %v4427_v40 = vpop.permute.xlu1 %4426 }
0x2104   : > { %v6103_v31 = vpop.eup %6102 }
0x2105   : > { %v4271_v32 = vsel %vm1036_vm1, %v6103_v31, 0.0 }
0x2106   : > { %4272 = vadd.xlane.f32.xlu0 %v4271_v32  ;;  %v5337_v32 = vld [vmem:[#allocation16 + $0x1] ss:$0 sm:$0xff] }
0x211c   : > { %4276 = vrot.lane.b32.xlu0 %v7586_v41, %s7878_s1 }
0x2193   : > { %v4273_v33 = vpop.xlane.xlu0 %4272 }
0x2194   : > { %6104 = vrcp.f32 %v4273_v33 }
0x2197   : > { %v4277_v34 = vpop.permute.xlu0 %4276 }
0x2198   : > { %5735 = vmatpush3.msra.mxu0 %v4277_v34 }
0x2199   : > { %5744 = vmatprep.subr.mxu0 %v6627_v1 }
0x219e   : > { %v6105_v35 = vpop.eup %6104 }
0x219f   : > { %v4275_v38 = vmul.f32 %v6105_v35, %v6103_v31  ;;  %v5350_v35 = vld [vmem:[%s7871_s30 + $0x70] sm:$0xff] }
0x21a1   : > { %5737 = vmatmul.mubr.msk.f32.vlgmr.msra.gmra.mrb[38].mxu0 %vm1036_vm1, %v4275_v38 }
0x21a2   : > { %5745 = vmatpush3.xpose.msk.msra.mxu0 %vm1036_vm1, %v4429_v36  ;;  %5746 = vmatprep.mubr.msk.f32.mxu0 %vm6628_vm0, %v6627_v1  ;;  %v5351_v36 = vld [vmem:[%s7871_s30 + $0x78] sm:$0xff] }
0x21a3   : > { %5754 = vmatprep.subr.mxu0 %v6627_v1  ;;  %v5861_v38 = vpack.c.bf16 %v5351_v36, %v5350_v35 }
0x21a5   : > { %5747 = vmatmul.mubr.msk.f32.vlgmr.msra.gmra.mrb[40].mxu0 %vm1036_vm1, %v4427_v40  ;;  %v5342_v40 = vld [vmem:[#allocation18 + $0x1] ss:$0 sm:$0xff] }
0x21a6   : > { %5756 = vmatprep.mubr.msk.f32.mxu0 %vm6628_vm0, %v6627_v1 }
0x2274   : > { %v4348_v43 = vpop.f32.mrb[38].mxu0 }
0x2275   : > { %v5738_v44 = vpop.f32.mrb[39].mxu0  ;;  %5742 = vmatmul.mubr.msk.f32.vlgmr.msra.gmra.mrb[40].mxu1 %vm1036_vm1, %v4348_v43 }
0x2276   : > { %5751 = vmatprep.mubr.msk.f32.mxu1 %vm6628_vm0, %v6627_v1 }
0x2278   : > { %v4500_v3 = vpop.f32.mrb[40].mxu0 }
0x2279   : > { %v4501_v45 = vadd.f32 %v4500_v3, %v7429_v11  ;;  %v5748_v46 = vpop.f32.mrb[41].mxu0  ;;  %v5318_v11 = vld [vmem:[%s7868_s28 + $0x38] sm:$0xff] }
0x227a   : > { %5755 = vmatpush3.msra.mxu0 %v5318_v11 }
0x227b   : > { %v4504_v47 = vsel %vm1036_vm1, %v4501_v45, -inf  ;;  %5851 = vmatprep.subr.bf16.mxu0 %v6629_v2 }
0x227c   : > { %4505 = vmax.xlane.f32.xlu0 %v4504_v47 }
0x2292   : > { %4515 = vrot.lane.b32.xlu0 %v7586_v41, %s7879_s7 }
0x2309   : > { %v4506_v48 = vpop.xlane.xlu0 %4505 }
0x230a   : > { %v4507_v49 = vsub.f32 %v4501_v45, %v4506_v48  ;;  %v5352_v45 = vld [vmem:[#allocation19 + $0x1] ss:$0 sm:$0xff] }
0x230c   : > { %v4508_v39 = vmul.f32 1.442695, %v4507_v49 }
0x230d   : > { %v4516_v50 = vpop.permute.xlu0 %4515 }
0x230e   : > { %6106 = vpow2.f32 %v4508_v39  ;;  %5750 = vmatpush3.msra.mxu1 %v4516_v50 }
0x230f   : > { %5845 = vmatprep.subr.bf16.mxu1 %v6629_v2 }
0x2318   : > { %v6107_v51 = vpop.eup %6106 }
0x2319   : > { %v4510_v52 = vsel %vm1036_vm1, %v6107_v51, 0.0 }
0x231a   : > { %4511 = vadd.xlane.f32.xlu1 %v4510_v52 }
0x2348   : > { %v4421_v41 = vpop.f32.mrb[40].mxu1 }
0x2349   : > { %v4425_v53 = vadd.f32 %v4421_v41, %v4184_v22  ;;  %v5743_v54 = vpop.f32.mrb[41].mxu1  ;;  %v5855_v22 = vpack.c.bf16 %v5347_v21, %v5346_v19  ;;  %v4913_v41 = vld [vmem:[#allocation24] sm:$0xff] }
0x23a7   : > { %v4512_v55 = vpop.xlane.xlu1 %4511 }
0x23a8   : > { %6108 = vrcp.f32 %v4512_v55  ;;  %v4915_v55 = vld [vmem:[#allocation24 + $0x10] sm:$0xff] }
0x23b2   : > { %v6109_v56 = vpop.eup %6108 }
0x23b3   : > { %v4514_v57 = vmul.f32 %v6109_v56, %v6107_v51  ;;  %v4916_v56 = vld [vmem:[#allocation24 + $0x18] sm:$0xff] }
0x23b5   : > { %5752 = vmatmul.mubr.msk.f32.vlgmr.msra.gmra.mrb[42].mxu1 %vm1036_vm1, %v4514_v57  ;;  %v5867_v57 = vpack.c.bf16 %v4916_v56, %v4915_v55 }
0x23b6   : > { %5767 = vmatprep.mubr.msk.f32.mxu1 %vm6628_vm0, %v6627_v1  ;;  %5847 = vmatpush3.bf16.msra.mxu1 %v5846_v14 }
0x23b7   : > { %5848 = vmatprep.subr.bf16.mxu1 %v6629_v2 }
0x2488   : > { %v4587_v58 = vpop.f32.mrb[42].mxu1 }
0x2489   : > { %v5753_v59 = vpop.f32.mrb[43].mxu1  ;;  %5757 = vmatmul.mubr.msk.f32.vlgmr.msra.gmra.mrb[42].mxu0 %vm1036_vm1, %v4587_v58 }
0x248a   : > { %5786 = vmatprep.mubr.msk.f32.mxu0 %vm6628_vm0, %v6627_v1  ;;  %5853 = vmatpush3.bf16.msra.mxu0 %v5852_v20 }
0x248b   : > { %5854 = vmatprep.subr.bf16.mxu0 %v6629_v2 }
0x248e   : > { %5856 = vmatpush3.bf16.msra.mxu0 %v5855_v22 }
0x248f   : > { %5857 = vmatprep.subr.bf16.mxu0 %v6629_v2 }
0x2492   : > { %5859 = vmatpush3.bf16.msra.mxu0 %v5858_v25 }
0x2493   : > { %5860 = vmatprep.subr.bf16.mxu0 %v6629_v2 }
0x2496   : > { %5862 = vmatpush3.bf16.msra.mxu0 %v5861_v38 }
0x255c   : > { %v4660_v61 = vpop.f32.mrb[42].mxu0 }
0x255d   : > { %v4664_v62 = vadd.f32 %v4660_v61, %v4425_v53  ;;  %v5758_v63 = vpop.f32.mrb[43].mxu0  ;;  %v4914_v53 = vld [vmem:[#allocation24 + $0x8] sm:$0xff] }
0x255e   : > { %v5864_v54 = vpack.c.bf16 %v4914_v53, %v4913_v41 }
0x255f   : > { %v4671_v0 = vadd.f32 %v5335_v60, %v4664_v62  ;;  %v5354_v62 = vld [vmem:[#allocation21 + $0x1] ss:$0 sm:$0xff] }
0x2561   : > { %v4672_v4 = vadd.f32 %v4671_v0, %v7580_v37  ;;  %v5340_v37 = vld [vmem:[%s7869_s12 + $0x30] sm:$0xff] }
0x2562   : > { %v5849_v16 = vpack.c.bf16 %v5341_v15, %v5340_v37  ;;  %v5355_v0 = vld [vmem:[#allocation22 + $0x1] ss:$0 sm:$0xff] }
0x2563   : > { %v4677_v5 = vsel %vm1206_vm4, %v4672_v4, 0.0 }
0x2564   : > { %4678 = vadd.xlane.f32.xlu1 %v4677_v5  ;;  %5850 = vmatpush3.bf16.msra.mxu1 %v5849_v16 }
0x2565   : > { %5863 = vmatprep.subr.bf16.mxu1 %v6629_v2 }
0x25f1   : > { %v4679_v7 = vpop.xlane.xlu1 %4678 }
0x25f2   : > { %v4680_v30 = vmul.f32 0.03125, %v4679_v7  ;;  %v5356_v7 = vld [vmem:[#allocation25] ss:$0 sm:$0xff] }
0x25f4   : > { %v4681_v8 = vsub.f32 %v4672_v4, %v4680_v30 }
0x25f6   : > { %v4682_v9 = vmul.f32 %v4681_v8, %v4681_v8 }
0x25f8   : > { %v4683_v10 = vsel %vm1206_vm4, %v4682_v9, 0.0 }
0x25f9   : > { %4684 = vadd.xlane.f32.xlu1 %v4683_v10 }
0x2686   : > { %v4685_v26 = vpop.xlane.xlu1 %4684 }
0x2687   : > { %v4686_v6 = vmul.f32 0.03125, %v4685_v26 }
0x2689   : > { %v4687_v27 = vadd.f32 1e-05, %v4686_v6 }
0x268b   : > { %6110 = vrsqrt.f32 %v4687_v27 }
0x2695   : > { %v6111_v28 = vpop.eup %6110 }
0x2696   : > { %v4689_v31 = vmul.f32 %v6111_v28, %v4681_v8 }
0x2698   : > { %v4696_v33 = vmul.f32 %v5336_v29, %v4689_v31 }
0x269a   : > { %v4703_v34 = vadd.f32 %v5337_v32, %v4696_v33 }
0x269c   : > { %5768 = vmatmul.mubr.msk.f32.vlgmr.msra.gmra.mrb[44].mxu1 %vm1206_vm4, %v4703_v34 }
0x269d   : > { %5797 = vmatprep.mubr.msk.f32.mxu1 %vm6628_vm0, %v6627_v1  ;;  %5865 = vmatpush3.bf16.msra.mxu1 %v5864_v54 }
0x269e   : > { %5866 = vmatprep.subr.bf16.mxu1 %v6629_v2 }
0x26a1   : > { %5868 = vmatpush3.bf16.msra.mxu1 %v5867_v57 }
0x276f   : > { %v4786_v42 = vpop.f32.mrb[44].mxu1 }
0x2770   : > { %v4787_v43 = vadd.f32 %v5342_v40, %v4786_v42  ;;  %v5769_v44 = vpop.f32.mrb[45].mxu1 }
0x2772   : > { %v4790_v3 = vmax.f32 %v4787_v43, 0.0 }
0x2774   : > { %5787 = vmatmul.mubr.msk.f32.vlgmr.msra.gmra.mrb[44].mxu0 %vm3513_vm5, %v4790_v3 }
0x2847   : > { %v4877_v46 = vpop.f32.mrb[44].mxu0 }
0x2848   : > { %v4878_v1 = vadd.f32 %v5352_v45, %v4877_v46  ;;  %v5788_v47 = vpop.f32.mrb[45].mxu0 }
0x284a   : > { %v4881_v48 = vadd.f32 %v4878_v1, %v4703_v34 }
0x284c   : > { %v4886_v49 = vsel %vm1206_vm4, %v4881_v48, 0.0 }
0x284d   : > { %4887 = vadd.xlane.f32.xlu1 %v4886_v49 }
0x28da   : > { %v4888_v39 = vpop.xlane.xlu1 %4887 }
0x28db   : > { %v4889_v50 = vmul.f32 0.03125, %v4888_v39 }
0x28dd   : > { %v4890_v51 = vsub.f32 %v4881_v48, %v4889_v50 }
0x28df   : > { %v4891_v52 = vmul.f32 %v4890_v51, %v4890_v51 }
0x28e1   : > { %v4892_v11 = vsel %vm1206_vm4, %v4891_v52, 0.0 }
0x28e2   : > { %4893 = vadd.xlane.f32.xlu1 %v4892_v11 }
0x296f   : > { %v4894_v58 = vpop.xlane.xlu1 %4893 }
0x2970   : > { %v4895_v59 = vmul.f32 0.03125, %v4894_v58 }
0x2972   : > { %v4896_v60 = vadd.f32 1e-05, %v4895_v59 }
0x2974   : > { %6112 = vrsqrt.f32 %v4896_v60 }
0x297e   : > { %v6113_v61 = vpop.eup %6112 }
0x297f   : > { %v4898_v63 = vmul.f32 %v6113_v61, %v4890_v51 }
0x2981   : > { %v4905_v4 = vmul.f32 %v5354_v62, %v4898_v63 }
0x2983   : > { %v4912_v5 = vadd.f32 %v5355_v0, %v4905_v4 }
0x2985   : > { %5798 = vmatmul.mubr.msk.f32.vlgmr.msra.gmra.mrb[46].mxu1 %vm1206_vm4, %v4912_v5 }
0x2a58   : > { %v4993_v2 = vpop.f32.mrb[46].mxu1 }
0x2a59   : > { %v4994_v30 = vadd.f32 %v5356_v7, %v4993_v2  ;;  %v5799_v8 = vpop.f32.mrb[47].mxu1 }
0x2a5b   : > { %4997 = vst [vmem:[%s1026_s20] sm:$0xff] %v4994_v30 }
0x2a5c PF: > { %s7881_s4 = sld [smem:[#allocation36_spill]] }
0x2a62   : > { %s45_s27 = sadd.s32 1, %s7881_s4  }
0x2a63   : > { %p42_p5 = scmp.ge.s32.totalorder %s45_s27, 4  }
0x2a65   :  { %44 = sbr.rel (!%p42_p5) target bundleno = 28 (0x1c), region = 234 }
0x2a6c   :  { %5017 = vsyncpa [#allocation3], 1 }
0x2a6d   :  { %5019 = vsyncpa [#allocation3 + $0x1], 1 }
0x2a6e   :  { %5020 = vsyncpa [#allocation5], 1 }
0x2a6f   :  { %5021 = vsyncpa [#allocation8], 1 }
0x2a70   :  { %5022 = vsyncpa [#allocation11], 1 }
0x2a71   :  { %5023 = vsyncpa [#allocation14], 1 }
0x2a72   :  { %5024 = vsyncpa [#allocation17], 1 }
0x2a73   :  { %5025 = vsyncpa [#allocation20], 1 }
0x2a74   :  { %5026 = vsyncpa [#allocation23], 1 }
0x2a75   :  { %5027 = vsyncpa [#allocation26], 1 }

</bundles_post_ra>
